<compile_context>
chip_gen: v7x
topology: tpu7x:2x2x1
jax: 0.10.0
libtpu: 0.0.40
codegen_flags: <defaults>
</compile_context>

<pallas_src>
import functools

import numpy as np
import jax
import jax.numpy as jnp
from jax.experimental import pallas as pl
from jax.experimental.pallas import tpu as pltpu


# ----------------------------------------------------------------------------
# Weight packing: everything into one lane-padded f32 slab (1 resident DMA)
# ----------------------------------------------------------------------------
def pack_weight_slab(params, lanes=128, align=8):
    """Pack all (cin, cout) weights / (1, cout) biases into one (R, 128) slab."""
    offsets = {}
    row = 0
    names = sorted(params)
    for name in names:
        arr = np.asarray(params[name], np.float32)
        ci, co = arr.shape
        assert co <= lanes, (name, arr.shape)
        offsets[name] = (row, (ci, co))
        row += ((ci + align - 1) // align) * align          # sublane-aligned rows
    total = max(align, ((row + align - 1) // align) * align)
    slab = np.zeros((total, lanes), np.float32)
    for name in names:
        r, (ci, co) = offsets[name]
        slab[r:r + ci, :co] = np.asarray(params[name], np.float32)
    return jnp.asarray(slab), offsets


def _num_batch_steps(batch):
    """2 grid steps on multi-TensorCore chips (v7x / megacore), else 1."""
    try:
        kind = jax.devices()[0].device_kind.lower()
    except Exception:
        return 1
    multi_tc = ("v7" in kind or "7x" in kind or "v4" in kind
                or ("v5" in kind and "lite" not in kind and "v5e" not in kind))
    if multi_tc and batch >= 2 and batch % 2 == 0:
        return 2
    return 1


# ----------------------------------------------------------------------------
# Fused Pallas kernel (whole forward, per batch block)
# ----------------------------------------------------------------------------
def frustum_fused(features, one_hot, w_slab, offsets, est_dim):
    B, N, C = features.shape
    nc = one_hot.shape[-1]
    R, L = w_slab.shape
    steps = _num_batch_steps(B)
    nb = B // steps                                   # batch elements per grid step
    oh3 = one_hot.reshape(B, 1, nc)
    f32 = jnp.float32

    def kernel(feat_ref, oh_ref, w_ref, pts_ref, bat_ref):
        def W(name):
            r, (ci, co) = offsets[name]               # static Python ints
            return w_ref[r:r + ci, 0:co]              # static slice of resident slab

        def dense(h, wname, bname, relu=True):
            y = jnp.dot(h, W(wname), preferred_element_type=f32) + W(bname)
            return jnp.maximum(y, 0.0) if relu else y

        x = feat_ref[...]                             # (nb, N, C) f32
        oh = oh_ref[...].reshape(nb, nc)              # (nb, nc)
        xf = x.reshape(nb * N, C)                     # stacked rows -> bigger matmuls

        # ---- instance-segmentation PointNet ----
        f1 = dense(xf, "inst_w1", "inst_b1")                              # (nb*N, 32)
        f2 = dense(f1, "inst_w2", "inst_b2")                              # (nb*N, 64)
        g = jnp.max(f2.reshape(nb, N, 64), axis=1)                        # (nb, 64)
        # concat([f1, g, one_hot]) @ Wc3 == f1@Wf3 + g@Wg3 + oh@Woh3
        gpart = (jnp.dot(g, W("inst_wg3"), preferred_element_type=f32)
                 + jnp.dot(oh, W("inst_woh3"), preferred_element_type=f32))
        h = jnp.maximum(
            jnp.dot(f1, W("inst_wf3"), preferred_element_type=f32).reshape(nb, N, 32)
            + gpart[:, None, :] + W("inst_b3"), 0.0)                      # (nb, N, 32)
        # logits head extended with a precomputed (fg - bg) score column so the
        # mask is an in-lane compare against 0 (no cross-lane shuffle).
        logits3 = dense(h.reshape(nb * N, 32), "inst_wout3", "inst_bout3",
                        relu=False)                                       # (nb*N, 3)
        logits = logits3[:, 0:2]
        maskf = (logits3[:, 2:3] > 0.0).astype(f32)                       # (nb*N, 1)
        mask3 = maskf.reshape(nb, N, 1)

        # ---- foreground masked mean + centering (exact divide) ----
        coords = x[:, :, 0:3]                                             # (nb, N, 3)
        count = jnp.sum(mask3, axis=1, keepdims=True)                     # (nb, 1, 1)
        mask_eff = jnp.where(count > 0.0, mask3, 1.0)                     # fg_count==0 fallback
        count_eff = jnp.sum(mask_eff, axis=1, keepdims=True)
        mean = jnp.sum(coords * mask_eff, axis=1, keepdims=True) / count_eff
        centered = coords - mean                                          # (nb, N, 3)
        cf = centered.reshape(nb * N, 3)

        # ---- center regression net (masked max-pool; ReLU>=0 so mask-mul == masked max)
        hc = dense(cf, "ctr_w1", "ctr_b1")
        hc = dense(hc, "ctr_w2", "ctr_b2")                                # (nb*N, 64)
        gc = jnp.max(hc.reshape(nb, N, 64) * mask_eff, axis=1)            # (nb, 64)
        gcf = jnp.maximum(
            jnp.dot(gc, W("ctr_wf1g"), preferred_element_type=f32)
            + jnp.dot(oh, W("ctr_wf1oh"), preferred_element_type=f32)
            + W("ctr_bf1"), 0.0)                                          # (nb, 32)
        delta = dense(gcf, "ctr_wout", "ctr_bout", relu=False)            # (nb, 3)

        # ---- box estimation net on re-centered coords ----
        c2 = (centered - delta[:, None, :]).reshape(nb * N, 3)
        hb = dense(c2, "box_w1", "box_b1")
        hb = dense(hb, "box_w2", "box_b2")
        hb = dense(hb, "box_w3", "box_b3")                                # (nb*N, 128)
        gb = jnp.max(hb.reshape(nb, N, 128) * mask_eff, axis=1)           # (nb, 128)
        gb1 = jnp.maximum(
            jnp.dot(gb, W("box_wf1g"), preferred_element_type=f32)
            + jnp.dot(oh, W("box_wf1oh"), preferred_element_type=f32)
            + W("box_bf1"), 0.0)                                          # (nb, 64)
        gb2 = dense(gb1, "box_wf2", "box_bf2")                            # (nb, 32)
        est = dense(gb2, "box_wout", "box_bout", relu=False)              # (nb, est_dim)

        # ---- lane-dense output compose: ONE full-width unmasked store each ----
        # (at production N consider bf16 for this slab to cut HBM write volume)
        pts = jnp.concatenate(
            [logits.reshape(nb, N, 2), mask3, centered,
             jnp.zeros((nb, N, 128 - 6), f32)], axis=-1)                  # (nb, N, 128)
        pts_ref[...] = pts

        bat = jnp.concatenate(
            [mean[:, 0, :], count[:, 0, :], delta, est,
             jnp.zeros((nb, 128 - 7 - est_dim), f32)], axis=-1)           # (nb, 128)
        bat_ref[...] = bat.reshape(nb, 1, 128)

    in_specs = [
        pl.BlockSpec((nb, N, C), lambda i: (i, 0, 0)),
        pl.BlockSpec((nb, 1, nc), lambda i: (i, 0, 0)),
        pl.BlockSpec((R, L), lambda i: (0, 0)),        # resident weight slab (1 DMA)
    ]
    out_specs = (
        pl.BlockSpec((nb, N, 128), lambda i: (i, 0, 0)),
        pl.BlockSpec((nb, 1, 128), lambda i: (i, 0, 0)),
    )
    return pl.pallas_call(
        kernel,
        grid=(steps,),
        out_shape=(jax.ShapeDtypeStruct((B, N, 128), jnp.float32),
                   jax.ShapeDtypeStruct((B, 1, 128), jnp.float32)),
        in_specs=in_specs,
        out_specs=out_specs,
        compiler_params=pltpu.CompilerParams(
            dimension_semantics=("parallel",),
            vmem_limit_bytes=32 * 1024 * 1024),
    )(features, oh3, w_slab)


# ----------------------------------------------------------------------------
# Parameters (simplified PointNet stand-ins, deterministic)
# ----------------------------------------------------------------------------
def build_params(key, in_ch, num_classes, NH, NS):
    est_dim = 3 + 2 * NH + 4 * NS

    def dense_p(k, cin, cout):
        kw, kb = jax.random.split(k)
        w = 0.1 * jax.random.normal(kw, (cin, cout), jnp.float32)
        b = 0.02 * jax.random.normal(kb, (1, cout), jnp.float32)
        return w, b

    ks = iter(jax.random.split(key, 32))
    p = {}
    # instance segmentation PointNet
    p["inst_w1"], p["inst_b1"] = dense_p(next(ks), in_ch, 32)
    p["inst_w2"], p["inst_b2"] = dense_p(next(ks), 32, 64)
    p["inst_wf3"], p["inst_b3"] = dense_p(next(ks), 32, 32)      # c3: per-point part
    p["inst_wg3"], _ = dense_p(next(ks), 64, 32)                 # c3: global part
    p["inst_woh3"], _ = dense_p(next(ks), num_classes, 32)       # c3: one-hot part
    wout, bout = dense_p(next(ks), 32, 2)
    # append (fg - bg) score column -> in-lane mask compare in the kernel
    p["inst_wout3"] = jnp.concatenate([wout, wout[:, 1:2] - wout[:, 0:1]], axis=1)
    p["inst_bout3"] = jnp.concatenate([bout, bout[:, 1:2] - bout[:, 0:1]], axis=1)
    # center regression net
    p["ctr_w1"], p["ctr_b1"] = dense_p(next(ks), 3, 32)
    p["ctr_w2"], p["ctr_b2"] = dense_p(next(ks), 32, 64)
    p["ctr_wf1g"], p["ctr_bf1"] = dense_p(next(ks), 64, 32)
    p["ctr_wf1oh"], _ = dense_p(next(ks), num_classes, 32)
    p["ctr_wout"], p["ctr_bout"] = dense_p(next(ks), 32, 3)
    # box estimation net
    p["box_w1"], p["box_b1"] = dense_p(next(ks), 3, 32)
    p["box_w2"], p["box_b2"] = dense_p(next(ks), 32, 64)
    p["box_w3"], p["box_b3"] = dense_p(next(ks), 64, 128)
    p["box_wf1g"], p["box_bf1"] = dense_p(next(ks), 128, 64)
    p["box_wf1oh"], _ = dense_p(next(ks), num_classes, 64)
    p["box_wf2"], p["box_bf2"] = dense_p(next(ks), 64, 32)
    p["box_wout"], p["box_bout"] = dense_p(next(ks), 32, est_dim)
    return p, est_dim


# ----------------------------------------------------------------------------
# Forward pass
# ----------------------------------------------------------------------------
def frustum_net_forward(features, one_hot, w_slab, size_templates,
                        offsets, est_dim, NH, NS, num_points_per_object=None):
    # TODO(synk): the reference randomly samples `num_points_per_object`
    # foreground points (F.logits_mask / np.random.choice) before the center /
    # box nets; per-batch random gather has no clean Pallas equivalent at this
    # scale, so the fused kernel uses a foreground-masked mean / max-pool over
    # all points instead (num_points_per_object is unused).
    pts_slab, bat_slab = frustum_fused(features, one_hot, w_slab, offsets, est_dim)

    mask_logits = pts_slab[..., 0:2]                 # (B, N, 2) channels-last
    fg_mean = bat_slab[:, 0, 0:3]                    # (B, 3)
    delta = bat_slab[:, 0, 4:7]                      # (B, 3)
    est = bat_slab[:, 0, 7:7 + est_dim]              # (B, est_dim)

    center_delta = est[:, :3]
    heading_scores = est[:, 3:3 + NH]
    heading_res_norm = est[:, 3 + NH:3 + 2 * NH]
    size_scores = est[:, 3 + 2 * NH:3 + 2 * NH + NS]
    size_res_norm = est[:, 3 + 2 * NH + NS:].reshape(-1, NS, 3)

    outputs = {}
    outputs["mask_logits"] = mask_logits
    outputs["center_reg"] = fg_mean + delta
    outputs["center"] = center_delta + outputs["center_reg"]
    outputs["heading_scores"] = heading_scores
    outputs["heading_residuals_normalized"] = heading_res_norm
    outputs["heading_residuals"] = heading_res_norm * (np.pi / NH)
    outputs["size_scores"] = size_scores
    outputs["size_residuals_normalized"] = size_res_norm
    outputs["size_residuals"] = size_res_norm * size_templates[None]   # (1, NS, 3)
    return outputs


# ----------------------------------------------------------------------------
# Main
# ----------------------------------------------------------------------------
if __name__ == "__main__":
    B = 2                        # batch
    N = 128                      # points per frustum
    M = 32                       # num_points_per_object (see TODO above)
    num_classes = 3
    NH = 4                       # num_heading_angle_bins
    NS = 3                       # num_size_templates
    extra_feature_channels = 1
    in_ch = 3 + extra_feature_channels

    key = jax.random.PRNGKey(0)
    kf, kl, kp, kt = jax.random.split(key, 4)
    features = jax.random.normal(kf, (B, N, in_ch), jnp.float32)
    labels = jax.random.randint(kl, (B,), 0, num_classes)
    one_hot_vectors = jax.nn.one_hot(labels, num_classes, dtype=jnp.float32)
    size_templates = jnp.abs(jax.random.normal(kt, (NS, 3), jnp.float32)) + 1.0

    params, est_dim = build_params(kp, in_ch, num_classes, NH, NS)
    w_slab, offsets = pack_weight_slab(params)       # host-side, once

    fwd = jax.jit(functools.partial(frustum_net_forward,
                                    offsets=offsets, est_dim=est_dim,
                                    NH=NH, NS=NS, num_points_per_object=M))
    outputs = fwd(features, one_hot_vectors, w_slab, size_templates)
    jax.block_until_ready(outputs)

    # Sanity-check shapes against the reference semantics.
    assert outputs["mask_logits"].shape == (B, N, 2)
    assert outputs["center_reg"].shape == (B, 3)
    assert outputs["center"].shape == (B, 3)
    assert outputs["heading_scores"].shape == (B, NH)
    assert outputs["heading_residuals"].shape == (B, NH)
    assert outputs["size_scores"].shape == (B, NS)
    assert outputs["size_residuals"].shape == (B, NS, 3)
    for leaf in jax.tree_util.tree_leaves(outputs):
        assert bool(jnp.all(jnp.isfinite(leaf)))

    print("KERNEL_OK")
</pallas_src>

<mosaic_0001>
module attributes {stable_mosaic.version = 11 : i64} {
  func.func @kernel(%arg0: i32, %arg1: memref<2x128x4xf32, #tpu.memory_space<vmem>>, %arg2: memref<2x1x3xf32, #tpu.memory_space<vmem>>, %arg3: memref<768x128xf32, #tpu.memory_space<vmem>>, %arg4: memref<2x128x128xf32, #tpu.memory_space<vmem>>, %arg5: memref<2x1x128xf32, #tpu.memory_space<vmem>>) attributes {dimension_semantics = [#tpu.dimension_semantics<parallel>], iteration_bounds = array<i64: 1>, scalar_prefetch = 0 : i64, scratch_operands = 0 : i64, tpu.core_type = #tpu.core_type<tc>, window_params = [{transform_indices = @transform_0, window_bounds = array<i64: 2, 128, 4>}, {transform_indices = @transform_1, window_bounds = array<i64: 2, 1, 3>}, {pipeline_mode = #tpu.pipeline_mode<synchronous>, transform_indices = @transform_2, window_bounds = array<i64: 768, 128>}, {transform_indices = @transform_3, window_bounds = array<i64: 2, 128, 128>}, {transform_indices = @transform_4, window_bounds = array<i64: 2, 1, 128>}]} {
    %c0 = arith.constant 0 : index
    %c0_0 = arith.constant 0 : index
    %c0_1 = arith.constant 0 : index
    %0 = vector.load %arg1[%c0, %c0_0, %c0_1] : memref<2x128x4xf32, #tpu.memory_space<vmem>>, vector<2x128x4xf32>
    %c0_2 = arith.constant 0 : index
    %c0_3 = arith.constant 0 : index
    %c0_4 = arith.constant 0 : index
    %1 = vector.load %arg2[%c0_2, %c0_3, %c0_4] : memref<2x1x3xf32, #tpu.memory_space<vmem>>, vector<2x1x3xf32>
    %2 = vector.shape_cast %1 : vector<2x1x3xf32> to vector<2x3xf32>
    %3 = vector.shape_cast %0 : vector<2x128x4xf32> to vector<256x4xf32>
    %c592 = arith.constant 592 : index
    %c0_5 = arith.constant 0 : index
    %4 = vector.load %arg3[%c592, %c0_5] : memref<768x128xf32, #tpu.memory_space<vmem>>, vector<4x32xf32>
    %cst = arith.constant dense<0.000000e+00> : vector<256x32xf32>
    %5 = tpu.matmul %3, %4, %cst {dimension_numbers = #tpu.dot_dimension_numbers<[1], [0], [0], [1], [0, 0, 1, 1], [], []>} : vector<256x4xf32>, vector<4x32xf32>, vector<256x32xf32> -> vector<256x32xf32>
    %c560 = arith.constant 560 : index
    %c0_6 = arith.constant 0 : index
    %6 = vector.load %arg3[%c560, %c0_6] : memref<768x128xf32, #tpu.memory_space<vmem>>, vector<1x32xf32>
    %7 = vector.broadcast %6 : vector<1x32xf32> to vector<256x32xf32>
    %8 = arith.addf %5, %7 : vector<256x32xf32>
    %cst_7 = arith.constant 0.000000e+00 : f32
    %9 = vector.broadcast %cst_7 : f32 to vector<256x32xf32>
    %10 = arith.maximumf %8, %9 : vector<256x32xf32>
    %c600 = arith.constant 600 : index
    %c0_8 = arith.constant 0 : index
    %11 = vector.load %arg3[%c600, %c0_8] : memref<768x128xf32, #tpu.memory_space<vmem>>, vector<32x64xf32>
    %cst_9 = arith.constant dense<0.000000e+00> : vector<256x64xf32>
    %12 = tpu.matmul %10, %11, %cst_9 {dimension_numbers = #tpu.dot_dimension_numbers<[1], [0], [0], [1], [0, 0, 1, 1], [], []>} : vector<256x32xf32>, vector<32x64xf32>, vector<256x64xf32> -> vector<256x64xf32>
    %c568 = arith.constant 568 : index
    %c0_10 = arith.constant 0 : index
    %13 = vector.load %arg3[%c568, %c0_10] : memref<768x128xf32, #tpu.memory_space<vmem>>, vector<1x64xf32>
    %14 = vector.broadcast %13 : vector<1x64xf32> to vector<256x64xf32>
    %15 = arith.addf %12, %14 : vector<256x64xf32>
    %cst_11 = arith.constant 0.000000e+00 : f32
    %16 = vector.broadcast %cst_11 : f32 to vector<256x64xf32>
    %17 = arith.maximumf %15, %16 : vector<256x64xf32>
    %18 = vector.shape_cast %17 : vector<256x64xf32> to vector<2x128x64xf32>
    %cst_12 = arith.constant dense<0xFF800000> : vector<2x64xf32>
    %19 = vector.multi_reduction <maximumf>, %18, %cst_12 [1] : vector<2x128x64xf32> to vector<2x64xf32>
    %c664 = arith.constant 664 : index
    %c0_13 = arith.constant 0 : index
    %20 = vector.load %arg3[%c664, %c0_13] : memref<768x128xf32, #tpu.memory_space<vmem>>, vector<64x32xf32>
    %cst_14 = arith.constant dense<0.000000e+00> : vector<2x32xf32>
    %21 = tpu.matmul %19, %20, %cst_14 {dimension_numbers = #tpu.dot_dimension_numbers<[1], [0], [0], [1], [0, 0, 1, 1], [], []>} : vector<2x64xf32>, vector<64x32xf32>, vector<2x32xf32> -> vector<2x32xf32>
    %c728 = arith.constant 728 : index
    %c0_15 = arith.constant 0 : index
    %22 = vector.load %arg3[%c728, %c0_15] : memref<768x128xf32, #tpu.memory_space<vmem>>, vector<3x32xf32>
    %cst_16 = arith.constant dense<0.000000e+00> : vector<2x32xf32>
    %23 = tpu.matmul %2, %22, %cst_16 {dimension_numbers = #tpu.dot_dimension_numbers<[1], [0], [0], [1], [0, 0, 1, 1], [], []>} : vector<2x3xf32>, vector<3x32xf32>, vector<2x32xf32> -> vector<2x32xf32>
    %24 = arith.addf %21, %23 : vector<2x32xf32>
    %c632 = arith.constant 632 : index
    %c0_17 = arith.constant 0 : index
    %25 = vector.load %arg3[%c632, %c0_17] : memref<768x128xf32, #tpu.memory_space<vmem>>, vector<32x32xf32>
    %cst_18 = arith.constant dense<0.000000e+00> : vector<256x32xf32>
    %26 = tpu.matmul %10, %25, %cst_18 {dimension_numbers = #tpu.dot_dimension_numbers<[1], [0], [0], [1], [0, 0, 1, 1], [], []>} : vector<256x32xf32>, vector<32x32xf32>, vector<256x32xf32> -> vector<256x32xf32>
    %27 = vector.shape_cast %26 : vector<256x32xf32> to vector<2x128x32xf32>
    %28 = vector.shape_cast %24 : vector<2x32xf32> to vector<2x1x32xf32>
    %29 = vector.broadcast %28 : vector<2x1x32xf32> to vector<2x128x32xf32>
    %30 = arith.addf %27, %29 : vector<2x128x32xf32>
    %c576 = arith.constant 576 : index
    %c0_19 = arith.constant 0 : index
    %31 = vector.load %arg3[%c576, %c0_19] : memref<768x128xf32, #tpu.memory_space<vmem>>, vector<1x32xf32>
    %32 = vector.shape_cast %31 : vector<1x32xf32> to vector<1x1x32xf32>
    %33 = vector.broadcast %32 : vector<1x1x32xf32> to vector<2x128x32xf32>
    %34 = arith.addf %30, %33 : vector<2x128x32xf32>
    %cst_20 = arith.constant 0.000000e+00 : f32
    %35 = vector.broadcast %cst_20 : f32 to vector<2x128x32xf32>
    %36 = arith.maximumf %34, %35 : vector<2x128x32xf32>
    %37 = vector.shape_cast %36 : vector<2x128x32xf32> to vector<256x32xf32>
    %c736 = arith.constant 736 : index
    %c0_21 = arith.constant 0 : index
    %38 = vector.load %arg3[%c736, %c0_21] : memref<768x128xf32, #tpu.memory_space<vmem>>, vector<32x3xf32>
    %cst_22 = arith.constant dense<0.000000e+00> : vector<256x3xf32>
    %39 = tpu.matmul %37, %38, %cst_22 {dimension_numbers = #tpu.dot_dimension_numbers<[1], [0], [0], [1], [0, 0, 1, 1], [], []>} : vector<256x32xf32>, vector<32x3xf32>, vector<256x3xf32> -> vector<256x3xf32>
    %c584 = arith.constant 584 : index
    %c0_23 = arith.constant 0 : index
    %40 = vector.load %arg3[%c584, %c0_23] : memref<768x128xf32, #tpu.memory_space<vmem>>, vector<1x3xf32>
    %41 = vector.broadcast %40 : vector<1x3xf32> to vector<256x3xf32>
    %42 = arith.addf %39, %41 : vector<256x3xf32>
    %43 = vector.extract_strided_slice %42 {offsets = [0, 0], sizes = [256, 2], strides = [1, 1]} : vector<256x3xf32> to vector<256x2xf32>
    %44 = vector.extract_strided_slice %42 {offsets = [0, 2], sizes = [256, 1], strides = [1, 1]} : vector<256x3xf32> to vector<256x1xf32>
    %cst_24 = arith.constant 0.000000e+00 : f32
    %45 = vector.broadcast %cst_24 : f32 to vector<256x1xf32>
    %46 = arith.cmpf ogt, %44, %45 : vector<256x1xf32>
    %47 = arith.extui %46 : vector<256x1xi1> to vector<256x1xi32>
    %48 = arith.sitofp %47 : vector<256x1xi32> to vector<256x1xf32>
    %49 = vector.shape_cast %48 : vector<256x1xf32> to vector<2x128x1xf32>
    %50 = vector.extract_strided_slice %0 {offsets = [0, 0, 0], sizes = [2, 128, 3], strides = [1, 1, 1]} : vector<2x128x4xf32> to vector<2x128x3xf32>
    %cst_25 = arith.constant dense<0.000000e+00> : vector<2x1xf32>
    %51 = vector.multi_reduction <add>, %49, %cst_25 [1] : vector<2x128x1xf32> to vector<2x1xf32>
    %52 = vector.shape_cast %51 : vector<2x1xf32> to vector<2x1x1xf32>
    %cst_26 = arith.constant 0.000000e+00 : f32
    %53 = vector.broadcast %cst_26 : f32 to vector<2x1x1xf32>
    %54 = arith.cmpf ogt, %52, %53 : vector<2x1x1xf32>
    %cst_27 = arith.constant 1.000000e+00 : f32
    %55 = vector.shape_cast %54 : vector<2x1x1xi1> to vector<2x1x1xi1>
    %56 = vector.broadcast %55 : vector<2x1x1xi1> to vector<2x128x1xi1>
    %57 = vector.broadcast %cst_27 : f32 to vector<2x128x1xf32>
    %58 = arith.select %56, %49, %57 : vector<2x128x1xi1>, vector<2x128x1xf32>
    %cst_28 = arith.constant dense<0.000000e+00> : vector<2x1xf32>
    %59 = vector.multi_reduction <add>, %58, %cst_28 [1] : vector<2x128x1xf32> to vector<2x1xf32>
    %60 = vector.shape_cast %59 : vector<2x1xf32> to vector<2x1x1xf32>
    %61 = vector.broadcast %58 : vector<2x128x1xf32> to vector<2x128x3xf32>
    %62 = arith.mulf %50, %61 : vector<2x128x3xf32>
    %cst_29 = arith.constant dense<0.000000e+00> : vector<2x3xf32>
    %63 = vector.multi_reduction <add>, %62, %cst_29 [1] : vector<2x128x3xf32> to vector<2x3xf32>
    %64 = vector.shape_cast %63 : vector<2x3xf32> to vector<2x1x3xf32>
    %65 = vector.broadcast %60 : vector<2x1x1xf32> to vector<2x1x3xf32>
    %66 = arith.divf %64, %65 : vector<2x1x3xf32>
    %67 = vector.broadcast %66 : vector<2x1x3xf32> to vector<2x128x3xf32>
    %68 = arith.subf %50, %67 : vector<2x128x3xf32>
    %69 = vector.shape_cast %68 : vector<2x128x3xf32> to vector<256x3xf32>
    %c416 = arith.constant 416 : index
    %c0_30 = arith.constant 0 : index
    %70 = vector.load %arg3[%c416, %c0_30] : memref<768x128xf32, #tpu.memory_space<vmem>>, vector<3x32xf32>
    %cst_31 = arith.constant dense<0.000000e+00> : vector<256x32xf32>
    %71 = tpu.matmul %69, %70, %cst_31 {dimension_numbers = #tpu.dot_dimension_numbers<[1], [0], [0], [1], [0, 0, 1, 1], [], []>} : vector<256x3xf32>, vector<3x32xf32>, vector<256x32xf32> -> vector<256x32xf32>
    %c384 = arith.constant 384 : index
    %c0_32 = arith.constant 0 : index
    %72 = vector.load %arg3[%c384, %c0_32] : memref<768x128xf32, #tpu.memory_space<vmem>>, vector<1x32xf32>
    %73 = vector.broadcast %72 : vector<1x32xf32> to vector<256x32xf32>
    %74 = arith.addf %71, %73 : vector<256x32xf32>
    %cst_33 = arith.constant 0.000000e+00 : f32
    %75 = vector.broadcast %cst_33 : f32 to vector<256x32xf32>
    %76 = arith.maximumf %74, %75 : vector<256x32xf32>
    %c424 = arith.constant 424 : index
    %c0_34 = arith.constant 0 : index
    %77 = vector.load %arg3[%c424, %c0_34] : memref<768x128xf32, #tpu.memory_space<vmem>>, vector<32x64xf32>
    %cst_35 = arith.constant dense<0.000000e+00> : vector<256x64xf32>
    %78 = tpu.matmul %76, %77, %cst_35 {dimension_numbers = #tpu.dot_dimension_numbers<[1], [0], [0], [1], [0, 0, 1, 1], [], []>} : vector<256x32xf32>, vector<32x64xf32>, vector<256x64xf32> -> vector<256x64xf32>
    %c392 = arith.constant 392 : index
    %c0_36 = arith.constant 0 : index
    %79 = vector.load %arg3[%c392, %c0_36] : memref<768x128xf32, #tpu.memory_space<vmem>>, vector<1x64xf32>
    %80 = vector.broadcast %79 : vector<1x64xf32> to vector<256x64xf32>
    %81 = arith.addf %78, %80 : vector<256x64xf32>
    %cst_37 = arith.constant 0.000000e+00 : f32
    %82 = vector.broadcast %cst_37 : f32 to vector<256x64xf32>
    %83 = arith.maximumf %81, %82 : vector<256x64xf32>
    %84 = vector.shape_cast %83 : vector<256x64xf32> to vector<2x128x64xf32>
    %85 = vector.broadcast %58 : vector<2x128x1xf32> to vector<2x128x64xf32>
    %86 = arith.mulf %84, %85 : vector<2x128x64xf32>
    %cst_38 = arith.constant dense<0xFF800000> : vector<2x64xf32>
    %87 = vector.multi_reduction <maximumf>, %86, %cst_38 [1] : vector<2x128x64xf32> to vector<2x64xf32>
    %c456 = arith.constant 456 : index
    %c0_39 = arith.constant 0 : index
    %88 = vector.load %arg3[%c456, %c0_39] : memref<768x128xf32, #tpu.memory_space<vmem>>, vector<64x32xf32>
    %cst_40 = arith.constant dense<0.000000e+00> : vector<2x32xf32>
    %89 = tpu.matmul %87, %88, %cst_40 {dimension_numbers = #tpu.dot_dimension_numbers<[1], [0], [0], [1], [0, 0, 1, 1], [], []>} : vector<2x64xf32>, vector<64x32xf32>, vector<2x32xf32> -> vector<2x32xf32>
    %c520 = arith.constant 520 : index
    %c0_41 = arith.constant 0 : index
    %90 = vector.load %arg3[%c520, %c0_41] : memref<768x128xf32, #tpu.memory_space<vmem>>, vector<3x32xf32>
    %cst_42 = arith.constant dense<0.000000e+00> : vector<2x32xf32>
    %91 = tpu.matmul %2, %90, %cst_42 {dimension_numbers = #tpu.dot_dimension_numbers<[1], [0], [0], [1], [0, 0, 1, 1], [], []>} : vector<2x3xf32>, vector<3x32xf32>, vector<2x32xf32> -> vector<2x32xf32>
    %92 = arith.addf %89, %91 : vector<2x32xf32>
    %c400 = arith.constant 400 : index
    %c0_43 = arith.constant 0 : index
    %93 = vector.load %arg3[%c400, %c0_43] : memref<768x128xf32, #tpu.memory_space<vmem>>, vector<1x32xf32>
    %94 = vector.broadcast %93 : vector<1x32xf32> to vector<2x32xf32>
    %95 = arith.addf %92, %94 : vector<2x32xf32>
    %cst_44 = arith.constant 0.000000e+00 : f32
    %96 = vector.broadcast %cst_44 : f32 to vector<2x32xf32>
    %97 = arith.maximumf %95, %96 : vector<2x32xf32>
    %c528 = arith.constant 528 : index
    %c0_45 = arith.constant 0 : index
    %98 = vector.load %arg3[%c528, %c0_45] : memref<768x128xf32, #tpu.memory_space<vmem>>, vector<32x3xf32>
    %cst_46 = arith.constant dense<0.000000e+00> : vector<2x3xf32>
    %99 = tpu.matmul %97, %98, %cst_46 {dimension_numbers = #tpu.dot_dimension_numbers<[1], [0], [0], [1], [0, 0, 1, 1], [], []>} : vector<2x32xf32>, vector<32x3xf32>, vector<2x3xf32> -> vector<2x3xf32>
    %c408 = arith.constant 408 : index
    %c0_47 = arith.constant 0 : index
    %100 = vector.load %arg3[%c408, %c0_47] : memref<768x128xf32, #tpu.memory_space<vmem>>, vector<1x3xf32>
    %101 = vector.broadcast %100 : vector<1x3xf32> to vector<2x3xf32>
    %102 = arith.addf %99, %101 : vector<2x3xf32>
    %103 = vector.shape_cast %102 : vector<2x3xf32> to vector<2x1x3xf32>
    %104 = vector.broadcast %103 : vector<2x1x3xf32> to vector<2x128x3xf32>
    %105 = arith.subf %68, %104 : vector<2x128x3xf32>
    %106 = vector.shape_cast %105 : vector<2x128x3xf32> to vector<256x3xf32>
    %c48 = arith.constant 48 : index
    %c0_48 = arith.constant 0 : index
    %107 = vector.load %arg3[%c48, %c0_48] : memref<768x128xf32, #tpu.memory_space<vmem>>, vector<3x32xf32>
    %cst_49 = arith.constant dense<0.000000e+00> : vector<256x32xf32>
    %108 = tpu.matmul %106, %107, %cst_49 {dimension_numbers = #tpu.dot_dimension_numbers<[1], [0], [0], [1], [0, 0, 1, 1], [], []>} : vector<256x3xf32>, vector<3x32xf32>, vector<256x32xf32> -> vector<256x32xf32>
    %c0_50 = arith.constant 0 : index
    %c0_51 = arith.constant 0 : index
    %109 = vector.load %arg3[%c0_50, %c0_51] : memref<768x128xf32, #tpu.memory_space<vmem>>, vector<1x32xf32>
    %110 = vector.broadcast %109 : vector<1x32xf32> to vector<256x32xf32>
    %111 = arith.addf %108, %110 : vector<256x32xf32>
    %cst_52 = arith.constant 0.000000e+00 : f32
    %112 = vector.broadcast %cst_52 : f32 to vector<256x32xf32>
    %113 = arith.maximumf %111, %112 : vector<256x32xf32>
    %c56 = arith.constant 56 : index
    %c0_53 = arith.constant 0 : index
    %114 = vector.load %arg3[%c56, %c0_53] : memref<768x128xf32, #tpu.memory_space<vmem>>, vector<32x64xf32>
    %cst_54 = arith.constant dense<0.000000e+00> : vector<256x64xf32>
    %115 = tpu.matmul %113, %114, %cst_54 {dimension_numbers = #tpu.dot_dimension_numbers<[1], [0], [0], [1], [0, 0, 1, 1], [], []>} : vector<256x32xf32>, vector<32x64xf32>, vector<256x64xf32> -> vector<256x64xf32>
    %c8 = arith.constant 8 : index
    %c0_55 = arith.constant 0 : index
    %116 = vector.load %arg3[%c8, %c0_55] : memref<768x128xf32, #tpu.memory_space<vmem>>, vector<1x64xf32>
    %117 = vector.broadcast %116 : vector<1x64xf32> to vector<256x64xf32>
    %118 = arith.addf %115, %117 : vector<256x64xf32>
    %cst_56 = arith.constant 0.000000e+00 : f32
    %119 = vector.broadcast %cst_56 : f32 to vector<256x64xf32>
    %120 = arith.maximumf %118, %119 : vector<256x64xf32>
    %c88 = arith.constant 88 : index
    %c0_57 = arith.constant 0 : index
    %121 = vector.load %arg3[%c88, %c0_57] : memref<768x128xf32, #tpu.memory_space<vmem>>, vector<64x128xf32>
    %cst_58 = arith.constant dense<0.000000e+00> : vector<256x128xf32>
    %122 = tpu.matmul %120, %121, %cst_58 {dimension_numbers = #tpu.dot_dimension_numbers<[1], [0], [0], [1], [0, 0, 1, 1], [], []>} : vector<256x64xf32>, vector<64x128xf32>, vector<256x128xf32> -> vector<256x128xf32>
    %c16 = arith.constant 16 : index
    %c0_59 = arith.constant 0 : index
    %123 = vector.load %arg3[%c16, %c0_59] : memref<768x128xf32, #tpu.memory_space<vmem>>, vector<1x128xf32>
    %124 = vector.broadcast %123 : vector<1x128xf32> to vector<256x128xf32>
    %125 = arith.addf %122, %124 : vector<256x128xf32>
    %cst_60 = arith.constant 0.000000e+00 : f32
    %126 = vector.broadcast %cst_60 : f32 to vector<256x128xf32>
    %127 = arith.maximumf %125, %126 : vector<256x128xf32>
    %128 = vector.shape_cast %127 : vector<256x128xf32> to vector<2x128x128xf32>
    %129 = vector.broadcast %58 : vector<2x128x1xf32> to vector<2x128x128xf32>
    %130 = arith.mulf %128, %129 : vector<2x128x128xf32>
    %cst_61 = arith.constant dense<0xFF800000> : vector<2x128xf32>
    %131 = vector.multi_reduction <maximumf>, %130, %cst_61 [1] : vector<2x128x128xf32> to vector<2x128xf32>
    %c152 = arith.constant 152 : index
    %c0_62 = arith.constant 0 : index
    %132 = vector.load %arg3[%c152, %c0_62] : memref<768x128xf32, #tpu.memory_space<vmem>>, vector<128x64xf32>
    %cst_63 = arith.constant dense<0.000000e+00> : vector<2x64xf32>
    %133 = tpu.matmul %131, %132, %cst_63 {dimension_numbers = #tpu.dot_dimension_numbers<[1], [0], [0], [1], [0, 0, 1, 1], [], []>} : vector<2x128xf32>, vector<128x64xf32>, vector<2x64xf32> -> vector<2x64xf32>
    %c280 = arith.constant 280 : index
    %c0_64 = arith.constant 0 : index
    %134 = vector.load %arg3[%c280, %c0_64] : memref<768x128xf32, #tpu.memory_space<vmem>>, vector<3x64xf32>
    %cst_65 = arith.constant dense<0.000000e+00> : vector<2x64xf32>
    %135 = tpu.matmul %2, %134, %cst_65 {dimension_numbers = #tpu.dot_dimension_numbers<[1], [0], [0], [1], [0, 0, 1, 1], [], []>} : vector<2x3xf32>, vector<3x64xf32>, vector<2x64xf32> -> vector<2x64xf32>
    %136 = arith.addf %133, %135 : vector<2x64xf32>
    %c24 = arith.constant 24 : index
    %c0_66 = arith.constant 0 : index
    %137 = vector.load %arg3[%c24, %c0_66] : memref<768x128xf32, #tpu.memory_space<vmem>>, vector<1x64xf32>
    %138 = vector.broadcast %137 : vector<1x64xf32> to vector<2x64xf32>
    %139 = arith.addf %136, %138 : vector<2x64xf32>
    %cst_67 = arith.constant 0.000000e+00 : f32
    %140 = vector.broadcast %cst_67 : f32 to vector<2x64xf32>
    %141 = arith.maximumf %139, %140 : vector<2x64xf32>
    %c288 = arith.constant 288 : index
    %c0_68 = arith.constant 0 : index
    %142 = vector.load %arg3[%c288, %c0_68] : memref<768x128xf32, #tpu.memory_space<vmem>>, vector<64x32xf32>
    %cst_69 = arith.constant dense<0.000000e+00> : vector<2x32xf32>
    %143 = tpu.matmul %141, %142, %cst_69 {dimension_numbers = #tpu.dot_dimension_numbers<[1], [0], [0], [1], [0, 0, 1, 1], [], []>} : vector<2x64xf32>, vector<64x32xf32>, vector<2x32xf32> -> vector<2x32xf32>
    %c32 = arith.constant 32 : index
    %c0_70 = arith.constant 0 : index
    %144 = vector.load %arg3[%c32, %c0_70] : memref<768x128xf32, #tpu.memory_space<vmem>>, vector<1x32xf32>
    %145 = vector.broadcast %144 : vector<1x32xf32> to vector<2x32xf32>
    %146 = arith.addf %143, %145 : vector<2x32xf32>
    %cst_71 = arith.constant 0.000000e+00 : f32
    %147 = vector.broadcast %cst_71 : f32 to vector<2x32xf32>
    %148 = arith.maximumf %146, %147 : vector<2x32xf32>
    %c352 = arith.constant 352 : index
    %c0_72 = arith.constant 0 : index
    %149 = vector.load %arg3[%c352, %c0_72] : memref<768x128xf32, #tpu.memory_space<vmem>>, vector<32x23xf32>
    %cst_73 = arith.constant dense<0.000000e+00> : vector<2x23xf32>
    %150 = tpu.matmul %148, %149, %cst_73 {dimension_numbers = #tpu.dot_dimension_numbers<[1], [0], [0], [1], [0, 0, 1, 1], [], []>} : vector<2x32xf32>, vector<32x23xf32>, vector<2x23xf32> -> vector<2x23xf32>
    %c40 = arith.constant 40 : index
    %c0_74 = arith.constant 0 : index
    %151 = vector.load %arg3[%c40, %c0_74] : memref<768x128xf32, #tpu.memory_space<vmem>>, vector<1x23xf32>
    %152 = vector.broadcast %151 : vector<1x23xf32> to vector<2x23xf32>
    %153 = arith.addf %150, %152 : vector<2x23xf32>
    %154 = vector.shape_cast %43 : vector<256x2xf32> to vector<2x128x2xf32>
    %cst_75 = arith.constant 0.000000e+00 : f32
    %155 = vector.broadcast %cst_75 : f32 to vector<2x128x122xf32>
    %156 = tpu.concatenate %154, %49, %68, %155 in 2 : vector<2x128x2xf32>, vector<2x128x1xf32>, vector<2x128x3xf32>, vector<2x128x122xf32> -> vector<2x128x128xf32>
    %c0_76 = arith.constant 0 : index
    %c0_77 = arith.constant 0 : index
    %c0_78 = arith.constant 0 : index
    %157 = vector.load %arg4[%c0_76, %c0_77, %c0_78] : memref<2x128x128xf32, #tpu.memory_space<vmem>>, vector<2x128x128xf32>
    tpu.vector_store %arg4[%c0_76, %c0_77, %c0_78], %156 {strides = array<i32>} : memref<2x128x128xf32, #tpu.memory_space<vmem>>, vector<2x128x128xf32>,
    %158 = vector.shape_cast %66 : vector<2x1x3xf32> to vector<2x3xf32>
    %159 = vector.shape_cast %52 : vector<2x1x1xf32> to vector<2x1xf32>
    %cst_79 = arith.constant 0.000000e+00 : f32
    %160 = vector.broadcast %cst_79 : f32 to vector<2x98xf32>
    %161 = tpu.concatenate %158, %159, %102, %153, %160 in 1 : vector<2x3xf32>, vector<2x1xf32>, vector<2x3xf32>, vector<2x23xf32>, vector<2x98xf32> -> vector<2x128xf32>
    %162 = vector.shape_cast %161 : vector<2x128xf32> to vector<2x1x128xf32>
    %c0_80 = arith.constant 0 : index
    %c0_81 = arith.constant 0 : index
    %c0_82 = arith.constant 0 : index
    %163 = vector.load %arg5[%c0_80, %c0_81, %c0_82] : memref<2x1x128xf32, #tpu.memory_space<vmem>>, vector<2x1x128xf32>
    tpu.vector_store %arg5[%c0_80, %c0_81, %c0_82], %162 {strides = array<i32>} : memref<2x1x128xf32, #tpu.memory_space<vmem>>, vector<2x1x128xf32>,
    return
  }
  func.func @transform_0(%arg0: i32) -> (i32, i32, i32) {
    %c0_i32 = arith.constant 0 : i32
    %c0_i32_0 = arith.constant 0 : i32
    %c0_i32_1 = arith.constant 0 : i32
    return %arg0, %c0_i32, %c0_i32_0 : i32, i32, i32
  }
  func.func @transform_1(%arg0: i32) -> (i32, i32, i32) {
    %c0_i32 = arith.constant 0 : i32
    %c0_i32_0 = arith.constant 0 : i32
    %c0_i32_1 = arith.constant 0 : i32
    return %arg0, %c0_i32, %c0_i32_0 : i32, i32, i32
  }
  func.func @transform_2(%arg0: i32) -> (i32, i32) {
    %c0_i32 = arith.constant 0 : i32
    %c0_i32_0 = arith.constant 0 : i32
    %c0_i32_1 = arith.constant 0 : i32
    return %c0_i32, %c0_i32_0 : i32, i32
  }
  func.func @transform_3(%arg0: i32) -> (i32, i32, i32) {
    %c0_i32 = arith.constant 0 : i32
    %c0_i32_0 = arith.constant 0 : i32
    %c0_i32_1 = arith.constant 0 : i32
    return %arg0, %c0_i32, %c0_i32_0 : i32, i32, i32
  }
  func.func @transform_4(%arg0: i32) -> (i32, i32, i32) {
    %c0_i32 = arith.constant 0 : i32
    %c0_i32_0 = arith.constant 0 : i32
    %c0_i32_1 = arith.constant 0 : i32
    return %arg0, %c0_i32, %c0_i32_0 : i32, i32, i32
  }
}

</mosaic_0001>

<bundles_post_ra>
// kernel: frustum_net_forward.1
= control target key start
LH: loop header
LB: loop body
LE: loop exit
PB: predicated region body
PF: predicated region fallthrough
CT: control target
= control target key end

     0   :  { %10 = vsyncpa [#allocation3], 0  ;;  %s6864_s15 = smov [#allocation2]   ;;  %s9279_s0 = inlined_call_operand.vmem [shape: f32[2,128,4], index: 0, kind: input, shape index: {}]   ;;  %s9280_s1 = inlined_call_operand.vmem [shape: f32[2,1,3], index: 1, kind: input, shape index: {}]   ;;  %s9281_s2 = inlined_call_operand.hbm [shape: f32[768,128], index: 2, kind: input, shape index: {}]   ;;  %s9282_s3 = inlined_call_operand.vmem [shape: f32[2,128,128], index: 3, kind: output, shape index: {0}]   ;;  %s9283_s4 = inlined_call_operand.vmem [shape: f32[2,1,128], index: 4, kind: output, shape index: {1}]  }
   0x1   :  { %s20_s16 = sshll.u32 %s6864_s15, 4  ;;  %s6840_s19 = scalar_lea.hbm %s9281_s2, 12288  ;;  %s21_s16 = int_to_ptr.vmem [resolvable:$true] %s20_s16 }
   0x2   :  { %p6841_p0 = scmp.ne.s32.totalorder %s9281_s2, %s6840_s19  ;;  %p6844_p1 = scmp.lt.u32.totalorder %s6840_s19, %s9281_s2 }
   0x4   :  { %p6846_p2 = pnand %p6844_p1, %p6841_p0 }
   0x6   :  { %6849 = shalt.err (!%p6846_p2)
}
   0x7   :  { %s6850_s24 = scalar_lea.vmem %s21_s16, 12288  ;;  %p6855_p4 = scmp.lt.s32.totalorder %s21_s16, %s21_s16 }
   0x8   :  { %p6851_p3 = scmp.ne.s32.totalorder %s21_s16, %s6850_s24  ;;  %p6856_p5 = scmp.lt.s32.totalorder %s6850_s24, %s6850_s24 }
   0xa   :  { %p6857_p6 = por %p6856_p5, %p6855_p4 }
   0xc   :  { %p6858_p7 = pnand %p6857_p6, %p6851_p3 }
   0xe   :  { %6861 = shalt.err (!%p6858_p7)
}
   0xf   :  { %s6865_s25 = smov 128   ;;  %s6866_s26 = smov 8  }
  0x10   :  { %26 = dma.hbm_to_vmem [thread:$0]  %s9281_s2, 12288, %s21_s16, [#allocation3], %s6865_s25, %s6865_s25, %s6866_s26  }
  0x11   :  { %6862 = dma.done.wait [#allocation3], 12288  }
  0x12   :  { %6863 = vsyncadd [#allocation3], 4294955008  ;;  %vm167_vm0 = vcmask 1043456   ;;  %vm70_vm1 = vcmask 31744   ;;  %v64_v0 = vld [vmem:[#allocation2 + $0x250] sm:$0xf] }
  0x13   :  { %v30_v1 = vld [vmem:[%s9279_s0] sm:$0xff]  ;;  %v31_v2 = vld [vmem:[%s9279_s0 + $0x8] sm:$0xff]  ;;  %5992 = vmatprep.subr.msk.mxu0 %vm167_vm0, %v64_v0  ;;  %v32_v3 = vld [vmem:[%s9279_s0 + $0x10] sm:$0xff]  ;;  %vm437_vm2 = vcmask 261120   ;;  %vm895_vm3 = vcmask 1042432   ;;  %vm6869_vm4 = vmmov 0  }
  0x14   :  { %5994 = vmatprep.mubr.msk.f32.mxu0 %vm70_vm1, %v30_v1  ;;  %5993 = vmatpush3.msk.msra.mxu0 %vm167_vm0, %v64_v0  ;;  %v33_v4 = vld [vmem:[%s9279_s0 + $0x18] sm:$0xff]  ;;  %v34_v5 = vld [vmem:[%s9279_s0 + $0x20] sm:$0xff]  ;;  %v35_v6 = vld [vmem:[%s9279_s0 + $0x28] sm:$0xff]  ;;  %vm892_vm5 = vcmask 23552   ;;  %vm791_vm6 = vcmask 523264   ;;  %vm971_vm7 = vcmask 1041409  }
  0x15   :  { %5995 = vmatmul.mubr.msk.f32.vlgmr.msra.gmra.mrb[0].mxu0 %vm70_vm1, %v31_v2  ;;  %v36_v7 = vld [vmem:[%s9279_s0 + $0x30] sm:$0xff]  ;;  %v428_v8 = vld [vmem:[#allocation2 + $0x258] sm:$0xff]  ;;  %v429_v9 = vld [vmem:[#allocation2 + $0x260] sm:$0xff]  ;;  %vm1834_vm8 = vcmask 23568   ;;  %vm5074_vm9 = vcmask 15360   ;;  %s6873_s13 = smov 3  }
  0x16   :  { %5997 = vmatprep.mubr.msk.f32.mxu0 %vm70_vm1, %v32_v3  ;;  %v37_v10 = vld [vmem:[%s9279_s0 + $0x38] sm:$0xff]  ;;  %v6615_v11 = vpack.c.bf16 %v429_v9, %v428_v8  ;;  %v38_v12 = vld [vmem:[%s9279_s0 + $0x40] sm:$0xff]  ;;  %v39_v13 = vld [vmem:[%s9279_s0 + $0x48] sm:$0xff]  ;;  %s6874_s26 = smov 4   ;;  %s6875_s5 = smov 7  }
  0x17   :  { %v40_v14 = vld [vmem:[%s9279_s0 + $0x50] sm:$0xff]  ;;  %v41_v15 = vld [vmem:[%s9279_s0 + $0x58] sm:$0xff]  ;;  %v42_v16 = vld [vmem:[%s9279_s0 + $0x60] sm:$0xff] }
  0x18   :  { %6616 = vmatprep.subr.bf16.mxu1 %v6615_v11  ;;  %v43_v17 = vld [vmem:[%s9279_s0 + $0x68] sm:$0xff]  ;;  %v44_v18 = vld [vmem:[%s9279_s0 + $0x70] sm:$0xff]  ;;  %v45_v19 = vld [vmem:[%s9279_s0 + $0x78] sm:$0xff] }
  0x19   :  { %5998 = vmatmul.mubr.msk.f32.gmra.mrb[2].mxu0 %vm70_vm1, %v33_v4  ;;  %6618 = vmatpush3.bf16.msra.mxu1 %v6615_v11  ;;  %v46_v20 = vld [vmem:[%s9279_s0 + $0x80] sm:$0xff]  ;;  %v47_v21 = vld [vmem:[%s9279_s0 + $0x88] sm:$0xff]  ;;  %v48_v22 = vld [vmem:[%s9279_s0 + $0x90] sm:$0xff] }
  0x1a   :  { %6000 = vmatprep.mubr.msk.f32.mxu0 %vm70_vm1, %v34_v5  ;;  %v49_v23 = vld [vmem:[%s9279_s0 + $0x98] sm:$0xff]  ;;  %v50_v24 = vld [vmem:[%s9279_s0 + $0xa0] sm:$0xff]  ;;  %v51_v25 = vld [vmem:[%s9279_s0 + $0xa8] sm:$0xff] }
  0x1b   :  { %v52_v26 = vld [vmem:[%s9279_s0 + $0xb0] sm:$0xff]  ;;  %v53_v27 = vld [vmem:[%s9279_s0 + $0xb8] sm:$0xff]  ;;  %v54_v28 = vld [vmem:[%s9279_s0 + $0xc0] sm:$0xff] }
  0x1c   :  { %v55_v29 = vld [vmem:[%s9279_s0 + $0xc8] sm:$0xff]  ;;  %v56_v30 = vld [vmem:[%s9279_s0 + $0xd0] sm:$0xff]  ;;  %v57_v31 = vld [vmem:[%s9279_s0 + $0xd8] sm:$0xff] }
  0x1d   :  { %6001 = vmatmul.mubr.msk.f32.gmra.mrb[4].mxu0 %vm70_vm1, %v35_v6  ;;  %v58_v32 = vld [vmem:[%s9279_s0 + $0xe0] sm:$0xff]  ;;  %v59_v33 = vld [vmem:[%s9279_s0 + $0xe8] sm:$0xff]  ;;  %v60_v34 = vld [vmem:[%s9279_s0 + $0xf0] sm:$0xff] }
  0x1e   :  { %6003 = vmatprep.mubr.msk.f32.mxu0 %vm70_vm1, %v36_v7  ;;  %v61_v35 = vld [vmem:[%s9279_s0 + $0xf8] sm:$0xff]  ;;  %v430_v36 = vld [vmem:[#allocation2 + $0x268] sm:$0xff]  ;;  %v431_v37 = vld [vmem:[#allocation2 + $0x270] sm:$0xff] }
  0x1f   :  { %v6619_v38 = vpack.c.bf16 %v431_v37, %v430_v36  ;;  %v1045_v39 = vld [vmem:[#allocation2 + $0x278] sm:$0xff]  ;;  %v1046_v40 = vld [vmem:[#allocation2 + $0x280] sm:$0xff]  ;;  %v7041_v42 = vld [vmem:[#allocation2 + $0x230] ss:$0 sm:$0xff] }
  0x20   :  { %v6635_v41 = vpack.c.bf16 %v1046_v40, %v1045_v39  ;;  %v1047_v47 = vld [vmem:[#allocation2 + $0x288] sm:$0xff]  ;;  %v1048_v48 = vld [vmem:[#allocation2 + $0x290] sm:$0xff] }
  0x21   :  { %6004 = vmatmul.mubr.msk.f32.gmra.mrb[6].mxu0 %vm70_vm1, %v37_v10  ;;  %6620 = vmatprep.subr.bf16.mxu1 %v6619_v38  ;;  %v6639_v54 = vpack.c.bf16 %v1048_v48, %v1047_v47 }
  0x22   :  { %6006 = vmatprep.mubr.msk.f32.mxu0 %vm70_vm1, %v38_v12  ;;  %6622 = vmatpush3.bf16.msra.mxu1 %v6619_v38 }
  0x23   :  { %6636 = vmatprep.subr.bf16.mxu1 %v6635_v41 }
  0x25   :  { %6007 = vmatmul.mubr.msk.f32.gmra.mrb[8].mxu0 %vm70_vm1, %v39_v13 }
  0x26   :  { %6009 = vmatprep.mubr.msk.f32.mxu0 %vm70_vm1, %v40_v14 }
  0x29   :  { %6010 = vmatmul.mubr.msk.f32.gmra.mrb[10].mxu0 %vm70_vm1, %v41_v15 }
  0x2a   :  { %6012 = vmatprep.mubr.msk.f32.mxu0 %vm70_vm1, %v42_v16 }
  0x2d   :  { %6013 = vmatmul.mubr.msk.f32.gmra.mrb[12].mxu0 %vm70_vm1, %v43_v17 }
  0x2e   :  { %6015 = vmatprep.mubr.msk.f32.mxu0 %vm70_vm1, %v44_v18 }
  0x31   :  { %6016 = vmatmul.mubr.msk.f32.gmra.mrb[14].mxu0 %vm70_vm1, %v45_v19 }
  0x32   :  { %6018 = vmatprep.mubr.msk.f32.mxu0 %vm70_vm1, %v46_v20 }
  0x35   :  { %6019 = vmatmul.mubr.msk.f32.gmra.mrb[16].mxu0 %vm70_vm1, %v47_v21 }
  0x36   :  { %6021 = vmatprep.mubr.msk.f32.mxu0 %vm70_vm1, %v48_v22 }
  0x39   :  { %6022 = vmatmul.mubr.msk.f32.gmra.mrb[18].mxu0 %vm70_vm1, %v49_v23 }
  0x3a   :  { %6024 = vmatprep.mubr.msk.f32.mxu0 %vm70_vm1, %v50_v24 }
  0x3d   :  { %6025 = vmatmul.mubr.msk.f32.gmra.mrb[20].mxu0 %vm70_vm1, %v51_v25 }
  0x3e   :  { %6027 = vmatprep.mubr.msk.f32.mxu0 %vm70_vm1, %v52_v26 }
  0x41   :  { %6028 = vmatmul.mubr.msk.f32.gmra.mrb[22].mxu0 %vm70_vm1, %v53_v27 }
  0x42   :  { %6030 = vmatprep.mubr.msk.f32.mxu0 %vm70_vm1, %v54_v28 }
  0x45   :  { %6031 = vmatmul.mubr.msk.f32.gmra.mrb[24].mxu0 %vm70_vm1, %v55_v29 }
  0x46   :  { %6033 = vmatprep.mubr.msk.f32.mxu0 %vm70_vm1, %v56_v30 }
  0x49   :  { %6034 = vmatmul.mubr.msk.f32.gmra.mrb[26].mxu0 %vm70_vm1, %v57_v31 }
  0x4a   :  { %6036 = vmatprep.mubr.msk.f32.mxu0 %vm70_vm1, %v58_v32 }
  0x4d   :  { %6037 = vmatmul.mubr.msk.f32.gmra.mrb[28].mxu0 %vm70_vm1, %v59_v33 }
  0x4e   :  { %6039 = vmatprep.mubr.msk.f32.mxu0 %vm70_vm1, %v60_v34 }
  0x51   :  { %6040 = vmatmul.mubr.msk.f32.gmra.mrb[30].mxu0 %vm70_vm1, %v61_v35 }
  0xe8   :  { %v5996_v43 = vpop.f32.mrb[0].mxu0 }
  0xe9   :  { %v7044_v44 = vadd.f32 %v5996_v43, %v7041_v42  ;;  %v237_v45 = vpop.f32.mrb[1].mxu0 }
  0xea   :  { %v7047_v46 = vadd.f32 %v7041_v42, %v237_v45 }
  0xeb   :  { %v397_v51 = vmax.f32 %v7044_v44, 0.0  ;;  %v874_v44 = vld [vmem:[#allocation2 + $0x2d8] sm:$0x7] }
  0xec   :  { %v396_v49 = vmax.f32 %v7047_v46, 0.0  ;;  %v5999_v50 = vpop.f32.mrb[2].mxu0  ;;  %v6868_v46 = vmov 1966171168  }
  0xed   :  { %v7052_v52 = vadd.f32 %v5999_v50, %v7041_v42  ;;  %v247_v53 = vpop.f32.mrb[3].mxu0 }
  0xee   :  { %v7055_v55 = vadd.f32 %v7041_v42, %v247_v53  ;;  %6050 = vmatprep.mubr.msk.f32.mxu1 %vm437_vm2, %v396_v49 }
  0xef   :  { %6051 = vmatmul.mubr.msk.f32.vlgmr.msra.gmra.mrb[0].mxu1 %vm437_vm2, %v397_v51  ;;  %v399_v58 = vmax.f32 %v7052_v52, 0.0 }
  0xf0   :  { %v398_v56 = vmax.f32 %v7055_v55, 0.0  ;;  %v6002_v57 = vpop.f32.mrb[4].mxu0  ;;  %6638 = vmatpush3.bf16.msra.mxu1 %v6635_v41 }
  0xf1   :  { %v7066_v59 = vadd.f32 %v6002_v57, %v7041_v42  ;;  %v257_v60 = vpop.f32.mrb[5].mxu0  ;;  %6640 = vmatprep.subr.bf16.mxu1 %v6639_v54 }
  0xf2   :  { %v7069_v61 = vadd.f32 %v7041_v42, %v257_v60  ;;  %6053 = vmatprep.mubr.msk.f32.mxu1 %vm437_vm2, %v398_v56 }
  0xf3   :  { %6054 = vmatmul.mubr.msk.f32.gmra.mrb[2].mxu1 %vm437_vm2, %v399_v58  ;;  %v401_v0 = vmax.f32 %v7066_v59, 0.0 }
  0xf4   :  { %v400_v62 = vmax.f32 %v7069_v61, 0.0  ;;  %v6005_v63 = vpop.f32.mrb[6].mxu0  ;;  %6642 = vmatpush3.bf16.msra.mxu1 %v6639_v54 }
  0xf5   :  { %v7080_v1 = vadd.f32 %v6005_v63, %v7041_v42  ;;  %v267_v2 = vpop.f32.mrb[7].mxu0 }
  0xf6   :  { %v7083_v3 = vadd.f32 %v7041_v42, %v267_v2  ;;  %6056 = vmatprep.mubr.msk.f32.mxu1 %vm437_vm2, %v400_v62 }
  0xf7   :  { %6057 = vmatmul.mubr.msk.f32.gmra.mrb[4].mxu1 %vm437_vm2, %v401_v0  ;;  %v403_v6 = vmax.f32 %v7080_v1, 0.0  ;;  %v867_v1 = vld [vmem:[#allocation2 + $0x2a0] sm:$0xff] }
  0xf8   :  { %v402_v4 = vmax.f32 %v7083_v3, 0.0  ;;  %v6008_v5 = vpop.f32.mrb[8].mxu0 }
  0xf9   :  { %v7094_v7 = vadd.f32 %v6008_v5, %v7041_v42  ;;  %v277_v8 = vpop.f32.mrb[9].mxu0 }
  0xfa   :  { %v7097_v9 = vadd.f32 %v7041_v42, %v277_v8  ;;  %6059 = vmatprep.mubr.msk.f32.mxu1 %vm437_vm2, %v402_v4 }
  0xfb   :  { %6060 = vmatmul.mubr.msk.f32.gmra.mrb[6].mxu1 %vm437_vm2, %v403_v6  ;;  %v405_v12 = vmax.f32 %v7094_v7, 0.0  ;;  %v868_v7 = vld [vmem:[#allocation2 + $0x2a8] sm:$0xff] }
  0xfc   :  { %v404_v10 = vmax.f32 %v7097_v9, 0.0  ;;  %v6011_v11 = vpop.f32.mrb[10].mxu0  ;;  %v869_v9 = vld [vmem:[#allocation2 + $0x2b0] sm:$0xff] }
  0xfd   :  { %v7108_v13 = vadd.f32 %v6011_v11, %v7041_v42  ;;  %v287_v14 = vpop.f32.mrb[11].mxu0 }
  0xfe   :  { %v7111_v15 = vadd.f32 %v7041_v42, %v287_v14  ;;  %6062 = vmatprep.mubr.msk.f32.mxu1 %vm437_vm2, %v404_v10 }
  0xff   :  { %6063 = vmatmul.mubr.msk.f32.gmra.mrb[8].mxu1 %vm437_vm2, %v405_v12  ;;  %v407_v18 = vmax.f32 %v7108_v13, 0.0  ;;  %v871_v13 = vld [vmem:[#allocation2 + $0x2c0] sm:$0xff] }
 0x100   :  { %v406_v16 = vmax.f32 %v7111_v15, 0.0  ;;  %v6014_v17 = vpop.f32.mrb[12].mxu0 }
 0x101   :  { %v7122_v19 = vadd.f32 %v6014_v17, %v7041_v42  ;;  %v297_v20 = vpop.f32.mrb[13].mxu0 }
 0x102   :  { %v7125_v21 = vadd.f32 %v7041_v42, %v297_v20  ;;  %6065 = vmatprep.mubr.msk.f32.mxu1 %vm437_vm2, %v406_v16 }
 0x103   :  { %6066 = vmatmul.mubr.msk.f32.gmra.mrb[10].mxu1 %vm437_vm2, %v407_v18  ;;  %v409_v24 = vmax.f32 %v7122_v19, 0.0 }
 0x104   :  { %v408_v22 = vmax.f32 %v7125_v21, 0.0  ;;  %v6017_v23 = vpop.f32.mrb[14].mxu0  ;;  %v7333_v21 = vld [vmem:[#allocation2 + $0x238] ss:$0 sm:$0xff] }
 0x105   :  { %v7136_v25 = vadd.f32 %v6017_v23, %v7041_v42  ;;  %v307_v26 = vpop.f32.mrb[15].mxu0 }
 0x106   :  { %v7139_v27 = vadd.f32 %v7041_v42, %v307_v26  ;;  %6068 = vmatprep.mubr.msk.f32.mxu1 %vm437_vm2, %v408_v22 }
 0x107   :  { %6069 = vmatmul.mubr.msk.f32.gmra.mrb[12].mxu1 %vm437_vm2, %v409_v24  ;;  %v411_v30 = vmax.f32 %v7136_v25, 0.0 }
 0x108   :  { %v410_v28 = vmax.f32 %v7139_v27, 0.0  ;;  %v6020_v29 = vpop.f32.mrb[16].mxu0 }
 0x109   :  { %v7150_v31 = vadd.f32 %v6020_v29, %v7041_v42  ;;  %v317_v32 = vpop.f32.mrb[17].mxu0 }
 0x10a   :  { %v7153_v33 = vadd.f32 %v7041_v42, %v317_v32  ;;  %6071 = vmatprep.mubr.msk.f32.mxu1 %vm437_vm2, %v410_v28 }
 0x10b   :  { %6072 = vmatmul.mubr.msk.f32.gmra.mrb[14].mxu1 %vm437_vm2, %v411_v30  ;;  %v413_v36 = vmax.f32 %v7150_v31, 0.0 }
 0x10c   :  { %v412_v34 = vmax.f32 %v7153_v33, 0.0  ;;  %v6023_v35 = vpop.f32.mrb[18].mxu0 }
 0x10d   :  { %v7164_v37 = vadd.f32 %v6023_v35, %v7041_v42  ;;  %v327_v38 = vpop.f32.mrb[19].mxu0 }
 0x10e   :  { %v7167_v39 = vadd.f32 %v7041_v42, %v327_v38  ;;  %6074 = vmatprep.mubr.msk.f32.mxu1 %vm437_vm2, %v412_v34 }
 0x10f   :  { %6075 = vmatmul.mubr.msk.f32.gmra.mrb[16].mxu1 %vm437_vm2, %v413_v36  ;;  %v415_v43 = vmax.f32 %v7164_v37, 0.0 }
 0x110   :  { %v414_v40 = vmax.f32 %v7167_v39, 0.0  ;;  %v6026_v41 = vpop.f32.mrb[20].mxu0 }
 0x111   :  { %v7178_v45 = vadd.f32 %v6026_v41, %v7041_v42  ;;  %v337_v47 = vpop.f32.mrb[21].mxu0 }
 0x112   :  { %v7181_v48 = vadd.f32 %v7041_v42, %v337_v47  ;;  %6077 = vmatprep.mubr.msk.f32.mxu1 %vm437_vm2, %v414_v40 }
 0x113   :  { %6078 = vmatmul.mubr.msk.f32.gmra.mrb[18].mxu1 %vm437_vm2, %v415_v43  ;;  %v417_v54 = vmax.f32 %v7178_v45, 0.0 }
 0x114   :  { %v416_v50 = vmax.f32 %v7181_v48, 0.0  ;;  %v6029_v53 = vpop.f32.mrb[22].mxu0 }
 0x115   :  { %v7192_v57 = vadd.f32 %v6029_v53, %v7041_v42  ;;  %v347_v60 = vpop.f32.mrb[23].mxu0 }
 0x116   :  { %v7195_v63 = vadd.f32 %v7041_v42, %v347_v60  ;;  %6080 = vmatprep.mubr.msk.f32.mxu1 %vm437_vm2, %v416_v50 }
 0x117   :  { %6081 = vmatmul.mubr.msk.f32.gmra.mrb[20].mxu1 %vm437_vm2, %v417_v54  ;;  %v419_v8 = vmax.f32 %v7192_v57, 0.0 }
 0x118   :  { %v418_v2 = vmax.f32 %v7195_v63, 0.0  ;;  %v6032_v5 = vpop.f32.mrb[24].mxu0 }
 0x119   :  { %v7206_v11 = vadd.f32 %v6032_v5, %v7041_v42  ;;  %v357_v14 = vpop.f32.mrb[25].mxu0 }
 0x11a   :  { %v358_v17 = vadd.f32 %v7041_v42, %v357_v14  ;;  %6083 = vmatprep.mubr.msk.f32.mxu1 %vm437_vm2, %v418_v2 }
 0x11b   :  { %6084 = vmatmul.mubr.msk.f32.gmra.mrb[22].mxu1 %vm437_vm2, %v419_v8  ;;  %v421_v26 = vmax.f32 %v7206_v11, 0.0 }
 0x11c   :  { %v420_v20 = vmax.f32 %v358_v17, 0.0  ;;  %v6035_v23 = vpop.f32.mrb[26].mxu0 }
 0x11d   :  { %v373_v29 = vadd.f32 %v6035_v23, %v7041_v42  ;;  %v367_v32 = vpop.f32.mrb[27].mxu0 }
 0x11e   :  { %v368_v35 = vadd.f32 %v7041_v42, %v367_v32  ;;  %6086 = vmatprep.mubr.msk.f32.mxu1 %vm437_vm2, %v420_v20 }
 0x11f   :  { %6087 = vmatmul.mubr.msk.f32.gmra.mrb[24].mxu1 %vm437_vm2, %v421_v26  ;;  %v423_v47 = vmax.f32 %v373_v29, 0.0 }
 0x120   :  { %v422_v38 = vmax.f32 %v368_v35, 0.0  ;;  %v6038_v41 = vpop.f32.mrb[28].mxu0 }
 0x121   :  { %v383_v53 = vadd.f32 %v6038_v41, %v7041_v42  ;;  %v377_v57 = vpop.f32.mrb[29].mxu0 }
 0x122   :  { %v378_v60 = vadd.f32 %v7041_v42, %v377_v57  ;;  %6089 = vmatprep.mubr.msk.f32.mxu1 %vm437_vm2, %v422_v38 }
 0x123   :  { %6090 = vmatmul.mubr.msk.f32.gmra.mrb[26].mxu1 %vm437_vm2, %v423_v47  ;;  %v425_v14 = vmax.f32 %v383_v53, 0.0 }
 0x124   :  { %v424_v5 = vmax.f32 %v378_v60, 0.0  ;;  %v6041_v11 = vpop.f32.mrb[30].mxu0 }
 0x125   :  { %v393_v17 = vadd.f32 %v6041_v11, %v7041_v42  ;;  %v387_v23 = vpop.f32.mrb[31].mxu0 }
 0x126   :  { %v388_v32 = vadd.f32 %v7041_v42, %v387_v23  ;;  %6092 = vmatprep.mubr.msk.f32.mxu1 %vm437_vm2, %v424_v5  ;;  %v9286_v42 = vmov 0.0  }
 0x127   :  { %6093 = vmatmul.mubr.msk.f32.gmra.mrb[28].mxu1 %vm437_vm2, %v425_v14  ;;  %v427_v35 = vmax.f32 %v393_v17, 0.0  ;;  %6098 = vmatprep.subr.mxu0 %v9286_v42 }
 0x128   :  { %v426_v29 = vmax.f32 %v388_v32, 0.0  ;;  %6099 = vmatpush3.msk.msra.mxu0 %vm895_vm3, %v874_v44  ;;  %6100 = vmatprep.mubr.msk.f32.mxu0 %vm6869_vm4, %v9286_v42 }
 0x12a   :  { %6095 = vmatprep.mubr.msk.f32.mxu1 %vm437_vm2, %v426_v29 }
 0x12b   :  { %6096 = vmatmul.mubr.msk.f32.gmra.mrb[30].mxu1 %vm437_vm2, %v427_v35 }
 0x12c   :  { %6130 = vmatprep.mubr.msk.f32.mxu1 %vm437_vm2, %v396_v49  ;;  %v879_v49 = vunpack.c.l.s4 %v6868_v46 }
 0x12e   :  { %v880_v52 = vunpack.c.0.s8 %v879_v49 }
 0x12f   :  { %6131 = vmatmul.mubr.msk.f32.vlgmr.msra.gmra.mrb[32].mxu1 %vm437_vm2, %v397_v51  ;;  %v881_v51 = vlaneseq }
 0x130   :  { %6133 = vmatprep.mubr.msk.f32.mxu1 %vm437_vm2, %v398_v56  ;;  %v62_v56 = vld [vmem:[%s9280_s1] sm:$0x1] }
 0x131   :  { %v7308_v55 = vshrl.u32 %v881_v51, 7 }
 0x133   :  { %6134 = vmatmul.mubr.msk.f32.gmra.mrb[34].mxu1 %vm437_vm2, %v399_v58  ;;  %v63_v58 = vld [vmem:[%s9280_s1 + $0x1] sm:$0x1]  ;;  %v7317_v61 = vsub.s32 %v880_v52, %v7308_v55  ;;  %s6872_s1 = smov 1  }
 0x134   :  { %6136 = vmatprep.mubr.msk.f32.mxu1 %vm437_vm2, %v400_v62  ;;  %v877_v59 = vcombine.low %v62_v56, %v63_v58 }
 0x135   :  { %9349 = vst [vmem:[#allocation5_spill] sm:$0xff] %v7317_v61 }
 0x136   :  { %v884_v62 = vrot.slane %v877_v59, %v7317_v61 }
 0x137   :  { %6137 = vmatmul.mubr.msk.f32.gmra.mrb[36].mxu1 %vm437_vm2, %v401_v0  ;;  %v866_v0 = vld [vmem:[#allocation2 + $0x298] sm:$0xff] }
 0x138   :  { %6139 = vmatprep.mubr.msk.f32.mxu1 %vm437_vm2, %v402_v4  ;;  %v7321_v3 = vrot.slane %v884_v62, %v7317_v61  ;;  %v6624_v4 = vpack.c.bf16 %v867_v1, %v866_v0 }
 0x13a   :  { %9350 = vst [vmem:[#allocation6_spill] sm:$0xff] %v7321_v3  ;;  %6101 = vmatmul.mubr.msk.f32.vlgmr.msra.gmra.mrb[32].mxu0 %vm892_vm5, %v7321_v3 }
 0x13b   :  { %6140 = vmatmul.mubr.msk.f32.gmra.mrb[38].mxu1 %vm437_vm2, %v403_v6  ;;  %v9284_v6 = vmov 0.0|0.0   ;;  %6119 = vmatprep.mubr.msk.f32.mxu0 %vm6869_vm4, %v9286_v42 }
 0x13c   :  { %6142 = vmatprep.mubr.msk.f32.mxu1 %vm437_vm2, %v404_v10  ;;  %6623 = vmatprep.subr.bf16.mxu0 %v9284_v6  ;;  %v6627_v10 = vpack.c.bf16 %v869_v9, %v868_v7 }
 0x13d   :  { %6625 = vmatpush3.bf16.msra.mxu0 %v6624_v4 }
 0x13e   :  { %6626 = vmatprep.subr.bf16.mxu0 %v9284_v6 }
 0x13f   :  { %6143 = vmatmul.mubr.msk.f32.gmra.mrb[40].mxu1 %vm437_vm2, %v405_v12  ;;  %v870_v12 = vld [vmem:[#allocation2 + $0x2b8] sm:$0xff] }
 0x140   :  { %6145 = vmatprep.mubr.msk.f32.mxu1 %vm437_vm2, %v406_v16  ;;  %v6630_v15 = vpack.c.bf16 %v871_v13, %v870_v12  ;;  %v872_v16 = vld [vmem:[#allocation2 + $0x2c8] sm:$0xff] }
 0x141   :  { %6628 = vmatpush3.bf16.msra.mxu0 %v6627_v10 }
 0x142   :  { %6629 = vmatprep.subr.bf16.mxu0 %v9284_v6 }
 0x143   :  { %6146 = vmatmul.mubr.msk.f32.gmra.mrb[42].mxu1 %vm437_vm2, %v407_v18  ;;  %v873_v18 = vld [vmem:[#allocation2 + $0x2d0] sm:$0xff] }
 0x144   :  { %6148 = vmatprep.mubr.msk.f32.mxu1 %vm437_vm2, %v408_v22  ;;  %v6633_v19 = vpack.c.bf16 %v873_v18, %v872_v16 }
 0x145   :  { %6631 = vmatpush3.bf16.msra.mxu0 %v6630_v15 }
 0x146   :  { %6632 = vmatprep.subr.bf16.mxu0 %v9284_v6 }
 0x147   :  { %6149 = vmatmul.mubr.msk.f32.gmra.mrb[44].mxu1 %vm437_vm2, %v409_v24 }
 0x148   :  { %6151 = vmatprep.mubr.msk.f32.mxu1 %vm437_vm2, %v410_v28 }
 0x149   :  { %6634 = vmatpush3.bf16.msra.mxu0 %v6633_v19 }
 0x14b   :  { %6152 = vmatmul.mubr.msk.f32.gmra.mrb[46].mxu1 %vm437_vm2, %v411_v30 }
 0x14c   :  { %6154 = vmatprep.mubr.msk.f32.mxu1 %vm437_vm2, %v412_v34 }
 0x14f   :  { %6155 = vmatmul.mubr.msk.f32.gmra.mrb[48].mxu1 %vm437_vm2, %v413_v36 }
 0x150   :  { %6157 = vmatprep.mubr.msk.f32.mxu1 %vm437_vm2, %v414_v40 }
 0x153   :  { %6158 = vmatmul.mubr.msk.f32.gmra.mrb[50].mxu1 %vm437_vm2, %v415_v43 }
 0x154   :  { %6160 = vmatprep.mubr.msk.f32.mxu1 %vm437_vm2, %v416_v50 }
 0x157   :  { %6161 = vmatmul.mubr.msk.f32.gmra.mrb[52].mxu1 %vm437_vm2, %v417_v54 }
 0x158   :  { %6163 = vmatprep.mubr.msk.f32.mxu1 %vm437_vm2, %v418_v2 }
 0x15b   :  { %6164 = vmatmul.mubr.msk.f32.gmra.mrb[54].mxu1 %vm437_vm2, %v419_v8 }
 0x15c   :  { %6166 = vmatprep.mubr.msk.f32.mxu1 %vm437_vm2, %v420_v20 }
 0x15f   :  { %6167 = vmatmul.mubr.msk.f32.gmra.mrb[56].mxu1 %vm437_vm2, %v421_v26 }
 0x160   :  { %6169 = vmatprep.mubr.msk.f32.mxu1 %vm437_vm2, %v422_v38 }
 0x163   :  { %6170 = vmatmul.mubr.msk.f32.gmra.mrb[58].mxu1 %vm437_vm2, %v423_v47 }
 0x164   :  { %6172 = vmatprep.mubr.msk.f32.mxu1 %vm437_vm2, %v424_v5 }
 0x167   :  { %6173 = vmatmul.mubr.msk.f32.gmra.mrb[60].mxu1 %vm437_vm2, %v425_v14 }
 0x168   :  { %6175 = vmatprep.mubr.msk.f32.mxu1 %vm437_vm2, %v426_v29 }
 0x16b   :  { %6176 = vmatmul.mubr.msk.f32.gmra.mrb[62].mxu1 %vm437_vm2, %v427_v35 }
 0x1c2   :  { %v6052_v22 = vpop.f32.mrb[0].mxu1 }
 0x1c3   :  { %v606_v24 = vadd.f32 %v6052_v22, %v7333_v21  ;;  %v600_v25 = vpop.f32.mrb[1].mxu1 }
 0x1c4   :  { %v601_v27 = vadd.f32 %v7333_v21, %v600_v25 }
 0x1c5   :  { %v760_v30 = vmax.f32 %v606_v24, 0.0 }
 0x1c6   :  { %v6055_v28 = vpop.f32.mrb[2].mxu1  ;;  %v759_v34 = vmax.f32 %v601_v27, 0.0 }
 0x1c7   :  { %v616_v31 = vadd.f32 %v6055_v28, %v7333_v21  ;;  %v610_v33 = vpop.f32.mrb[3].mxu1  ;;  %v793_v43 = vsel %vm791_vm6, %v760_v30, -inf }
 0x1c8   :  { %v611_v36 = vadd.f32 %v7333_v21, %v610_v33  ;;  %v792_v54 = vsel %vm791_vm6, %v759_v34, -inf }
 0x1c9   :  { %v762_v37 = vmax.f32 %v616_v31, 0.0 }
 0x1ca   :  { %v761_v39 = vmax.f32 %v611_v36, 0.0  ;;  %v6058_v40 = vpop.f32.mrb[4].mxu1 }
 0x1cb   :  { %v796_v45 = vsel %vm791_vm6, %v762_v37, -inf  ;;  %v626_v48 = vadd.f32 %v6058_v40, %v7333_v21  ;;  %v620_v50 = vpop.f32.mrb[5].mxu1 }
 0x1cc   :  { %v797_v63 = vmax.f32 %v793_v43, %v796_v45  ;;  %v794_v2 = vsel %vm791_vm6, %v761_v39, -inf  ;;  %v621_v8 = vadd.f32 %v7333_v21, %v620_v50 }
 0x1cd   :  { %v795_v20 = vmax.f32 %v792_v54, %v794_v2  ;;  %v764_v26 = vmax.f32 %v626_v48, 0.0 }
 0x1ce   :  { %v763_v38 = vmax.f32 %v621_v8, 0.0  ;;  %v6061_v41 = vpop.f32.mrb[6].mxu1 }
 0x1cf   :  { %v800_v47 = vsel %vm791_vm6, %v764_v26, -inf  ;;  %v636_v53 = vadd.f32 %v6061_v41, %v7333_v21  ;;  %v630_v57 = vpop.f32.mrb[7].mxu1 }
 0x1d0   :  { %v801_v60 = vmax.f32 %v797_v63, %v800_v47  ;;  %v798_v5 = vsel %vm791_vm6, %v763_v38, -inf  ;;  %v631_v11 = vadd.f32 %v7333_v21, %v630_v57 }
 0x1d1   :  { %v799_v14 = vmax.f32 %v795_v20, %v798_v5  ;;  %v766_v17 = vmax.f32 %v636_v53, 0.0 }
 0x1d2   :  { %v765_v23 = vmax.f32 %v631_v11, 0.0  ;;  %v6064_v32 = vpop.f32.mrb[8].mxu1 }
 0x1d3   :  { %v804_v29 = vsel %vm791_vm6, %v766_v17, -inf  ;;  %v646_v35 = vadd.f32 %v6064_v32, %v7333_v21  ;;  %v640_v44 = vpop.f32.mrb[9].mxu1 }
 0x1d4   :  { %v805_v46 = vmax.f32 %v801_v60, %v804_v29  ;;  %v802_v49 = vsel %vm791_vm6, %v765_v23, -inf  ;;  %v641_v51 = vadd.f32 %v7333_v21, %v640_v44 }
 0x1d5   :  { %v803_v52 = vmax.f32 %v799_v14, %v802_v49  ;;  %v768_v56 = vmax.f32 %v646_v35, 0.0 }
 0x1d6   :  { %v767_v58 = vmax.f32 %v641_v51, 0.0  ;;  %v6067_v59 = vpop.f32.mrb[10].mxu1 }
 0x1d7   :  { %v808_v62 = vsel %vm791_vm6, %v768_v56, -inf  ;;  %v656_v0 = vadd.f32 %v6067_v59, %v7333_v21  ;;  %v650_v1 = vpop.f32.mrb[11].mxu1 }
 0x1d8   :  { %v809_v4 = vmax.f32 %v805_v46, %v808_v62  ;;  %v806_v7 = vsel %vm791_vm6, %v767_v58, -inf  ;;  %v651_v9 = vadd.f32 %v7333_v21, %v650_v1 }
 0x1d9   :  { %v807_v10 = vmax.f32 %v803_v52, %v806_v7  ;;  %v770_v12 = vmax.f32 %v656_v0, 0.0 }
 0x1da   :  { %v769_v13 = vmax.f32 %v651_v9, 0.0  ;;  %v6070_v15 = vpop.f32.mrb[12].mxu1 }
 0x1db   :  { %v812_v16 = vsel %vm791_vm6, %v770_v12, -inf  ;;  %v666_v18 = vadd.f32 %v6070_v15, %v7333_v21  ;;  %v660_v19 = vpop.f32.mrb[13].mxu1 }
 0x1dc   :  { %v813_v22 = vmax.f32 %v809_v4, %v812_v16  ;;  %v810_v24 = vsel %vm791_vm6, %v769_v13, -inf  ;;  %v661_v25 = vadd.f32 %v7333_v21, %v660_v19 }
 0x1dd   :  { %v811_v27 = vmax.f32 %v807_v10, %v810_v24  ;;  %v772_v28 = vmax.f32 %v666_v18, 0.0 }
 0x1de   :  { %v771_v30 = vmax.f32 %v661_v25, 0.0  ;;  %v6073_v31 = vpop.f32.mrb[14].mxu1 }
 0x1df   :  { %v816_v33 = vsel %vm791_vm6, %v772_v28, -inf  ;;  %v676_v34 = vadd.f32 %v6073_v31, %v7333_v21  ;;  %v670_v36 = vpop.f32.mrb[15].mxu1 }
 0x1e0   :  { %v817_v37 = vmax.f32 %v813_v22, %v816_v33  ;;  %v814_v39 = vsel %vm791_vm6, %v771_v30, -inf  ;;  %v671_v40 = vadd.f32 %v7333_v21, %v670_v36 }
 0x1e1   :  { %v815_v43 = vmax.f32 %v811_v27, %v814_v39  ;;  %v774_v45 = vmax.f32 %v676_v34, 0.0 }
 0x1e2   :  { %v773_v48 = vmax.f32 %v671_v40, 0.0  ;;  %v6076_v50 = vpop.f32.mrb[16].mxu1 }
 0x1e3   :  { %v820_v54 = vsel %vm791_vm6, %v774_v45, -inf  ;;  %v686_v63 = vadd.f32 %v6076_v50, %v7333_v21  ;;  %v680_v2 = vpop.f32.mrb[17].mxu1 }
 0x1e4   :  { %v821_v8 = vmax.f32 %v817_v37, %v820_v54  ;;  %v818_v20 = vsel %vm791_vm6, %v773_v48, -inf  ;;  %v681_v26 = vadd.f32 %v7333_v21, %v680_v2 }
 0x1e5   :  { %v819_v38 = vmax.f32 %v815_v43, %v818_v20  ;;  %v776_v53 = vmax.f32 %v686_v63, 0.0 }
 0x1e6   :  { %v6079_v41 = vpop.f32.mrb[18].mxu1  ;;  %v775_v5 = vmax.f32 %v681_v26, 0.0 }
 0x1e7   :  { %v7369_v47 = vmax.f32 %v819_v38, %v821_v8  ;;  %v696_v57 = vadd.f32 %v6079_v41, %v7333_v21  ;;  %v690_v60 = vpop.f32.mrb[19].mxu1  ;;  %v830_v32 = vsel %vm791_vm6, %v776_v53, -inf }
 0x1e8   :  { %v691_v11 = vadd.f32 %v7333_v21, %v690_v60  ;;  %v829_v46 = vsel %vm791_vm6, %v775_v5, -inf }
 0x1e9   :  { %v778_v14 = vmax.f32 %v696_v57, 0.0  ;;  %v823_v5 = vrot.slane %v7369_v47, 4 }
 0x1ea   :  { %v777_v17 = vmax.f32 %v691_v11, 0.0  ;;  %v6082_v23 = vpop.f32.mrb[20].mxu1 }
 0x1eb   :  { %v833_v29 = vsel %vm791_vm6, %v778_v14, -inf  ;;  %v706_v35 = vadd.f32 %v6082_v23, %v7333_v21  ;;  %v700_v44 = vpop.f32.mrb[21].mxu1 }
 0x1ec   :  { %v834_v49 = vmax.f32 %v830_v32, %v833_v29  ;;  %v831_v51 = vsel %vm791_vm6, %v777_v17, -inf  ;;  %v701_v52 = vadd.f32 %v7333_v21, %v700_v44 }
 0x1ed   :  { %v832_v56 = vmax.f32 %v829_v46, %v831_v51  ;;  %v780_v58 = vmax.f32 %v706_v35, 0.0  ;;  %v824_v51 = vmax.f32 %v7369_v47, %v823_v5  ;;  %v1408_v5 = vld [vmem:[#allocation2 + $0x2e0] sm:$0xff] }
 0x1ee   :  { %v779_v59 = vmax.f32 %v701_v52, 0.0  ;;  %v6085_v62 = vpop.f32.mrb[22].mxu1 }
 0x1ef   :  { %v837_v0 = vsel %vm791_vm6, %v780_v58, -inf  ;;  %v716_v1 = vadd.f32 %v6085_v62, %v7333_v21  ;;  %v710_v4 = vpop.f32.mrb[23].mxu1 }
 0x1f0   :  { %v838_v7 = vmax.f32 %v834_v49, %v837_v0  ;;  %v835_v9 = vsel %vm791_vm6, %v779_v59, -inf  ;;  %v711_v10 = vadd.f32 %v7333_v21, %v710_v4 }
 0x1f1   :  { %v836_v12 = vmax.f32 %v832_v56, %v835_v9  ;;  %v782_v13 = vmax.f32 %v716_v1, 0.0  ;;  %v825_v1 = vrot.slane %v824_v51, 2 }
 0x1f2   :  { %v781_v15 = vmax.f32 %v711_v10, 0.0  ;;  %v6088_v16 = vpop.f32.mrb[24].mxu1 }
 0x1f3   :  { %v841_v18 = vsel %vm791_vm6, %v782_v13, -inf  ;;  %v726_v19 = vadd.f32 %v6088_v16, %v7333_v21  ;;  %v720_v22 = vpop.f32.mrb[25].mxu1  ;;  %v826_v10 = vmax.f32 %v824_v51, %v825_v1 }
 0x1f4   :  { %v842_v24 = vmax.f32 %v838_v7, %v841_v18  ;;  %v839_v25 = vsel %vm791_vm6, %v781_v15, -inf  ;;  %v721_v27 = vadd.f32 %v7333_v21, %v720_v22 }
 0x1f5   :  { %v840_v28 = vmax.f32 %v836_v12, %v839_v25  ;;  %v784_v30 = vmax.f32 %v726_v19, 0.0  ;;  %v827_v16 = vrot.slane %v826_v10, 1 }
 0x1f6   :  { %v783_v31 = vmax.f32 %v721_v27, 0.0  ;;  %v6091_v33 = vpop.f32.mrb[26].mxu1 }
 0x1f7   :  { %v845_v34 = vsel %vm791_vm6, %v784_v30, -inf  ;;  %v736_v36 = vadd.f32 %v6091_v33, %v7333_v21  ;;  %v730_v37 = vpop.f32.mrb[27].mxu1  ;;  %v828_v27 = vmax.f32 %v826_v10, %v827_v16 }
 0x1f8   :  { %v846_v39 = vmax.f32 %v842_v24, %v845_v34  ;;  %v843_v40 = vsel %vm791_vm6, %v783_v31, -inf  ;;  %v731_v43 = vadd.f32 %v7333_v21, %v730_v37 }
 0x1f9   :  { %v844_v45 = vmax.f32 %v840_v28, %v843_v40  ;;  %v786_v48 = vmax.f32 %v736_v36, 0.0 }
 0x1fa   :  { %v785_v50 = vmax.f32 %v731_v43, 0.0  ;;  %v6094_v54 = vpop.f32.mrb[28].mxu1 }
 0x1fb   :  { %v849_v63 = vsel %vm791_vm6, %v786_v48, -inf  ;;  %v746_v2 = vadd.f32 %v6094_v54, %v7333_v21  ;;  %v740_v8 = vpop.f32.mrb[29].mxu1 }
 0x1fc   :  { %v850_v20 = vmax.f32 %v846_v39, %v849_v63  ;;  %v847_v26 = vsel %vm791_vm6, %v785_v50, -inf  ;;  %v741_v38 = vadd.f32 %v7333_v21, %v740_v8 }
 0x1fd   :  { %v848_v41 = vmax.f32 %v844_v45, %v847_v26  ;;  %v788_v53 = vmax.f32 %v746_v2, 0.0 }
 0x1fe   :  { %v787_v57 = vmax.f32 %v741_v38, 0.0  ;;  %v6097_v60 = vpop.f32.mrb[30].mxu1 }
 0x1ff   :  { %v853_v11 = vsel %vm791_vm6, %v788_v53, -inf  ;;  %v756_v14 = vadd.f32 %v6097_v60, %v7333_v21  ;;  %v750_v17 = vpop.f32.mrb[31].mxu1 }
 0x200   :  { %v854_v23 = vmax.f32 %v850_v20, %v853_v11  ;;  %v851_v32 = vsel %vm791_vm6, %v787_v57, -inf  ;;  %v751_v29 = vadd.f32 %v7333_v21, %v750_v17  ;;  %v1409_v11 = vld [vmem:[#allocation2 + $0x2e8] sm:$0xff]  ;;  %v1410_v17 = vld [vmem:[#allocation2 + $0x2f0] sm:$0xff] }
 0x201   :  { %v852_v35 = vmax.f32 %v848_v41, %v851_v32  ;;  %v790_v44 = vmax.f32 %v756_v14, 0.0  ;;  %v6643_v14 = vpack.c.bf16 %v1409_v11, %v1408_v5 }
 0x202   :  { %v789_v46 = vmax.f32 %v751_v29, 0.0  ;;  %v7400_v49 = vpop.f32.mrb[32].mxu1 }
 0x203   :  { %v857_v52 = vsel %vm791_vm6, %v790_v44, -inf  ;;  %v7404_v56 = vpop.f32.mrb[33].mxu1  ;;  %6644 = vmatprep.subr.bf16.mxu0 %v6643_v14  ;;  %v7451_v44 = vsub.s32 0, %v7308_v55 }
 0x204   :  { %v858_v58 = vmax.f32 %v854_v23, %v857_v52  ;;  %v855_v59 = vsel %vm791_vm6, %v789_v46, -inf  ;;  %v1411_v23 = vld [vmem:[#allocation2 + $0x2f8] sm:$0xff] }
 0x205   :  { %v856_v62 = vmax.f32 %v852_v35, %v855_v59  ;;  %v6647_v32 = vpack.c.bf16 %v1411_v23, %v1410_v17  ;;  %9351 = vst [vmem:[#allocation7_spill] sm:$0xff] %v7451_v44 }
 0x206   :  { %v7407_v0 = vpop.f32.mrb[34].mxu1 }
 0x207   :  { %v859_v4 = vmax.f32 %v856_v62, %v858_v58  ;;  %v1125_v21 = vpop.f32.mrb[35].mxu1  ;;  %v7455_v58 = vld [vmem:[#allocation2 + $0x240] ss:$0 sm:$0xff] }
 0x209   :  { %v860_v7 = vrot.slane %v859_v4, 4 }
 0x20a   :  { %v6138_v9 = vpop.f32.mrb[36].mxu1 }
 0x20b   :  { %v861_v12 = vmax.f32 %v859_v4, %v860_v7  ;;  %v1135_v13 = vpop.f32.mrb[37].mxu1 }
 0x20d   :  { %v862_v15 = vrot.slane %v861_v12, 2 }
 0x20e   :  { %v6141_v47 = vpop.f32.mrb[38].mxu1 }
 0x20f   :  { %v863_v18 = vmax.f32 %v861_v12, %v862_v15  ;;  %v1145_v19 = vpop.f32.mrb[39].mxu1 }
 0x211   :  { %v864_v22 = vrot.slane %v863_v18, 1 }
 0x212   :  { %v7409_v24 = vpop.f32.mrb[40].mxu1 }
 0x213   :  { %v7411_v25 = vpop.f32.mrb[41].mxu1  ;;  %v865_v28 = vmax.f32 %v863_v18, %v864_v22 }
 0x215   :  { %v972_v30 = vsel %vm971_vm7, %v865_v28, %v828_v27 }
 0x216   :  { %6120 = vmatmul.mubr.msk.f32.vlgmr.msra.gmra.mrb[32].mxu0 %vm791_vm6, %v972_v30  ;;  %v6147_v31 = vpop.f32.mrb[42].mxu1 }
 0x217   :  { %v1165_v33 = vpop.f32.mrb[43].mxu1  ;;  %6646 = vmatpush3.bf16.msra.mxu0 %v6643_v14 }
 0x218   :  { %6648 = vmatprep.subr.bf16.mxu0 %v6647_v32 }
 0x21a   :  { %v6150_v34 = vpop.f32.mrb[44].mxu1 }
 0x21b   :  { %v1175_v36 = vpop.f32.mrb[45].mxu1  ;;  %6650 = vmatpush3.bf16.msra.mxu0 %v6647_v32 }
 0x21e   :  { %v7415_v37 = vpop.f32.mrb[46].mxu1 }
 0x21f   :  { %v1185_v39 = vpop.f32.mrb[47].mxu1 }
 0x222   :  { %v7417_v40 = vpop.f32.mrb[48].mxu1 }
 0x223   :  { %v7419_v43 = vpop.f32.mrb[49].mxu1 }
 0x226   :  { %v7421_v45 = vpop.f32.mrb[50].mxu1 }
 0x227   :  { %v7423_v48 = vpop.f32.mrb[51].mxu1 }
 0x22a   :  { %v7425_v50 = vpop.f32.mrb[52].mxu1 }
 0x22b   :  { %v7427_v54 = vpop.f32.mrb[53].mxu1 }
 0x22e   :  { %v7429_v63 = vpop.f32.mrb[54].mxu1 }
 0x22f   :  { %v7431_v2 = vpop.f32.mrb[55].mxu1 }
 0x232   :  { %v7433_v8 = vpop.f32.mrb[56].mxu1 }
 0x233   :  { %v7435_v20 = vpop.f32.mrb[57].mxu1 }
 0x236   :  { %v7437_v26 = vpop.f32.mrb[58].mxu1 }
 0x237   :  { %v7439_v38 = vpop.f32.mrb[59].mxu1 }
 0x23a   :  { %v7441_v41 = vpop.f32.mrb[60].mxu1 }
 0x23b   :  { %v7443_v53 = vpop.f32.mrb[61].mxu1 }
 0x23e   :  { %v7445_v57 = vpop.f32.mrb[62].mxu1 }
 0x23f   :  { %v7447_v60 = vpop.f32.mrb[63].mxu1 }
 0x2e9   :  { %v1041_v29 = vpop.f32.mrb[32].mxu0 }
 0x2ea   :  { %v1281_v35 = vrot.slane %v1041_v29, %v7317_v61  ;;  %v6121_v46 = vpop.f32.mrb[33].mxu0 }
 0x2ec   :  { %v1289_v51 = vrot.slane %v1281_v35, %v7317_v61  ;;  %v1282_v59 = vcombine.high %v1281_v35, %v1281_v35 }
 0x2ee   :  { %v1300_v52 = vrot.slane %v1289_v51, %v7451_v44  ;;  %v1296_v27 = vrot.slane %v1282_v59, %v7317_v61 }
 0x2f0   :  { %v1307_v62 = vadd.f32 %v1300_v52, %v7404_v56  ;;  %v1308_v1 = vadd.f32 %v7400_v49, %v1300_v52  ;;  %v1309_v4 = vadd.f32 %v1300_v52, %v1125_v21  ;;  %v1310_v7 = vadd.f32 %v7407_v0, %v1300_v52 }
 0x2f1   :  { %v1311_v10 = vadd.f32 %v1300_v52, %v1135_v13  ;;  %v1312_v12 = vadd.f32 %v6138_v9, %v1300_v52  ;;  %v1313_v15 = vadd.f32 %v1300_v52, %v1145_v19  ;;  %v1314_v22 = vadd.f32 %v6141_v47, %v1300_v52 }
 0x2f2   :  { %v1344_v55 = vadd.f32 %v7455_v58, %v1307_v62  ;;  %v1345_v16 = vadd.f32 %v7455_v58, %v1308_v1  ;;  %v1346_v18 = vadd.f32 %v7455_v58, %v1309_v4  ;;  %v1347_v56 = vadd.f32 %v7455_v58, %v1310_v7 }
 0x2f3   :  { %v1348_v49 = vadd.f32 %v7455_v58, %v1311_v10  ;;  %v1315_v21 = vadd.f32 %v1300_v52, %v7411_v25  ;;  %v1316_v9 = vadd.f32 %v7409_v24, %v1300_v52  ;;  %v1317_v13 = vadd.f32 %v1300_v52, %v1165_v33 }
 0x2f4   :  { %v1376_v28 = vmax.f32 %v1344_v55, 0.0  ;;  %v1377_v30 = vmax.f32 %v1345_v16, 0.0  ;;  %v1378_v0 = vmax.f32 %v1346_v18, 0.0  ;;  %v1318_v19 = vadd.f32 %v6147_v31, %v1300_v52 }
 0x2f5   :  { %v1319_v47 = vadd.f32 %v1300_v52, %v1175_v36  ;;  %v1320_v5 = vadd.f32 %v6150_v34, %v1300_v52  ;;  %v1321_v11 = vadd.f32 %v1300_v52, %v1185_v39  ;;  %v1304_v14 = vrot.slane %v1296_v27, %v7451_v44 }
 0x2f6   :  { %6186 = vmatprep.mubr.msk.f32.mxu0 %vm437_vm2, %v1376_v28  ;;  %v1349_v17 = vadd.f32 %v7455_v58, %v1312_v12  ;;  %v1322_v23 = vadd.f32 %v7415_v37, %v1300_v52  ;;  %v1379_v32 = vmax.f32 %v1347_v56, 0.0  ;;  %v1380_v29 = vmax.f32 %v1348_v49, 0.0 }
 0x2f7   :  { %6187 = vmatmul.mubr.msk.f32.vlgmr.msra.gmra.mrb[34].mxu0 %vm437_vm2, %v1377_v30  ;;  %v1350_v25 = vadd.f32 %v7455_v58, %v1313_v15  ;;  %v1351_v24 = vadd.f32 %v7455_v58, %v1314_v22  ;;  %v1323_v33 = vadd.f32 %v1304_v14, %v7419_v43  ;;  %v1324_v34 = vadd.f32 %v7417_v40, %v1304_v14 }
 0x2f8   :  { %6189 = vmatprep.mubr.msk.f32.mxu0 %vm437_vm2, %v1378_v0  ;;  %v1381_v31 = vmax.f32 %v1349_v17, 0.0  ;;  %v1325_v36 = vadd.f32 %v1304_v14, %v7423_v48  ;;  %v1326_v39 = vadd.f32 %v7421_v45, %v1304_v14  ;;  %v1327_v37 = vadd.f32 %v1304_v14, %v7427_v54 }
 0x2f9   :  { %v1328_v35 = vadd.f32 %v7425_v50, %v1304_v14  ;;  %v1329_v46 = vadd.f32 %v1304_v14, %v7431_v2  ;;  %v1382_v51 = vmax.f32 %v1350_v25, 0.0  ;;  %v1352_v52 = vadd.f32 %v7455_v58, %v1315_v21 }
 0x2fa   :  { %v1330_v59 = vadd.f32 %v7429_v63, %v1304_v14  ;;  %v1383_v40 = vmax.f32 %v1351_v24, 0.0  ;;  %v1353_v43 = vadd.f32 %v7455_v58, %v1316_v9  ;;  %v1354_v45 = vadd.f32 %v7455_v58, %v1317_v13 }
 0x2fb   :  { %6190 = vmatmul.mubr.msk.f32.gmra.mrb[36].mxu0 %vm437_vm2, %v1379_v32  ;;  %v1384_v48 = vmax.f32 %v1352_v52, 0.0  ;;  %v1331_v54 = vadd.f32 %v1304_v14, %v7435_v20  ;;  %v1332_v50 = vadd.f32 %v7433_v8, %v1304_v14  ;;  %v1333_v2 = vadd.f32 %v1304_v14, %v7439_v38 }
 0x2fc   :  { %6192 = vmatprep.mubr.msk.f32.mxu0 %vm437_vm2, %v1380_v29  ;;  %v1334_v63 = vadd.f32 %v7437_v26, %v1304_v14  ;;  %v1335_v62 = vadd.f32 %v1304_v14, %v7443_v53  ;;  %v1336_v1 = vadd.f32 %v7441_v41, %v1304_v14  ;;  %v1337_v4 = vadd.f32 %v1304_v14, %v7447_v60 }
 0x2fd   :  { %v1338_v7 = vadd.f32 %v7445_v57, %v1304_v14  ;;  %v1385_v10 = vmax.f32 %v1353_v43, 0.0  ;;  %v1355_v20 = vadd.f32 %v7455_v58, %v1318_v19  ;;  %v1386_v8 = vmax.f32 %v1354_v45, 0.0 }
 0x2fe   :  { %v1356_v38 = vadd.f32 %v7455_v58, %v1319_v47  ;;  %v1357_v53 = vadd.f32 %v7455_v58, %v1320_v5  ;;  %v1358_v60 = vadd.f32 %v7455_v58, %v1321_v11  ;;  %v1359_v12 = vadd.f32 %v7455_v58, %v1322_v23 }
 0x2ff   :  { %6193 = vmatmul.mubr.msk.f32.gmra.mrb[38].mxu0 %vm437_vm2, %v1381_v31  ;;  %v1387_v26 = vmax.f32 %v1355_v20, 0.0  ;;  %v1360_v55 = vadd.f32 %v7455_v58, %v1323_v33  ;;  %v1361_v18 = vadd.f32 %v7455_v58, %v1324_v34  ;;  %v1362_v27 = vadd.f32 %v7455_v58, %v1325_v36 }
 0x300   :  { %6195 = vmatprep.mubr.msk.f32.mxu0 %vm437_vm2, %v1382_v51  ;;  %v1388_v41 = vmax.f32 %v1356_v38, 0.0  ;;  %v1389_v57 = vmax.f32 %v1357_v53, 0.0  ;;  %v1390_v15 = vmax.f32 %v1358_v60, 0.0  ;;  %v1391_v16 = vmax.f32 %v1359_v12, 0.0 }
 0x301   :  { %v1392_v22 = vmax.f32 %v1360_v55, 0.0  ;;  %v1393_v28 = vmax.f32 %v1361_v18, 0.0  ;;  %v1363_v30 = vadd.f32 %v7455_v58, %v1326_v39  ;;  %v1394_v56 = vmax.f32 %v1362_v27, 0.0 }
 0x302   :  { %v1364_v49 = vadd.f32 %v7455_v58, %v1327_v37  ;;  %v1365_v21 = vadd.f32 %v7455_v58, %v1328_v35  ;;  %v1366_v13 = vadd.f32 %v7455_v58, %v1329_v46  ;;  %v1367_v47 = vadd.f32 %v7455_v58, %v1330_v59  ;;  %v7545_v59 = vld [vmem:[#allocation2 + $0x248] ss:$0 sm:$0xff] }
 0x303   :  { %6196 = vmatmul.mubr.msk.f32.gmra.mrb[40].mxu0 %vm437_vm2, %v1383_v40  ;;  %v1395_v0 = vmax.f32 %v1363_v30, 0.0  ;;  %v1368_v11 = vadd.f32 %v7455_v58, %v1331_v54  ;;  %v1369_v17 = vadd.f32 %v7455_v58, %v1332_v50  ;;  %v1370_v32 = vadd.f32 %v7455_v58, %v1333_v2 }
 0x304   :  { %6198 = vmatprep.mubr.msk.f32.mxu0 %vm437_vm2, %v1384_v48  ;;  %v1396_v9 = vmax.f32 %v1364_v49, 0.0  ;;  %v1397_v19 = vmax.f32 %v1365_v21, 0.0  ;;  %v1398_v5 = vmax.f32 %v1366_v13, 0.0  ;;  %v1399_v14 = vmax.f32 %v1367_v47, 0.0  ;;  %v2333_v48 = vld [vmem:[#allocation2 + $0x1a0] sm:$0x7] }
 0x305   :  { %v1400_v23 = vmax.f32 %v1368_v11, 0.0  ;;  %v1401_v29 = vmax.f32 %v1369_v17, 0.0  ;;  %v1371_v25 = vadd.f32 %v7455_v58, %v1334_v63  ;;  %v1402_v24 = vmax.f32 %v1370_v32, 0.0  ;;  %6234 = vmatprep.subr.msk.mxu1 %vm895_vm3, %v2333_v48 }
 0x306   :  { %v1372_v31 = vadd.f32 %v7455_v58, %v1335_v62  ;;  %v1373_v34 = vadd.f32 %v7455_v58, %v1336_v1  ;;  %v1374_v39 = vadd.f32 %v7455_v58, %v1337_v4  ;;  %v1375_v35 = vadd.f32 %v7455_v58, %v1338_v7  ;;  %6235 = vmatpush3.msk.msra.mxu1 %vm895_vm3, %v2333_v48 }
 0x307   :  { %6199 = vmatmul.mubr.msk.f32.gmra.mrb[42].mxu0 %vm437_vm2, %v1385_v10  ;;  %v1403_v33 = vmax.f32 %v1371_v25, 0.0  ;;  %v6871_v52 = vmov 2   ;;  %6340 = vmatprep.subr.mxu1 %v9286_v42 }
 0x308   :  { %6201 = vmatprep.mubr.msk.f32.mxu0 %vm437_vm2, %v1386_v8  ;;  %v1404_v36 = vmax.f32 %v1372_v31, 0.0  ;;  %v1405_v37 = vmax.f32 %v1373_v34, 0.0  ;;  %v1406_v46 = vmax.f32 %v1374_v39, 0.0  ;;  %v1407_v51 = vmax.f32 %v1375_v35, 0.0  ;;  %6768 = vset.pattern.permute.xlu1 %v6871_v52 }
 0x309   :  { %6757 = vset.pattern.permute.xlu0 %v6871_v52 }
 0x30b   :  { %6202 = vmatmul.mubr.msk.f32.gmra.mrb[44].mxu0 %vm437_vm2, %v1387_v26 }
 0x30c   :  { %6204 = vmatprep.mubr.msk.f32.mxu0 %vm437_vm2, %v1388_v41 }
 0x30f   :  { %6205 = vmatmul.mubr.msk.f32.gmra.mrb[46].mxu0 %vm437_vm2, %v1389_v57 }
 0x310   :  { %6207 = vmatprep.mubr.msk.f32.mxu0 %vm437_vm2, %v1390_v15 }
 0x313   :  { %6208 = vmatmul.mubr.msk.f32.gmra.mrb[48].mxu0 %vm437_vm2, %v1391_v16 }
 0x314   :  { %6210 = vmatprep.mubr.msk.f32.mxu0 %vm437_vm2, %v1392_v22 }
 0x317   :  { %6211 = vmatmul.mubr.msk.f32.gmra.mrb[50].mxu0 %vm437_vm2, %v1393_v28 }
 0x318   :  { %6213 = vmatprep.mubr.msk.f32.mxu0 %vm437_vm2, %v1394_v56 }
 0x31b   :  { %6214 = vmatmul.mubr.msk.f32.gmra.mrb[52].mxu0 %vm437_vm2, %v1395_v0 }
 0x31c   :  { %6216 = vmatprep.mubr.msk.f32.mxu0 %vm437_vm2, %v1396_v9 }
 0x31f   :  { %6217 = vmatmul.mubr.msk.f32.gmra.mrb[54].mxu0 %vm437_vm2, %v1397_v19 }
 0x320   :  { %6219 = vmatprep.mubr.msk.f32.mxu0 %vm437_vm2, %v1398_v5 }
 0x323   :  { %6220 = vmatmul.mubr.msk.f32.gmra.mrb[56].mxu0 %vm437_vm2, %v1399_v14 }
 0x324   :  { %6222 = vmatprep.mubr.msk.f32.mxu0 %vm437_vm2, %v1400_v23 }
 0x327   :  { %6223 = vmatmul.mubr.msk.f32.gmra.mrb[58].mxu0 %vm437_vm2, %v1401_v29 }
 0x328   :  { %6225 = vmatprep.mubr.msk.f32.mxu0 %vm437_vm2, %v1402_v24 }
 0x32b   :  { %6226 = vmatmul.mubr.msk.f32.gmra.mrb[60].mxu0 %vm437_vm2, %v1403_v33 }
 0x32c   :  { %6228 = vmatprep.mubr.msk.f32.mxu0 %vm437_vm2, %v1404_v36 }
 0x32f   :  { %6229 = vmatmul.mubr.msk.f32.gmra.mrb[62].mxu0 %vm437_vm2, %v1405_v37 }
 0x330   :  { %6231 = vmatprep.mubr.msk.f32.mxu0 %vm437_vm2, %v1406_v46 }
 0x333   :  { %6232 = vmatmul.mubr.msk.f32.gmra.mrb[64].mxu0 %vm437_vm2, %v1407_v51 }
 0x3ca   :  { %v6188_v40 = vpop.f32.mrb[34].mxu0 }
 0x3cb   :  { %v1585_v43 = vadd.f32 %v6188_v40, %v7545_v59  ;;  %v1579_v45 = vpop.f32.mrb[35].mxu0 }
 0x3cc   :  { %v1580_v58 = vadd.f32 %v7545_v59, %v1579_v45 }
 0x3cd   :  { %vm1739_vm10 = vcmp.gt.f32.partialorder %v1585_v43, 0.0 }
 0x3ce   :  { %v7551_v54 = vsel %vm1739_vm10, 1.0, %v9286_v42  ;;  %vm1738_vm11 = vcmp.gt.f32.partialorder %v1580_v58, 0.0  ;;  %v6191_v50 = vpop.f32.mrb[36].mxu0 }
 0x3cf   :  { %v1836_v2 = vsel %vm1834_vm8, %v7551_v54, 0.0  ;;  %v7557_v63 = vsel %vm1738_vm11, 1.0, %v9286_v42  ;;  %v1595_v62 = vadd.f32 %v6191_v50, %v7545_v59  ;;  %v1589_v1 = vpop.f32.mrb[37].mxu0  ;;  %v7562_v4 = vsel %vm5074_vm9, %v1585_v43, %v7551_v54 }
 0x3d0   :  { %v1835_v7 = vsel %vm1834_vm8, %v7557_v63, 0.0  ;;  %v1590_v10 = vadd.f32 %v7545_v59, %v1589_v1  ;;  %v7570_v20 = vsel %vm5074_vm9, %v1580_v58, %v7557_v63 }
 0x3d1   :  { %v1837_v8 = vadd.f32 %v1836_v2, %v1835_v7  ;;  %vm1741_vm12 = vcmp.gt.f32.partialorder %v1595_v62, 0.0 }
 0x3d2   :  { %v7573_v38 = vsel %vm1741_vm12, 1.0, %v9286_v42  ;;  %vm1740_vm13 = vcmp.gt.f32.partialorder %v1590_v10, 0.0  ;;  %v6194_v26 = vpop.f32.mrb[38].mxu0 }
 0x3d3   :  { %v7576_v53 = vsel %vm1740_vm13, 1.0, %v9286_v42  ;;  %v1605_v41 = vadd.f32 %v6194_v26, %v7545_v59  ;;  %v1599_v60 = vpop.f32.mrb[39].mxu0  ;;  %v7581_v57 = vsel %vm5074_vm9, %v1595_v62, %v7573_v38  ;;  %v1840_v18 = vsel %vm1834_vm8, %v7573_v38, 0.0 }
 0x3d4   :  { %v1838_v12 = vsel %vm1834_vm8, %v7576_v53, 0.0  ;;  %v1600_v15 = vadd.f32 %v7545_v59, %v1599_v60  ;;  %v7588_v55 = vsel %vm5074_vm9, %v1590_v10, %v7576_v53 }
 0x3d5   :  { %v1839_v16 = vadd.f32 %v1838_v12, %v1837_v8  ;;  %vm1743_vm14 = vcmp.gt.f32.partialorder %v1605_v41, 0.0 }
 0x3d6   :  { %v7593_v22 = vsel %vm1743_vm14, 1.0, %v9286_v42  ;;  %vm1742_vm15 = vcmp.gt.f32.partialorder %v1600_v15, 0.0  ;;  %v6197_v27 = vpop.f32.mrb[40].mxu0 }
 0x3d7   :  { %v7596_v28 = vsel %vm1742_vm15, 1.0, %v9286_v42  ;;  %v1841_v30 = vadd.f32 %v1840_v18, %v1839_v16  ;;  %v1615_v56 = vadd.f32 %v6197_v27, %v7545_v59  ;;  %v1609_v49 = vpop.f32.mrb[41].mxu0  ;;  %v7604_v9 = vsel %vm5074_vm9, %v1605_v41, %v7593_v22 }
 0x3d8   :  { %v1842_v0 = vsel %vm1834_vm8, %v7596_v28, 0.0  ;;  %v1610_v21 = vadd.f32 %v7545_v59, %v1609_v49  ;;  %v7608_v13 = vsel %vm5074_vm9, %v1600_v15, %v7596_v28  ;;  %v1844_v47 = vsel %vm1834_vm8, %v7593_v22, 0.0 }
 0x3d9   :  { %v1843_v19 = vadd.f32 %v1842_v0, %v1841_v30  ;;  %vm1745_vm0 = vcmp.gt.f32.partialorder %v1615_v56, 0.0 }
 0x3da   :  { %v7613_v5 = vsel %vm1745_vm0, 1.0, %v9286_v42  ;;  %vm1744_vm10 = vcmp.gt.f32.partialorder %v1610_v21, 0.0  ;;  %v6200_v11 = vpop.f32.mrb[42].mxu0 }
 0x3db   :  { %v7616_v14 = vsel %vm1744_vm10, 1.0, %v9286_v42  ;;  %v1845_v17 = vadd.f32 %v1844_v47, %v1843_v19  ;;  %v1625_v23 = vadd.f32 %v6200_v11, %v7545_v59  ;;  %v1619_v32 = vpop.f32.mrb[43].mxu0  ;;  %v7624_v24 = vsel %vm5074_vm9, %v1615_v56, %v7613_v5 }
 0x3dc   :  { %v1846_v29 = vsel %vm1834_vm8, %v7616_v14, 0.0  ;;  %v1620_v25 = vadd.f32 %v7545_v59, %v1619_v32  ;;  %v7628_v31 = vsel %vm5074_vm9, %v1610_v21, %v7616_v14  ;;  %v1848_v34 = vsel %vm1834_vm8, %v7613_v5, 0.0 }
 0x3dd   :  { %v1847_v33 = vadd.f32 %v1846_v29, %v1845_v17  ;;  %vm1747_vm11 = vcmp.gt.f32.partialorder %v1625_v23, 0.0 }
 0x3de   :  { %v7633_v36 = vsel %vm1747_vm11, 1.0, %v9286_v42  ;;  %vm1746_vm12 = vcmp.gt.f32.partialorder %v1620_v25, 0.0  ;;  %v6203_v39 = vpop.f32.mrb[44].mxu0 }
 0x3df   :  { %v7636_v37 = vsel %vm1746_vm12, 1.0, %v9286_v42  ;;  %v1849_v35 = vadd.f32 %v1848_v34, %v1847_v33  ;;  %v1635_v46 = vadd.f32 %v6203_v39, %v7545_v59  ;;  %v1629_v51 = vpop.f32.mrb[45].mxu0  ;;  %v7644_v43 = vsel %vm5074_vm9, %v1625_v23, %v7633_v36 }
 0x3e0   :  { %v1850_v52 = vsel %vm1834_vm8, %v7636_v37, 0.0  ;;  %v1630_v40 = vadd.f32 %v7545_v59, %v1629_v51  ;;  %v7648_v45 = vsel %vm5074_vm9, %v1620_v25, %v7636_v37  ;;  %v1852_v48 = vsel %vm1834_vm8, %v7633_v36, 0.0 }
 0x3e1   :  { %v1851_v58 = vadd.f32 %v1850_v52, %v1849_v35  ;;  %vm1749_vm13 = vcmp.gt.f32.partialorder %v1635_v46, 0.0 }
 0x3e2   :  { %v7653_v50 = vsel %vm1749_vm13, 1.0, %v9286_v42  ;;  %vm1748_vm14 = vcmp.gt.f32.partialorder %v1630_v40, 0.0  ;;  %v6206_v2 = vpop.f32.mrb[46].mxu0 }
 0x3e3   :  { %v7656_v62 = vsel %vm1748_vm14, 1.0, %v9286_v42  ;;  %v1853_v1 = vadd.f32 %v1852_v48, %v1851_v58  ;;  %v1645_v7 = vadd.f32 %v6206_v2, %v7545_v59  ;;  %v1639_v10 = vpop.f32.mrb[47].mxu0  ;;  %v7664_v41 = vsel %vm5074_vm9, %v1635_v46, %v7653_v50 }
 0x3e4   :  { %v1854_v8 = vsel %vm1834_vm8, %v7656_v62, 0.0  ;;  %v1640_v26 = vadd.f32 %v7545_v59, %v1639_v10  ;;  %v7668_v60 = vsel %vm5074_vm9, %v1630_v40, %v7656_v62  ;;  %v1856_v15 = vsel %vm1834_vm8, %v7653_v50, 0.0 }
 0x3e5   :  { %v1855_v12 = vadd.f32 %v1854_v8, %v1853_v1  ;;  %vm1751_vm15 = vcmp.gt.f32.partialorder %v1645_v7, 0.0 }
 0x3e6   :  { %v7673_v16 = vsel %vm1751_vm15, 1.0, %v9286_v42  ;;  %vm1750_vm0 = vcmp.gt.f32.partialorder %v1640_v26, 0.0  ;;  %v6209_v18 = vpop.f32.mrb[48].mxu0 }
 0x3e7   :  { %v7676_v27 = vsel %vm1750_vm0, 1.0, %v9286_v42  ;;  %v1857_v30 = vadd.f32 %v1856_v15, %v1855_v12  ;;  %v1655_v56 = vadd.f32 %v6209_v18, %v7545_v59  ;;  %v1649_v49 = vpop.f32.mrb[49].mxu0  ;;  %v7684_v19 = vsel %vm5074_vm9, %v1645_v7, %v7673_v16 }
 0x3e8   :  { %v1858_v0 = vsel %vm1834_vm8, %v7676_v27, 0.0  ;;  %v1650_v21 = vadd.f32 %v7545_v59, %v1649_v49  ;;  %v7688_v47 = vsel %vm5074_vm9, %v1640_v26, %v7676_v27  ;;  %v1860_v17 = vsel %vm1834_vm8, %v7673_v16, 0.0 }
 0x3e9   :  { %9352 = vst [vmem:[#allocation8_spill] sm:$0xff] %v7688_v47  ;;  %v1859_v11 = vadd.f32 %v1858_v0, %v1857_v30  ;;  %vm1753_vm10 = vcmp.gt.f32.partialorder %v1655_v56, 0.0 }
 0x3ea   :  { %v7693_v23 = vsel %vm1753_vm10, 1.0, %v9286_v42  ;;  %vm1752_vm11 = vcmp.gt.f32.partialorder %v1650_v21, 0.0  ;;  %v6212_v32 = vpop.f32.mrb[50].mxu0 }
 0x3eb   :  { %v7696_v29 = vsel %vm1752_vm11, 1.0, %v9286_v42  ;;  %v1861_v25 = vadd.f32 %v1860_v17, %v1859_v11  ;;  %v1665_v33 = vadd.f32 %v6212_v32, %v7545_v59  ;;  %v1659_v34 = vpop.f32.mrb[51].mxu0  ;;  %v7704_v46 = vsel %vm5074_vm9, %v1655_v56, %v7693_v23 }
 0x3ec   :  { %v1862_v39 = vsel %vm1834_vm8, %v7696_v29, 0.0  ;;  %v1660_v35 = vadd.f32 %v7545_v59, %v1659_v34  ;;  %9353 = vst [vmem:[#allocation9_spill] sm:$0xff] %v7704_v46  ;;  %v7708_v51 = vsel %vm5074_vm9, %v1650_v21, %v7696_v29  ;;  %v1864_v40 = vsel %vm1834_vm8, %v7693_v23, 0.0 }
 0x3ed   :  { %9354 = vst [vmem:[#allocation10_spill] sm:$0xff] %v7708_v51  ;;  %v1863_v52 = vadd.f32 %v1862_v39, %v1861_v25  ;;  %vm1755_vm12 = vcmp.gt.f32.partialorder %v1665_v33, 0.0 }
 0x3ee   :  { %v7713_v58 = vsel %vm1755_vm12, 1.0, %v9286_v42  ;;  %vm1754_vm13 = vcmp.gt.f32.partialorder %v1660_v35, 0.0  ;;  %v6215_v48 = vpop.f32.mrb[52].mxu0 }
 0x3ef   :  { %v1865_v2 = vadd.f32 %v1864_v40, %v1863_v52  ;;  %v1873_v1 = vsel %vm1834_vm8, %v7713_v58, 0.0  ;;  %v7718_v7 = vsel %vm1754_vm13, 1.0, %v9286_v42  ;;  %v1675_v10 = vadd.f32 %v6215_v48, %v7545_v59  ;;  %v1669_v8 = vpop.f32.mrb[53].mxu0 }
 0x3f0   :  { %v1872_v26 = vsel %vm1834_vm8, %v7718_v7, 0.0  ;;  %v1670_v12 = vadd.f32 %v7545_v59, %v1669_v8  ;;  %v7726_v15 = vsel %vm5074_vm9, %v1665_v33, %v7713_v58  ;;  %v7730_v18 = vsel %vm5074_vm9, %v1660_v35, %v7718_v7 }
 0x3f1   :  { %9355 = vst [vmem:[#allocation11_spill] sm:$0xff] %v7726_v15  ;;  %9356 = vst [vmem:[#allocation12_spill] sm:$0xff] %v7730_v18  ;;  %v1866_v30 = vrot.slane %v1865_v2, 4  ;;  %v1874_v56 = vadd.f32 %v1873_v1, %v1872_v26  ;;  %vm1757_vm14 = vcmp.gt.f32.partialorder %v1675_v10, 0.0 }
 0x3f2   :  { %v7733_v49 = vsel %vm1757_vm14, 1.0, %v9286_v42  ;;  %vm1756_vm15 = vcmp.gt.f32.partialorder %v1670_v12, 0.0  ;;  %v6218_v0 = vpop.f32.mrb[54].mxu0 }
 0x3f3   :  { %v1867_v21 = vadd.f32 %v1866_v30, %v1865_v2  ;;  %v7736_v11 = vsel %vm1756_vm15, 1.0, %v9286_v42  ;;  %v1685_v17 = vadd.f32 %v6218_v0, %v7545_v59  ;;  %v1679_v32 = vpop.f32.mrb[55].mxu0  ;;  %v7744_v34 = vsel %vm5074_vm9, %v1675_v10, %v7733_v49 }
 0x3f4   :  { %v1875_v25 = vsel %vm1834_vm8, %v7736_v11, 0.0  ;;  %v1680_v33 = vadd.f32 %v7545_v59, %v1679_v32  ;;  %9357 = vst [vmem:[#allocation13_spill] sm:$0xff] %v7744_v34  ;;  %v7748_v39 = vsel %vm5074_vm9, %v1670_v12, %v7736_v11  ;;  %v1877_v40 = vsel %vm1834_vm8, %v7733_v49, 0.0 }
 0x3f5   :  { %9358 = vst [vmem:[#allocation14_spill] sm:$0xff] %v7748_v39  ;;  %v1868_v35 = vrot.slane %v1867_v21, 2  ;;  %v1876_v52 = vadd.f32 %v1875_v25, %v1874_v56  ;;  %vm1759_vm0 = vcmp.gt.f32.partialorder %v1685_v17, 0.0 }
 0x3f6   :  { %v7753_v48 = vsel %vm1759_vm0, 1.0, %v9286_v42  ;;  %vm1758_vm10 = vcmp.gt.f32.partialorder %v1680_v33, 0.0  ;;  %v6221_v2 = vpop.f32.mrb[56].mxu0 }
 0x3f7   :  { %v1869_v1 = vadd.f32 %v1868_v35, %v1867_v21  ;;  %v7756_v8 = vsel %vm1758_vm10, 1.0, %v9286_v42  ;;  %v1878_v10 = vadd.f32 %v1877_v40, %v1876_v52  ;;  %v1689_v26 = vpop.f32.mrb[57].mxu0  ;;  %v1695_v30 = vadd.f32 %v6221_v2, %v7545_v59 }
 0x3f8   :  { %v1879_v12 = vsel %vm1834_vm8, %v7756_v8, 0.0  ;;  %v1690_v56 = vadd.f32 %v7545_v59, %v1689_v26  ;;  %v7764_v0 = vsel %vm5074_vm9, %v1685_v17, %v7753_v48  ;;  %v7768_v21 = vsel %vm5074_vm9, %v1680_v33, %v7756_v8 }
 0x3f9   :  { %9359 = vst [vmem:[#allocation15_spill] sm:$0xff] %v7764_v0  ;;  %v1870_v32 = vrot.slane %v1869_v1, 1  ;;  %v1880_v25 = vadd.f32 %v1879_v12, %v1878_v10  ;;  %9360 = vst [vmem:[#allocation16_spill] sm:$0xff] %v7768_v21  ;;  %v1881_v35 = vsel %vm1834_vm8, %v7753_v48, 0.0  ;;  %vm1761_vm11 = vcmp.gt.f32.partialorder %v1695_v30, 0.0 }
 0x3fa   :  { %vm1760_vm12 = vcmp.gt.f32.partialorder %v1690_v56, 0.0  ;;  %v6224_v52 = vpop.f32.mrb[58].mxu0  ;;  %v7775_v2 = vsel %vm1761_vm11, 1.0, %v9286_v42 }
 0x3fb   :  { %v7772_v40 = vadd.f32 %v1870_v32, %v1869_v1  ;;  %v7778_v17 = vsel %vm1760_vm12, 1.0, %v9286_v42  ;;  %v1882_v26 = vadd.f32 %v1881_v35, %v1880_v25  ;;  %v1699_v10 = vpop.f32.mrb[59].mxu0  ;;  %v1885_v33 = vsel %vm1834_vm8, %v7775_v2, 0.0 }
 0x3fc   :  { %v1883_v12 = vsel %vm1834_vm8, %v7778_v17, 0.0  ;;  %v7785_v6 = vadd.f32 %v6224_v52, %v7545_v59  ;;  %v7788_v1 = vadd.f32 %v7545_v59, %v1699_v10  ;;  %v7793_v42 = vsel %vm5074_vm9, %v1695_v30, %v7775_v2 }
 0x3fd   :  { %vm1909_vm13 = vcmp.gt.f32.partialorder %v7772_v40, 0.0  ;;  %v1884_v32 = vadd.f32 %v1883_v12, %v1882_v26  ;;  %9361 = vst [vmem:[#allocation17_spill] sm:$0xff] %v7793_v42  ;;  %v7797_v25 = vsel %vm5074_vm9, %v1690_v56, %v7778_v17  ;;  %v9363_v10 = vmov 0.0  }
 0x3fe   :  { %9362 = vst [vmem:[#allocation18_spill] sm:$0xff] %v7797_v25  ;;  %vm1763_vm14 = vcmp.gt.f32.partialorder %v7785_v6, 0.0  ;;  %vm1762_vm15 = vcmp.gt.f32.partialorder %v7788_v1, 0.0  ;;  %v6227_v35 = vpop.f32.mrb[60].mxu0  ;;  %v1919_v52 = vsel %vm1909_vm13, %v7596_v28, 1.0  ;;  %v1920_v26 = vsel %vm1909_vm13, %v7593_v22, 1.0 }
 0x3ff   :  { %v7808_v30 = vsel %vm1763_vm14, 1.0, %v9363_v10  ;;  %v7811_v12 = vsel %vm1762_vm15, 1.0, %v9363_v10  ;;  %v1886_v56 = vadd.f32 %v1885_v33, %v1884_v32  ;;  %v7814_v44 = vadd.f32 %v6227_v35, %v7545_v59  ;;  %v1709_v61 = vpop.f32.mrb[61].mxu0 }
 0x400   :  { %v1887_v3 = vsel %vm1834_vm8, %v7811_v12, 0.0  ;;  %v7819_v28 = vadd.f32 %v7545_v59, %v1709_v61  ;;  %v1889_v22 = vsel %vm1834_vm8, %v7808_v30, 0.0  ;;  %v6769_v42 = vpack.i.bf16 %v1920_v26, %v1919_v52 }
 0x401   :  { %v1888_v25 = vadd.f32 %v1887_v3, %v1886_v56  ;;  %vm1765_vm0 = vcmp.gt.f32.partialorder %v7814_v44, 0.0  ;;  %v1915_v33 = vsel %vm1909_vm13, %v7557_v63, 1.0  ;;  %v1916_v61 = vsel %vm1909_vm13, %v7551_v54, 1.0 }
 0x402   :  { %v7825_v21 = vsel %vm1765_vm0, 1.0, %v9363_v10  ;;  %vm1764_vm10 = vcmp.gt.f32.partialorder %v7819_v28, 0.0  ;;  %v6230_v32 = vpop.f32.mrb[62].mxu0  ;;  %6770 = vperm.xlu1 %6768, %v6769_v42   ;;  %v1917_v56 = vsel %vm1909_vm13, %v7576_v53, 1.0  ;;  %v1918_v63 = vsel %vm1909_vm13, %v7573_v38, 1.0 }
 0x403   :  { %v7835_v35 = vsel %vm1764_vm10, 1.0, %v9363_v10  ;;  %v1890_v3 = vadd.f32 %v1889_v22, %v1888_v25  ;;  %v1719_v0 = vpop.f32.mrb[63].mxu0  ;;  %v1948_v54 = vsel %vm1834_vm8, %v1916_v61, 0.0  ;;  %v1893_v34 = vsel %vm1834_vm8, %v7825_v21, 0.0 }
 0x404   :  { %v1891_v39 = vsel %vm1834_vm8, %v7835_v35, 0.0  ;;  %v6758_v25 = vpack.i.bf16 %v1916_v61, %v1915_v33  ;;  %v1947_v42 = vsel %vm1834_vm8, %v1915_v33, 0.0  ;;  %v7850_v53 = vadd.f32 %v6230_v32, %v7545_v59 }
 0x405   :  { %v1892_v18 = vadd.f32 %v1891_v39, %v1890_v3  ;;  %v1949_v22 = vadd.f32 %v1948_v54, %v1947_v42  ;;  %v7853_v15 = vadd.f32 %v7545_v59, %v1719_v0  ;;  %v1921_v38 = vsel %vm1909_vm13, %v7616_v14, 1.0 }
 0x406   :  { %v6233_v51 = vpop.f32.mrb[64].mxu0  ;;  %v1950_v46 = vsel %vm1834_vm8, %v1917_v56, 0.0  ;;  %6759 = vperm.xlu0 %6757, %v6758_v25   ;;  %v1922_v39 = vsel %vm1909_vm13, %v7613_v5, 1.0  ;;  %v6763_v33 = vpack.i.bf16 %v1918_v63, %v1917_v56  ;;  %v1952_v32 = vsel %vm1834_vm8, %v1918_v63, 0.0 }
 0x407   :  { %v1894_v47 = vadd.f32 %v1893_v34, %v1892_v18  ;;  %v1729_v61 = vpop.f32.mrb[65].mxu0  ;;  %v1951_v3 = vadd.f32 %v1950_v46, %v1949_v22  ;;  %vm1767_vm11 = vcmp.gt.f32.partialorder %v7850_v53, 0.0  ;;  %vm1766_vm12 = vcmp.gt.f32.partialorder %v7853_v15, 0.0 }
 0x408   :  { %v7866_v14 = vsel %vm1767_vm11, 1.0, %v9363_v10  ;;  %v7869_v0 = vsel %vm1766_vm12, 1.0, %v9363_v10  ;;  %v6774_v18 = vpack.i.bf16 %v1922_v39, %v1921_v38  ;;  %v1735_v34 = vadd.f32 %v6233_v51, %v7545_v59 }
 0x409   :  { %v1954_v5 = vsel %vm1834_vm8, %v1919_v52, 0.0  ;;  %v1953_v56 = vadd.f32 %v1952_v32, %v1951_v3  ;;  %v1895_v63 = vsel %vm1834_vm8, %v7869_v0, 0.0  ;;  %v1730_v46 = vadd.f32 %v7545_v59, %v1729_v61 }
 0x40a   :  { %v1896_v54 = vadd.f32 %v1895_v63, %v1894_v47  ;;  %6775 = vperm.xlu1 %6768, %v6774_v18   ;;  %6764 = vperm.xlu0 %6757, %v6763_v33   ;;  %vm1769_vm14 = vcmp.gt.f32.partialorder %v1735_v34, 0.0  ;;  %v1925_v25 = vsel %vm1909_vm13, %v7656_v62, 1.0  ;;  %v1926_v51 = vsel %vm1909_vm13, %v7653_v50, 1.0 }
 0x40b   :  { %v1956_v52 = vsel %vm1834_vm8, %v1920_v26, 0.0  ;;  %v1955_v42 = vadd.f32 %v1954_v5, %v1953_v56  ;;  %v1897_v22 = vsel %vm1834_vm8, %v7866_v14, 0.0  ;;  %vm1768_vm15 = vcmp.gt.f32.partialorder %v1730_v46, 0.0 }
 0x40c   :  { %v7886_v59 = vsel %vm1769_vm14, 1.0, %v9363_v10  ;;  %v7889_v47 = vsel %vm1768_vm15, 1.0, %v9363_v10  ;;  %v1898_v33 = vadd.f32 %v1897_v22, %v1896_v54  ;;  %v6784_v61 = vpack.i.bf16 %v1926_v51, %v1925_v25 }
 0x40d   :  { %v1957_v62 = vadd.f32 %v1956_v52, %v1955_v42  ;;  %v1899_v32 = vsel %vm1834_vm8, %v7889_v47, 0.0  ;;  %v1923_v50 = vsel %vm1909_vm13, %v7636_v37, 1.0  ;;  %v1958_v26 = vsel %vm1834_vm8, %v1921_v38, 0.0 }
 0x40e   :  { %v1900_v3 = vadd.f32 %v1899_v32, %v1898_v33  ;;  %6785 = vperm.xlu1 %6768, %v6784_v61   ;;  %v1924_v18 = vsel %vm1909_vm13, %v7633_v36, 1.0  ;;  %v1929_v5 = vsel %vm1909_vm13, %v7696_v29, 1.0  ;;  %v1901_v63 = vsel %vm1834_vm8, %v7886_v59, 0.0 }
 0x40f   :  { %v1959_v56 = vadd.f32 %v1958_v26, %v1957_v62  ;;  %v6779_v54 = vpack.i.bf16 %v1924_v18, %v1923_v50  ;;  %v1930_v37 = vsel %vm1909_vm13, %v7693_v23, 1.0  ;;  %v1960_v38 = vsel %vm1834_vm8, %v1922_v39, 0.0 }
 0x410   :  { %v1902_v52 = vadd.f32 %v1901_v63, %v1900_v3  ;;  %v6794_v42 = vpack.i.bf16 %v1930_v37, %v1929_v5  ;;  %v1927_v36 = vsel %vm1909_vm13, %v7676_v27, 1.0  ;;  %v1928_v29 = vsel %vm1909_vm13, %v7673_v16, 1.0 }
 0x411   :  { %v1961_v22 = vadd.f32 %v1960_v38, %v1959_v56  ;;  %6780 = vperm.xlu0 %6757, %v6779_v54   ;;  %v7918_v33 = vsel %vm5074_vm9, %v7785_v6, %v7808_v30  ;;  %v1964_v39 = vsel %vm1834_vm8, %v1924_v18, 0.0  ;;  %v1962_v61 = vsel %vm1834_vm8, %v1923_v50, 0.0 }
 0x412   :  { %v1903_v23 = vrot.slane %v1902_v52, 4  ;;  %6795 = vperm.xlu1 %6768, %v6794_v42   ;;  %v6789_v62 = vpack.i.bf16 %v1928_v29, %v1927_v36  ;;  %v7925_v27 = vsel %vm5074_vm9, %v7788_v1, %v7811_v12  ;;  %v7930_v16 = vsel %vm5074_vm9, %v7814_v44, %v7825_v21 }
 0x413   :  { %v1963_v32 = vadd.f32 %v1962_v61, %v1961_v22  ;;  %v7935_v6 = vsel %vm5074_vm9, %v7819_v28, %v7835_v35  ;;  %v7940_v50 = vsel %vm5074_vm9, %v7850_v53, %v7866_v14  ;;  %v7945_v1 = vsel %vm5074_vm9, %v7853_v15, %v7869_v0 }
 0x414   :  { %v1904_v26 = vadd.f32 %v1903_v23, %v1902_v52  ;;  %9364 = vst [vmem:[#allocation19_spill] sm:$0xff] %v7945_v1  ;;  %v7949_v44 = vsel %vm5074_vm9, %v1730_v46, %v7889_v47  ;;  %v7953_v28 = vsel %vm5074_vm9, %v1735_v34, %v7886_v59  ;;  %v1966_v56 = vsel %vm1834_vm8, %v1925_v25, 0.0  ;;  %v8183_v1 = vld [vmem:[%s9279_s0 + $0x88] sm:$0xff] }
 0x415   :  { %9365 = vst [vmem:[#allocation20_spill] sm:$0xff] %v7949_v44  ;;  %v1965_v3 = vadd.f32 %v1964_v39, %v1963_v32  ;;  %6790 = vperm.xlu0 %6757, %v6789_v62   ;;  %9366 = vst [vmem:[#allocation21_spill] sm:$0xff] %v7953_v28  ;;  %v1968_v54 = vsel %vm1834_vm8, %v1926_v51, 0.0  ;;  %v1970_v52 = vsel %vm1834_vm8, %v1927_v36, 0.0  ;;  %v1972_v22 = vsel %vm1834_vm8, %v1928_v29, 0.0 }
 0x416   :  { %v1905_v18 = vrot.slane %v1904_v26, 2  ;;  %v1974_v34 = vsel %vm1834_vm8, %v1929_v5, 0.0  ;;  %v1976_v29 = vsel %vm1834_vm8, %v1930_v37, 0.0 }
 0x417   :  { %v1967_v53 = vadd.f32 %v1966_v56, %v1965_v3 }
 0x418   :  { %v1906_v63 = vadd.f32 %v1905_v18, %v1904_v26 }
 0x419   :  { %v1969_v38 = vadd.f32 %v1968_v54, %v1967_v53 }
 0x41a   :  { %v1907_v15 = vrot.slane %v1906_v63, 1 }
 0x41b   :  { %v1971_v42 = vadd.f32 %v1970_v52, %v1969_v38 }
 0x41c   :  { %v1908_v46 = vadd.f32 %v1907_v15, %v1906_v63 }
 0x41d   :  { %v1973_v23 = vadd.f32 %v1972_v22, %v1971_v42 }
 0x41e   :  { %vm1910_vm13 = vcmp.gt.f32.partialorder %v1908_v46, 0.0  ;;  %v7962_v39 = vsel %vm971_vm7, %v1908_v46, %v7772_v40 }
 0x41f   :  { %v1975_v25 = vadd.f32 %v1974_v34, %v1973_v23  ;;  %v1931_v51 = vsel %vm1910_vm13, %v7718_v7, 1.0  ;;  %v1932_v61 = vsel %vm1910_vm13, %v7713_v58, 1.0  ;;  %v1933_v36 = vsel %vm1910_vm13, %v7736_v11, 1.0 }
 0x420   :  { %v1984_v62 = vsel %vm1834_vm8, %v1931_v51, 0.0  ;;  %v1985_v5 = vsel %vm1834_vm8, %v1932_v61, 0.0  ;;  %2113 = vperm.xlu1 %6768, %v1933_v36   ;;  %v6799_v32 = vpack.i.bf16 %v1932_v61, %v1931_v51  ;;  %v1934_v26 = vsel %vm1910_vm13, %v7733_v49, 1.0 }
 0x421   :  { %v1986_v40 = vadd.f32 %v1985_v5, %v1984_v62  ;;  %v1936_v7 = vsel %vm1910_vm13, %v7753_v48, 1.0  ;;  %v1977_v3 = vadd.f32 %v1976_v29, %v1975_v25  ;;  %v1987_v58 = vsel %vm1834_vm8, %v1933_v36, 0.0 }
 0x422   :  { %6800 = vperm.xlu0 %6757, %v6799_v32   ;;  %v1938_v11 = vsel %vm1910_vm13, %v7775_v2, 1.0  ;;  %v1935_v37 = vsel %vm1910_vm13, %v7756_v8, 1.0  ;;  %v1989_v56 = vsel %vm1834_vm8, %v1934_v26, 0.0  ;;  %v1940_v49 = vsel %vm1910_vm13, %v7808_v30, 1.0 }
 0x423   :  { %v1988_v18 = vadd.f32 %v1987_v58, %v1986_v40  ;;  %v1978_v53 = vrot.slane %v1977_v3, 4  ;;  %v1937_v48 = vsel %vm1910_vm13, %v7778_v17, 1.0  ;;  %v1942_v63 = vsel %vm1910_vm13, %v7825_v21, 1.0 }
 0x424   :  { %2118 = vperm.xlu1 %6768, %v1934_v26   ;;  %v1939_v2 = vsel %vm1910_vm13, %v7811_v12, 1.0  ;;  %v1991_v8 = vsel %vm1834_vm8, %v1935_v37, 0.0  ;;  %v1944_v15 = vsel %vm1910_vm13, %v7866_v14, 1.0  ;;  %v1941_v52 = vsel %vm1910_vm13, %v7835_v35, 1.0 }
 0x425   :  { %v1990_v54 = vadd.f32 %v1989_v56, %v1988_v18  ;;  %v1979_v38 = vadd.f32 %v1978_v53, %v1977_v3  ;;  %v1993_v17 = vsel %vm1834_vm8, %v1936_v7, 0.0  ;;  %v1946_v21 = vsel %vm1910_vm13, %v7886_v59, 1.0 }
 0x426   :  { %v1943_v12 = vsel %vm1910_vm13, %v7869_v0, 1.0  ;;  %v1945_v22 = vsel %vm1910_vm13, %v7889_v47, 1.0  ;;  %v1995_v14 = vsel %vm1834_vm8, %v1937_v48, 0.0  ;;  %v1997_v51 = vsel %vm1834_vm8, %v1938_v11, 0.0 }
 0x427   :  { %v1980_v30 = vrot.slane %v1979_v38, 2  ;;  %v1992_v42 = vadd.f32 %v1991_v8, %v1990_v54  ;;  %v1999_v29 = vsel %vm1834_vm8, %v1939_v2, 0.0  ;;  %v2001_v0 = vsel %vm1834_vm8, %v1940_v49, 0.0 }
 0x428   :  { %2128 = vperm.xlu1 %6768, %v1936_v7   ;;  %v2003_v47 = vsel %vm1834_vm8, %v1941_v52, 0.0  ;;  %v2005_v5 = vsel %vm1834_vm8, %v1942_v63, 0.0  ;;  %v2007_v40 = vsel %vm1834_vm8, %v1943_v12, 0.0  ;;  %v2009_v7 = vsel %vm1834_vm8, %v1944_v15, 0.0 }
 0x429   :  { %v1981_v23 = vadd.f32 %v1980_v30, %v1979_v38  ;;  %v1994_v34 = vadd.f32 %v1993_v17, %v1992_v42  ;;  %v2011_v58 = vsel %vm1834_vm8, %v1945_v22, 0.0  ;;  %v2013_v18 = vsel %vm1834_vm8, %v1946_v21, 0.0  ;;  %v8028_v30 = vld [vmem:[%s9279_s0] sm:$0xff] }
 0x42a   :  { %vm5139_vm8 = vcmask 48128  }
 0x42b   :  { %v1982_v25 = vrot.slane %v1981_v23, 1  ;;  %v1996_v35 = vadd.f32 %v1995_v14, %v1994_v34 }
 0x42c   :  { %2138 = vperm.xlu1 %6768, %v1938_v11  }
 0x42d   :  { %v1983_v61 = vadd.f32 %v1982_v25, %v1981_v23  ;;  %v1998_v36 = vadd.f32 %v1997_v51, %v1996_v35  ;;  %v8045_v35 = vld [vmem:[%s9279_s0 + $0x18] sm:$0xff] }
 0x42f   :  { %2289 = vperm.xlu0 %6757, %v1983_v61   ;;  %v2000_v59 = vadd.f32 %v1999_v29, %v1998_v36  ;;  %v8052_v61 = vld [vmem:[%s9279_s0 + $0x10] sm:$0xff] }
 0x430   :  { %2148 = vperm.xlu1 %6768, %v1940_v49  }
 0x431   :  { %v2002_v46 = vadd.f32 %v2001_v0, %v2000_v59  ;;  %v8059_v59 = vld [vmem:[%s9279_s0 + $0x20] sm:$0xff] }
 0x433   :  { %2123 = vperm.xlu0 %6757, %v1935_v37   ;;  %v2004_v62 = vadd.f32 %v2003_v47, %v2002_v46 }
 0x434   :  { %2158 = vperm.xlu1 %6768, %v1942_v63  }
 0x435   :  { %v2006_v32 = vadd.f32 %v2005_v5, %v2004_v62 }
 0x437   :  { %2133 = vperm.xlu0 %6757, %v1937_v48   ;;  %v2008_v26 = vadd.f32 %v2007_v40, %v2006_v32  ;;  %v8069_v32 = vld [vmem:[%s9279_s0 + $0x28] sm:$0xff] }
 0x438   :  { %2168 = vperm.xlu1 %6768, %v1944_v15  }
 0x439   :  { %v2010_v3 = vadd.f32 %v2009_v7, %v2008_v26 }
 0x43b   :  { %2143 = vperm.xlu0 %6757, %v1939_v2   ;;  %v2012_v11 = vadd.f32 %v2011_v58, %v2010_v3 }
 0x43c   :  { %2178 = vperm.xlu1 %6768, %v1946_v21  }
 0x43d   :  { %v2014_v37 = vadd.f32 %v2013_v18, %v2012_v11  ;;  %v8080_v11 = vld [vmem:[%s9279_s0 + $0x30] sm:$0xff] }
 0x43f   :  { %2153 = vperm.xlu0 %6757, %v1941_v52   ;;  %v2015_v56 = vrot.slane %v2014_v37, 4  ;;  %v8021_v52 = vld [vmem:[%s9279_s0 + $0x8] sm:$0xff] }
 0x440   :  { %5211 = vrot.lane.b32.xlu1 %v7962_v39, %s6872_s1 }
 0x441   :  { %v2016_v53 = vadd.f32 %v2015_v56, %v2014_v37 }
 0x443   :  { %2163 = vperm.xlu0 %6757, %v1943_v12   ;;  %v2017_v49 = vrot.slane %v2016_v53, 2 }
 0x445   :  { %v2018_v48 = vadd.f32 %v2017_v49, %v2016_v53 }
 0x447   :  { %2173 = vperm.xlu0 %6757, %v1945_v22   ;;  %v2019_v63 = vrot.slane %v2018_v48, 1 }
 0x449   :  { %v2020_v54 = vadd.f32 %v2019_v63, %v2018_v48  ;;  %v8090_v48 = vld [vmem:[%s9279_s0 + $0x38] sm:$0xff] }
 0x44b   :  { %2294 = vperm.xlu0 %6757, %v2020_v54  }
 0x481   :  { %v6771_v2 = vpop.permute.xlu1 %6770 }
 0x482   :  { %v8032_v21 = vunpack.i.l.bf16 %v6771_v2  ;;  %v8040_v25 = vunpack.i.h.bf16 %v6771_v2 }
 0x484   :  { %9367 = vst [vmem:[#allocation22_spill] sm:$0xff] %v8032_v21  ;;  %9369 = vst [vmem:[#allocation24_spill] sm:$0xff] %v8040_v25  ;;  %v2185_v0 = vmul.f32 %v8059_v59, %v8032_v21  ;;  %v2186_v40 = vmul.f32 %v8069_v32, %v8040_v25 }
 0x485   :  { %v6760_v38 = vpop.permute.xlu0 %6759 }
 0x486   :  { %v8014_v8 = vunpack.i.h.bf16 %v6760_v38  ;;  %v8016_v15 = vunpack.i.l.bf16 %v6760_v38  ;;  %v2220_v58 = vsel %vm892_vm5, %v2185_v0, 0.0  ;;  %v2222_v49 = vsel %vm892_vm5, %v2186_v40, 0.0 }
 0x488   :  { %v2182_v39 = vmul.f32 %v8021_v52, %v8014_v8  ;;  %v2181_v42 = vmul.f32 %v8028_v30, %v8016_v15 }
 0x489   :  { %v6765_v17 = vpop.permute.xlu0 %6764  ;;  %v6776_v14 = vpop.permute.xlu1 %6775 }
 0x48a   :  { %v2214_v12 = vsel %vm892_vm5, %v2182_v39, 0.0  ;;  %v2213_v22 = vsel %vm892_vm5, %v2181_v42, 0.0  ;;  %v8036_v23 = vunpack.i.h.bf16 %v6765_v17  ;;  %v8038_v34 = vunpack.i.l.bf16 %v6765_v17  ;;  %v8102_v42 = vld [vmem:[%s9279_s0 + $0x40] sm:$0xff] }
 0x48b   :  { %v2215_v29 = vadd.f32 %v2214_v12, %v2213_v22  ;;  %v8063_v46 = vunpack.i.l.bf16 %v6776_v14  ;;  %v8073_v26 = vunpack.i.h.bf16 %v6776_v14 }
 0x48c   :  { %9368 = vst [vmem:[#allocation23_spill] sm:$0xff] %v8038_v34  ;;  %v2184_v51 = vmul.f32 %v8045_v35, %v8036_v23  ;;  %v2183_v36 = vmul.f32 %v8052_v61, %v8038_v34  ;;  %v8265_v34 = vld [vmem:[%s9279_s0 + $0xc8] sm:$0xff] }
 0x48d   :  { %9370 = vst [vmem:[#allocation25_spill] sm:$0xff] %v8063_v46  ;;  %9371 = vst [vmem:[#allocation26_spill] sm:$0xff] %v8073_v26  ;;  %v2187_v18 = vmul.f32 %v8080_v11, %v8063_v46  ;;  %v6786_v53 = vpop.permute.xlu1 %6785  ;;  %v2188_v63 = vmul.f32 %v8090_v48, %v8073_v26 }
 0x48e   :  { %v2216_v47 = vsel %vm892_vm5, %v2183_v36, 0.0  ;;  %v2218_v7 = vsel %vm892_vm5, %v2184_v51, 0.0  ;;  %v8097_v39 = vunpack.i.l.bf16 %v6786_v53  ;;  %v8107_v51 = vunpack.i.h.bf16 %v6786_v53  ;;  %v8112_v36 = vld [vmem:[%s9279_s0 + $0x48] sm:$0xff] }
 0x48f   :  { %v2217_v62 = vadd.f32 %v2216_v47, %v2215_v29  ;;  %v2224_v2 = vsel %vm892_vm5, %v2187_v18, 0.0  ;;  %v2226_v14 = vsel %vm892_vm5, %v2188_v63, 0.0  ;;  %v8119_v47 = vld [vmem:[%s9279_s0 + $0x50] sm:$0xff] }
 0x490   :  { %v6781_v5 = vpop.permute.xlu0 %6780  ;;  %9374 = vst [vmem:[#allocation29_spill] sm:$0xff] %v8097_v39  ;;  %9375 = vst [vmem:[#allocation30_spill] sm:$0xff] %v8107_v51 }
 0x491   :  { %v2219_v3 = vadd.f32 %v2218_v7, %v2217_v62  ;;  %v8084_v37 = vunpack.i.l.bf16 %v6781_v5  ;;  %v8094_v54 = vunpack.i.h.bf16 %v6781_v5  ;;  %v2191_v62 = vmul.f32 %v8119_v47, %v8097_v39  ;;  %v6796_v40 = vpop.permute.xlu1 %6795 }
 0x493   :  { %9372 = vst [vmem:[#allocation27_spill] sm:$0xff] %v8084_v37  ;;  %v2221_v56 = vadd.f32 %v2220_v58, %v2219_v3  ;;  %9373 = vst [vmem:[#allocation28_spill] sm:$0xff] %v8094_v54  ;;  %v2189_v17 = vmul.f32 %v8102_v42, %v8084_v37  ;;  %v2190_v29 = vmul.f32 %v8112_v36, %v8094_v54  ;;  %v8129_v58 = vld [vmem:[%s9279_s0 + $0x58] sm:$0xff]  ;;  %v2232_v63 = vsel %vm892_vm5, %v2191_v62, 0.0  ;;  %v8203_v37 = vld [vmem:[%s9279_s0 + $0x90] sm:$0xff] }
 0x494   :  { %v6791_v22 = vpop.permute.xlu0 %6790  ;;  %v2192_v18 = vmul.f32 %v8129_v58, %v8107_v51 }
 0x495   :  { %v2223_v38 = vadd.f32 %v2222_v49, %v2221_v56  ;;  %v2228_v5 = vsel %vm892_vm5, %v2189_v17, 0.0  ;;  %v8124_v7 = vunpack.i.l.bf16 %v6791_v22  ;;  %v2230_v56 = vsel %vm892_vm5, %v2190_v29, 0.0 }
 0x496   :  { %v8134_v53 = vunpack.i.h.bf16 %v6791_v22  ;;  %v2234_v29 = vsel %vm892_vm5, %v2192_v18, 0.0  ;;  %v8149_v22 = vunpack.i.h.bf16 %v6796_v40  ;;  %v8165_v18 = vld [vmem:[%s9279_s0 + $0x70] sm:$0xff] }
 0x497   :  { %v2225_v12 = vadd.f32 %v2224_v2, %v2223_v38  ;;  %9376 = vst [vmem:[#allocation31_spill] sm:$0xff] %v8124_v7  ;;  %v8137_v38 = vunpack.i.l.bf16 %v6796_v40  ;;  %v8142_v2 = vld [vmem:[%s9279_s0 + $0x60] sm:$0xff] }
 0x498   :  { %9377 = vst [vmem:[#allocation32_spill] sm:$0xff] %v8134_v53  ;;  %v2193_v17 = vmul.f32 %v8142_v2, %v8124_v7  ;;  %9380 = vst [vmem:[#allocation35_spill] sm:$0xff] %v8149_v22 }
 0x499   :  { %v2227_v0 = vadd.f32 %v2226_v14, %v2225_v12  ;;  %9378 = vst [vmem:[#allocation33_spill] sm:$0xff] %v8137_v38  ;;  %v2195_v40 = vmul.f32 %v8165_v18, %v8137_v38 }
 0x49b   :  { %v2229_v3 = vadd.f32 %v2228_v5, %v2227_v0  ;;  %v8154_v0 = vld [vmem:[%s9279_s0 + $0x68] sm:$0xff] }
 0x49c   :  { %v2194_v62 = vmul.f32 %v8154_v0, %v8134_v53 }
 0x49d   :  { %v2231_v49 = vadd.f32 %v2230_v56, %v2229_v3 }
 0x49f   :  { %v8146_v12 = vpop.permute.xlu1 %2113  ;;  %v2233_v14 = vadd.f32 %v2232_v63, %v2231_v49  ;;  %v2236_v49 = vsel %vm892_vm5, %v2193_v17, 0.0 }
 0x4a0   :  { %9379 = vst [vmem:[#allocation34_spill] sm:$0xff] %v8146_v12 }
 0x4a1   :  { %v6801_v5 = vpop.permute.xlu0 %6800  ;;  %v2235_v3 = vadd.f32 %v2234_v29, %v2233_v14  ;;  %v8175_v14 = vld [vmem:[%s9279_s0 + $0x78] sm:$0xff] }
 0x4a2   :  { %v8158_v56 = vunpack.i.h.bf16 %v6801_v5  ;;  %v8160_v28 = vunpack.i.l.bf16 %v6801_v5  ;;  %v2196_v29 = vmul.f32 %v8175_v14, %v8149_v22  ;;  %v2238_v5 = vsel %vm892_vm5, %v2194_v62, 0.0 }
 0x4a3   :  { %v8170_v63 = vpop.permute.xlu1 %2118  ;;  %v2237_v44 = vadd.f32 %v2236_v49, %v2235_v3  ;;  %v8190_v3 = vld [vmem:[%s9279_s0 + $0x80] sm:$0xff]  ;;  %v2240_v22 = vsel %vm892_vm5, %v2195_v40, 0.0 }
 0x4a4   :  { %9381 = vst [vmem:[#allocation36_spill] sm:$0xff] %v8158_v56  ;;  %9382 = vst [vmem:[#allocation37_spill] sm:$0xff] %v8160_v28  ;;  %v2198_v17 = vmul.f32 %v8183_v1, %v8158_v56  ;;  %v2197_v49 = vmul.f32 %v8190_v3, %v8160_v28  ;;  %v2242_v53 = vsel %vm892_vm5, %v2196_v29, 0.0 }
 0x4a5   :  { %9383 = vst [vmem:[#allocation38_spill] sm:$0xff] %v8170_v63  ;;  %v2239_v38 = vadd.f32 %v2238_v5, %v2237_v44  ;;  %v2199_v44 = vmul.f32 %v8203_v37, %v8146_v12 }
 0x4a6   :  { %v2251_v39 = vsel %vm892_vm5, %v2198_v17, 0.0  ;;  %v2250_v56 = vsel %vm892_vm5, %v2197_v49, 0.0 }
 0x4a7   :  { %v8195_v62 = vpop.permute.xlu1 %2128  ;;  %v2241_v7 = vadd.f32 %v2240_v22, %v2239_v38  ;;  %v2252_v40 = vadd.f32 %v2251_v39, %v2250_v56  ;;  %v2253_v29 = vsel %vm892_vm5, %v2199_v44, 0.0  ;;  %v8225_v56 = vld [vmem:[%s9279_s0 + $0xa8] sm:$0xff] }
 0x4a8   :  { %9384 = vst [vmem:[#allocation39_spill] sm:$0xff] %v8195_v62  ;;  %v2202_v44 = vmul.f32 %v8225_v56, %v8195_v62  ;;  %v8243_v62 = vld [vmem:[%s9279_s0 + $0xb8] sm:$0xff] }
 0x4a9   :  { %v2243_v51 = vadd.f32 %v2242_v53, %v2241_v7  ;;  %v8213_v7 = vld [vmem:[%s9279_s0 + $0x98] sm:$0xff]  ;;  %v2254_v49 = vadd.f32 %v2253_v29, %v2252_v40 }
 0x4aa   :  { %v2200_v53 = vmul.f32 %v8213_v7, %v8170_v63  ;;  %v2259_v63 = vsel %vm892_vm5, %v2202_v44, 0.0 }
 0x4ab   :  { %v2244_v5 = vrot.slane %v2243_v51, 4  ;;  %v8207_v28 = vpop.permute.xlu1 %2138 }
 0x4ac   :  { %9385 = vst [vmem:[#allocation40_spill] sm:$0xff] %v8207_v28  ;;  %v2204_v46 = vmul.f32 %v8243_v62, %v8207_v28 }
 0x4ad   :  { %v2245_v38 = vadd.f32 %v2244_v5, %v2243_v51  ;;  %v2255_v51 = vsel %vm892_vm5, %v2200_v53, 0.0  ;;  %v8232_v5 = vld [vmem:[%s9279_s0 + $0xa0] sm:$0xff] }
 0x4ae   :  { %v2290_v22 = vpop.permute.xlu0 %2289  ;;  %v2263_v28 = vsel %vm892_vm5, %v2204_v46, 0.0 }
 0x4af   :  { %6804 = vrcp.f32 %v2290_v22  ;;  %v2246_v17 = vrot.slane %v2245_v38, 2  ;;  %v8219_v39 = vpop.permute.xlu1 %2148 }
 0x4b1   :  { %v2247_v12 = vadd.f32 %v2246_v17, %v2245_v38  ;;  %v2256_v38 = vadd.f32 %v2255_v51, %v2254_v49  ;;  %v8250_v49 = vld [vmem:[%s9279_s0 + $0xb0] sm:$0xff] }
 0x4b2   :  { %v8217_v54 = vpop.permute.xlu0 %2123 }
 0x4b3   :  { %9386 = vst [vmem:[#allocation41_spill] sm:$0xff] %v8217_v54  ;;  %v2201_v40 = vmul.f32 %v8232_v5, %v8217_v54  ;;  %v2248_v22 = vrot.slane %v2247_v12, 1 }
 0x4b5   :  { %v2257_v29 = vsel %vm892_vm5, %v2201_v40, 0.0  ;;  %v2249_v40 = vadd.f32 %v2248_v22, %v2247_v12  ;;  %v2206_v12 = vmul.f32 %v8265_v34, %v8219_v39 }
 0x4b6   :  { %v2258_v53 = vadd.f32 %v2257_v29, %v2256_v38  ;;  %v8237_v17 = vpop.permute.xlu0 %2133  ;;  %v8254_v29 = vpop.permute.xlu1 %2158 }
 0x4b7   :  { %v2203_v51 = vmul.f32 %v8250_v49, %v8237_v17  ;;  %9387 = vst [vmem:[#allocation42_spill] sm:$0xff] %v8254_v29 }
 0x4b8   :  { %v2260_v38 = vadd.f32 %v2259_v63, %v2258_v53  ;;  %v8272_v63 = vld [vmem:[%s9279_s0 + $0xc0] sm:$0xff] }
 0x4b9   :  { %v6805_v44 = vpop.eup %6804  ;;  %v2261_v54 = vsel %vm892_vm5, %v2203_v51, 0.0 }
 0x4ba   :  { %v8257_v26 = vmul.f32 %v6805_v44, %v2249_v40  ;;  %v2262_v21 = vadd.f32 %v2261_v54, %v2260_v38  ;;  %v8259_v25 = vpop.permute.xlu0 %2143  ;;  %v8285_v38 = vpop.permute.xlu1 %2168  ;;  %v8306_v44 = vld [vmem:[%s9279_s0 + $0xd0] sm:$0xff] }
 0x4bb   :  { %9388 = vst [vmem:[#allocation43_spill] sm:$0xff] %v8259_v25  ;;  %v2205_v54 = vmul.f32 %v8272_v63, %v8259_v25  ;;  %9391 = vst [vmem:[#allocation46_spill] sm:$0xff] %v8285_v38 }
 0x4bc   :  { %v2264_v22 = vadd.f32 %v2263_v28, %v2262_v21  ;;  %v8278_v46 = vsub.f32 %v8021_v52, %v8257_v26  ;;  %v8282_v53 = vsub.f32 %v8028_v30, %v8257_v26  ;;  %v2267_v52 = vsel %vm892_vm5, %v2206_v12, 0.0  ;;  %v8297_v30 = vld [vmem:[%s9279_s0 + $0xd8] sm:$0xff] }
 0x4bd   :  { %v2265_v51 = vsel %vm892_vm5, %v2205_v54, 0.0  ;;  %v2208_v21 = vmul.f32 %v8297_v30, %v8254_v29  ;;  %v8312_v12 = vsub.f32 %v8052_v61, %v8257_v26 }
 0x4be   :  { %9389 = vst [vmem:[#allocation44_spill] sm:$0xff] %v8278_v46  ;;  %9390 = vst [vmem:[#allocation45_spill] sm:$0xff] %v8282_v53  ;;  %v2266_v40 = vadd.f32 %v2265_v51, %v2264_v22  ;;  %4980 = vrot.lane.b32.xlu0 %v8278_v46, %s6873_s13  ;;  %4978 = vrot.lane.b32.xlu1 %v8282_v53, %s6873_s13  ;;  %v8291_v28 = vpop.permute.xlu0 %2153  ;;  %v8318_v51 = vsub.f32 %v8045_v35, %v8257_v26  ;;  %v8333_v35 = vld [vmem:[%s9279_s0 + $0xe8] sm:$0xff] }
 0x4bf   :  { %6236 = vmatprep.mubr.msk.f32.mxu1 %vm892_vm5, %v8282_v53  ;;  %v2207_v54 = vmul.f32 %v8306_v44, %v8291_v28  ;;  %9392 = vst [vmem:[#allocation47_spill] sm:$0xff] %v8312_v12 }
 0x4c0   :  { %v2268_v22 = vadd.f32 %v2267_v52, %v2266_v40  ;;  %6237 = vmatmul.mubr.msk.f32.vlgmr.msra.gmra.mrb[64].mxu1 %vm892_vm5, %v8278_v46  ;;  %9393 = vst [vmem:[#allocation48_spill] sm:$0xff] %v8318_v51  ;;  %v2271_v40 = vsel %vm892_vm5, %v2208_v21, 0.0  ;;  %v2210_v52 = vmul.f32 %v8333_v35, %v8285_v38  ;;  %v8348_v21 = vpop.permute.xlu1 %2178  ;;  %v8354_v46 = vsub.f32 %v8069_v32, %v8257_v26  ;;  %v8369_v32 = vld [vmem:[%s9279_s0 + $0xf8] sm:$0xff] }
 0x4c1   :  { %v2269_v53 = vsel %vm892_vm5, %v2207_v54, 0.0  ;;  %6239 = vmatprep.mubr.msk.f32.mxu1 %vm892_vm5, %v8312_v12  ;;  %9396 = vst [vmem:[#allocation51_spill] sm:$0xff] %v8348_v21 }
 0x4c2   :  { %v2270_v29 = vadd.f32 %v2269_v53, %v2268_v22  ;;  %4982 = vrot.lane.b32.xlu0 %v8312_v12, %s6873_s13  ;;  %4984 = vrot.lane.b32.xlu1 %v8318_v51, %s6873_s13  ;;  %v8327_v61 = vpop.permute.xlu0 %2163  ;;  %v8340_v53 = vld [vmem:[%s9279_s0 + $0xe0] sm:$0xff]  ;;  %v8346_v22 = vsub.f32 %v8059_v59, %v8257_v26 }
 0x4c3   :  { %9394 = vst [vmem:[#allocation49_spill] sm:$0xff] %v8327_v61  ;;  %v2209_v54 = vmul.f32 %v8340_v53, %v8327_v61 }
 0x4c4   :  { %9395 = vst [vmem:[#allocation50_spill] sm:$0xff] %v8346_v22  ;;  %v2272_v12 = vadd.f32 %v2271_v40, %v2270_v29  ;;  %6240 = vmatmul.mubr.msk.f32.gmra.mrb[66].mxu1 %vm892_vm5, %v8318_v51  ;;  %v2275_v29 = vsel %vm892_vm5, %v2210_v52, 0.0  ;;  %v2212_v40 = vmul.f32 %v8369_v32, %v8348_v21 }
 0x4c5   :  { %v2273_v38 = vsel %vm892_vm5, %v2209_v54, 0.0  ;;  %6242 = vmatprep.mubr.msk.f32.mxu1 %vm892_vm5, %v8346_v22  ;;  %v8382_v54 = vsub.f32 %v8080_v11, %v8257_v26 }
 0x4c6   :  { %v2274_v61 = vadd.f32 %v2273_v38, %v2272_v12  ;;  %4986 = vrot.lane.b32.xlu0 %v8346_v22, %s6873_s13  ;;  %4988 = vrot.lane.b32.xlu1 %v8354_v46, %s6873_s13  ;;  %v8363_v59 = vpop.permute.xlu0 %2173  ;;  %v8376_v38 = vld [vmem:[%s9279_s0 + $0xf0] sm:$0xff]  ;;  %v8388_v22 = vsub.f32 %v8090_v48, %v8257_v26 }
 0x4c7   :  { %v2211_v12 = vmul.f32 %v8376_v38, %v8363_v59 }
 0x4c8   :  { %v2276_v52 = vadd.f32 %v2275_v29, %v2274_v61  ;;  %6243 = vmatmul.mubr.msk.f32.gmra.mrb[68].mxu1 %vm892_vm5, %v8354_v46  ;;  %v2279_v61 = vsel %vm892_vm5, %v2212_v40, 0.0  ;;  %v8400_v29 = vsub.f32 %v8102_v42, %v8257_v26  ;;  %v8416_v42 = vsub.f32 %v8119_v47, %v8257_v26 }
 0x4c9   :  { %v2277_v51 = vsel %vm892_vm5, %v2211_v12, 0.0  ;;  %6245 = vmatprep.mubr.msk.f32.mxu1 %vm892_vm5, %v8382_v54  ;;  %v8432_v47 = vsub.f32 %v8142_v2, %v8257_v26 }
 0x4ca   :  { %v2278_v21 = vadd.f32 %v2277_v51, %v2276_v52  ;;  %4990 = vrot.lane.b32.xlu0 %v8382_v54, %s6873_s13  ;;  %4992 = vrot.lane.b32.xlu1 %v8388_v22, %s6873_s13  ;;  %v2295_v11 = vpop.permute.xlu0 %2294  ;;  %v8406_v51 = vsub.f32 %v8112_v36, %v8257_v26  ;;  %v8422_v36 = vsub.f32 %v8129_v58, %v8257_v26 }
 0x4cb   :  { %6806 = vrcp.f32 %v2295_v11  ;;  %9397 = vst [vmem:[#allocation52_spill] sm:$0xff] %v8432_v47  ;;  %v8438_v58 = vsub.f32 %v8154_v0, %v8257_v26  ;;  %v8454_v0 = vsub.f32 %v8175_v14, %v8257_v26 }
 0x4cc   :  { %v2280_v48 = vadd.f32 %v2279_v61, %v2278_v21  ;;  %6246 = vmatmul.mubr.msk.f32.gmra.mrb[70].mxu1 %vm892_vm5, %v8388_v22  ;;  %v8448_v61 = vsub.f32 %v8165_v18, %v8257_v26 }
 0x4cd   :  { %6248 = vmatprep.mubr.msk.f32.mxu1 %vm892_vm5, %v8400_v29 }
 0x4ce   :  { %v2281_v12 = vrot.slane %v2280_v48, 4  ;;  %4994 = vrot.lane.b32.xlu0 %v8400_v29, %s6873_s13  ;;  %4996 = vrot.lane.b32.xlu1 %v8406_v51, %s6873_s13 }
 0x4d0   :  { %v2282_v21 = vadd.f32 %v2281_v12, %v2280_v48  ;;  %6249 = vmatmul.mubr.msk.f32.gmra.mrb[72].mxu1 %vm892_vm5, %v8406_v51  ;;  %v2695_v48 = vld [vmem:[#allocation2 + $0x1a8] sm:$0xff]  ;;  %v2696_v12 = vld [vmem:[#allocation2 + $0x1b0] sm:$0xff] }
 0x4d1   :  { %6251 = vmatprep.mubr.msk.f32.mxu1 %vm892_vm5, %v8416_v42 }
 0x4d2   :  { %v2283_v40 = vrot.slane %v2282_v21, 2  ;;  %4998 = vrot.lane.b32.xlu0 %v8416_v42, %s6873_s13  ;;  %5000 = vrot.lane.b32.xlu1 %v8422_v36, %s6873_s13 }
 0x4d4   :  { %v2284_v52 = vadd.f32 %v2283_v40, %v2282_v21  ;;  %6252 = vmatmul.mubr.msk.f32.gmra.mrb[74].mxu1 %vm892_vm5, %v8422_v36  ;;  %v6651_v40 = vpack.c.bf16 %v2696_v12, %v2695_v48  ;;  %v9398_v48 = vmov 0.0|0.0  }
 0x4d5   :  { %6254 = vmatprep.mubr.msk.f32.mxu1 %vm892_vm5, %v8432_v47  ;;  %v6807_v2 = vpop.eup %6806 }
 0x4d6   :  { %v2285_v11 = vrot.slane %v2284_v52, 1  ;;  %5002 = vrot.lane.b32.xlu0 %v8432_v47, %s6873_s13  ;;  %5004 = vrot.lane.b32.xlu1 %v8438_v58, %s6873_s13 }
 0x4d7   :  { %6652 = vmatprep.subr.bf16.mxu0 %v6651_v40 }
 0x4d8   :  { %v2286_v21 = vadd.f32 %v2285_v11, %v2284_v52  ;;  %6255 = vmatmul.mubr.msk.f32.gmra.mrb[76].mxu1 %vm892_vm5, %v8438_v58  ;;  %6654 = vmatpush3.bf16.msra.mxu0 %v6651_v40  ;;  %v2698_v11 = vld [vmem:[#allocation2 + $0x1c0] sm:$0xff] }
 0x4d9   :  { %6257 = vmatprep.mubr.msk.f32.mxu1 %vm892_vm5, %v8448_v61 }
 0x4da   :  { %v2300_v47 = vmul.f32 %v6807_v2, %v2286_v21  ;;  %5006 = vrot.lane.b32.xlu0 %v8448_v61, %s6873_s13  ;;  %5008 = vrot.lane.b32.xlu1 %v8454_v0, %s6873_s13 }
 0x4dc   :  { %6258 = vmatmul.mubr.msk.f32.gmra.mrb[78].mxu1 %vm892_vm5, %v8454_v0  ;;  %v8465_v18 = vsub.f32 %v8183_v1, %v2300_v47  ;;  %v8468_v14 = vsub.f32 %v8190_v3, %v2300_v47  ;;  %v8477_v52 = vsub.f32 %v8203_v37, %v2300_v47  ;;  %v8482_v1 = vsub.f32 %v8213_v7, %v2300_v47 }
 0x4dd   :  { %v8486_v3 = vsel %vm971_vm7, %v2300_v47, %v8257_v26  ;;  %v8495_v37 = vsub.f32 %v8232_v5, %v2300_v47  ;;  %v8500_v7 = vsub.f32 %v8225_v56, %v2300_v47  ;;  %v8509_v26 = vsub.f32 %v8250_v49, %v2300_v47  ;;  %v2697_v49 = vld [vmem:[#allocation2 + $0x1b8] sm:$0xff] }
 0x4de   :  { %5012 = vrot.lane.b32.xlu1 %v8465_v18, %s6873_s13  ;;  %5010 = vrot.lane.b32.xlu0 %v8468_v14, %s6873_s13  ;;  %v8514_v5 = vsub.f32 %v8243_v62, %v2300_v47  ;;  %v8523_v56 = vsub.f32 %v8272_v63, %v2300_v47  ;;  %v8528_v62 = vsub.f32 %v8265_v34, %v2300_v47 }
 0x4df   :  { %6260 = vmatprep.mubr.msk.f32.mxu1 %vm892_vm5, %v8468_v14  ;;  %v6655_v2 = vpack.c.bf16 %v2698_v11, %v2697_v49  ;;  %v8537_v63 = vsub.f32 %v8306_v44, %v2300_v47  ;;  %v8542_v34 = vsub.f32 %v8297_v30, %v2300_v47  ;;  %v8552_v44 = vsub.f32 %v8340_v53, %v2300_v47 }
 0x4e0   :  { %6261 = vmatmul.mubr.msk.f32.gmra.mrb[80].mxu1 %vm892_vm5, %v8465_v18  ;;  %v8557_v30 = vsub.f32 %v8333_v35, %v2300_v47  ;;  %v8564_v12 = vsub.f32 %v8376_v38, %v2300_v47  ;;  %v8571_v53 = vsub.f32 %v8369_v32, %v2300_v47  ;;  %v8577_v35 = vpop.permute.xlu1 %5211 }
 0x4e1   :  { %6263 = vmatprep.mubr.msk.f32.mxu1 %vm892_vm5, %v8477_v52  ;;  %6656 = vmatprep.subr.bf16.mxu0 %v6655_v2 }
 0x4e2   :  { %5016 = vrot.lane.b32.xlu1 %v8482_v1, %s6873_s13  ;;  %5014 = vrot.lane.b32.xlu0 %v8477_v52, %s6873_s13 }
 0x4e3   :  { %6658 = vmatpush3.bf16.msra.mxu0 %v6655_v2 }
 0x4e4   :  { %6264 = vmatmul.mubr.msk.f32.gmra.mrb[82].mxu1 %vm892_vm5, %v8482_v1  ;;  %6671 = vmatprep.subr.bf16.mxu0 %v9398_v48 }
 0x4e5   :  { %6266 = vmatprep.mubr.msk.f32.mxu1 %vm892_vm5, %v8495_v37 }
 0x4e6   :  { %5020 = vrot.lane.b32.xlu1 %v8500_v7, %s6873_s13  ;;  %5018 = vrot.lane.b32.xlu0 %v8495_v37, %s6873_s13 }
 0x4e8   :  { %6267 = vmatmul.mubr.msk.f32.gmra.mrb[84].mxu1 %vm892_vm5, %v8500_v7 }
 0x4e9   :  { %6269 = vmatprep.mubr.msk.f32.mxu1 %vm892_vm5, %v8509_v26 }
 0x4ea   :  { %5024 = vrot.lane.b32.xlu1 %v8514_v5, %s6873_s13  ;;  %5022 = vrot.lane.b32.xlu0 %v8509_v26, %s6873_s13 }
 0x4ec   :  { %6270 = vmatmul.mubr.msk.f32.gmra.mrb[86].mxu1 %vm892_vm5, %v8514_v5 }
 0x4ed   :  { %6272 = vmatprep.mubr.msk.f32.mxu1 %vm892_vm5, %v8523_v56 }
 0x4ee   :  { %5028 = vrot.lane.b32.xlu1 %v8528_v62, %s6873_s13  ;;  %5026 = vrot.lane.b32.xlu0 %v8523_v56, %s6873_s13 }
 0x4f0   :  { %6273 = vmatmul.mubr.msk.f32.gmra.mrb[88].mxu1 %vm892_vm5, %v8528_v62 }
 0x4f1   :  { %6275 = vmatprep.mubr.msk.f32.mxu1 %vm892_vm5, %v8537_v63 }
 0x4f2   :  { %5032 = vrot.lane.b32.xlu1 %v8542_v34, %s6873_s13  ;;  %5030 = vrot.lane.b32.xlu0 %v8537_v63, %s6873_s13 }
 0x4f4   :  { %6276 = vmatmul.mubr.msk.f32.gmra.mrb[90].mxu1 %vm892_vm5, %v8542_v34 }
 0x4f5   :  { %6278 = vmatprep.mubr.msk.f32.mxu1 %vm892_vm5, %v8552_v44 }
 0x4f6   :  { %5036 = vrot.lane.b32.xlu1 %v8557_v30, %s6873_s13 }
 0x4f8   :  { %6279 = vmatmul.mubr.msk.f32.gmra.mrb[92].mxu1 %vm892_vm5, %v8557_v30 }
 0x4f9   :  { %6281 = vmatprep.mubr.msk.f32.mxu1 %vm892_vm5, %v8564_v12 }
 0x4fc   :  { %6282 = vmatmul.mubr.msk.f32.gmra.mrb[94].mxu1 %vm892_vm5, %v8571_v53 }
 0x4fd   :  { %6342 = vmatprep.mubr.msk.f32.mxu1 %vm6869_vm4, %v9363_v10 }
 0x530   :  { %v4979_v38 = vpop.permute.xlu1 %4978  ;;  %v4981_v21 = vpop.permute.xlu0 %4980 }
 0x531   :  { %v5107_v40 = vsel %vm892_vm5, %v7570_v20, %v4979_v38  ;;  %v5108_v49 = vsel %vm892_vm5, %v7562_v4, %v4981_v21 }
 0x532   :  { %v5140_v32 = vsel %vm5139_vm8, %v5107_v40, 0.0  ;;  %v5141_v47 = vsel %vm5139_vm8, %v5108_v49, 0.0 }
 0x533   :  { %5172 = vst [vmem:[%s9282_s3] sm:$0xff] %v5140_v32  ;;  %5173 = vst [vmem:[%s9282_s3 + $0x8] sm:$0xff] %v5141_v47 }
 0x534   :  { %v4985_v11 = vpop.permute.xlu1 %4984  ;;  %v4983_v2 = vpop.permute.xlu0 %4982 }
 0x535   :  { %v5110_v20 = vsel %vm892_vm5, %v7581_v57, %v4985_v11  ;;  %v5109_v4 = vsel %vm892_vm5, %v7588_v55, %v4983_v2 }
 0x536   :  { %v5143_v38 = vsel %vm5139_vm8, %v5110_v20, 0.0  ;;  %v5142_v21 = vsel %vm5139_vm8, %v5109_v4, 0.0 }
 0x537   :  { %5175 = vst [vmem:[%s9282_s3 + $0x18] sm:$0xff] %v5143_v38  ;;  %5174 = vst [vmem:[%s9282_s3 + $0x10] sm:$0xff] %v5142_v21 }
 0x538   :  { %v4989_v40 = vpop.permute.xlu1 %4988  ;;  %v4987_v49 = vpop.permute.xlu0 %4986 }
 0x539   :  { %v5112_v57 = vsel %vm892_vm5, %v7604_v9, %v4989_v40  ;;  %v5111_v55 = vsel %vm892_vm5, %v7608_v13, %v4987_v49 }
 0x53a   :  { %v5145_v32 = vsel %vm5139_vm8, %v5112_v57, 0.0  ;;  %v5144_v47 = vsel %vm5139_vm8, %v5111_v55, 0.0 }
 0x53b   :  { %5177 = vst [vmem:[%s9282_s3 + $0x28] sm:$0xff] %v5145_v32  ;;  %5176 = vst [vmem:[%s9282_s3 + $0x20] sm:$0xff] %v5144_v47 }
 0x53c   :  { %v4993_v11 = vpop.permute.xlu1 %4992  ;;  %v4991_v2 = vpop.permute.xlu0 %4990 }
 0x53d   :  { %v5114_v9 = vsel %vm892_vm5, %v7624_v24, %v4993_v11  ;;  %v5113_v13 = vsel %vm892_vm5, %v7628_v31, %v4991_v2 }
 0x53e   :  { %v5147_v20 = vsel %vm5139_vm8, %v5114_v9, 0.0  ;;  %v5146_v4 = vsel %vm5139_vm8, %v5113_v13, 0.0  ;;  %v9399_v9 = vld [vmem:[#allocation8_spill] sm:$0xff] }
 0x53f   :  { %5179 = vst [vmem:[%s9282_s3 + $0x38] sm:$0xff] %v5147_v20  ;;  %5178 = vst [vmem:[%s9282_s3 + $0x30] sm:$0xff] %v5146_v4 }
 0x540   :  { %v4997_v38 = vpop.permute.xlu1 %4996  ;;  %v4995_v21 = vpop.permute.xlu0 %4994 }
 0x541   :  { %v5116_v24 = vsel %vm892_vm5, %v7644_v43, %v4997_v38  ;;  %v5115_v31 = vsel %vm892_vm5, %v7648_v45, %v4995_v21  ;;  %v9400_v21 = vld [vmem:[#allocation9_spill] sm:$0xff] }
 0x542   :  { %v5149_v40 = vsel %vm5139_vm8, %v5116_v24, 0.0  ;;  %v5148_v49 = vsel %vm5139_vm8, %v5115_v31, 0.0  ;;  %v9401_v24 = vld [vmem:[#allocation10_spill] sm:$0xff] }
 0x543   :  { %5181 = vst [vmem:[%s9282_s3 + $0x48] sm:$0xff] %v5149_v40  ;;  %5180 = vst [vmem:[%s9282_s3 + $0x40] sm:$0xff] %v5148_v49 }
 0x544   :  { %v5001_v57 = vpop.permute.xlu1 %5000  ;;  %v4999_v55 = vpop.permute.xlu0 %4998 }
 0x545   :  { %v5118_v43 = vsel %vm892_vm5, %v7664_v41, %v5001_v57  ;;  %v5117_v45 = vsel %vm892_vm5, %v7668_v60, %v4999_v55 }
 0x546   :  { %v5151_v32 = vsel %vm5139_vm8, %v5118_v43, 0.0  ;;  %v5150_v47 = vsel %vm5139_vm8, %v5117_v45, 0.0  ;;  %v9402_v43 = vld [vmem:[#allocation11_spill] sm:$0xff] }
 0x547   :  { %5183 = vst [vmem:[%s9282_s3 + $0x58] sm:$0xff] %v5151_v32  ;;  %5182 = vst [vmem:[%s9282_s3 + $0x50] sm:$0xff] %v5150_v47  ;;  %v9403_v32 = vld [vmem:[#allocation12_spill] sm:$0xff] }
 0x548   :  { %v5005_v11 = vpop.permute.xlu1 %5004  ;;  %v5003_v2 = vpop.permute.xlu0 %5002 }
 0x549   :  { %v5120_v41 = vsel %vm892_vm5, %v7684_v19, %v5005_v11  ;;  %v5119_v60 = vsel %vm892_vm5, %v9399_v9, %v5003_v2 }
 0x54a   :  { %v5153_v13 = vsel %vm5139_vm8, %v5120_v41, 0.0  ;;  %v5152_v20 = vsel %vm5139_vm8, %v5119_v60, 0.0  ;;  %v9404_v60 = vld [vmem:[#allocation13_spill] sm:$0xff] }
 0x54b   :  { %5185 = vst [vmem:[%s9282_s3 + $0x68] sm:$0xff] %v5153_v13  ;;  %5184 = vst [vmem:[%s9282_s3 + $0x60] sm:$0xff] %v5152_v20  ;;  %v9405_v20 = vld [vmem:[#allocation14_spill] sm:$0xff] }
 0x54c   :  { %v5009_v4 = vpop.permute.xlu1 %5008  ;;  %v5007_v38 = vpop.permute.xlu0 %5006 }
 0x54d   :  { %v5122_v19 = vsel %vm892_vm5, %v9400_v21, %v5009_v4  ;;  %v5121_v31 = vsel %vm892_vm5, %v9401_v24, %v5007_v38 }
 0x54e   :  { %v5155_v40 = vsel %vm5139_vm8, %v5122_v19, 0.0  ;;  %v5154_v49 = vsel %vm5139_vm8, %v5121_v31, 0.0  ;;  %v9406_v31 = vld [vmem:[#allocation15_spill] sm:$0xff] }
 0x54f   :  { %5187 = vst [vmem:[%s9282_s3 + $0x78] sm:$0xff] %v5155_v40  ;;  %5186 = vst [vmem:[%s9282_s3 + $0x70] sm:$0xff] %v5154_v49  ;;  %v9407_v49 = vld [vmem:[#allocation16_spill] sm:$0xff] }
 0x550   :  { %v5013_v57 = vpop.permute.xlu1 %5012  ;;  %v5011_v55 = vpop.permute.xlu0 %5010 }
 0x551   :  { %v5124_v45 = vsel %vm892_vm5, %v9402_v43, %v5013_v57  ;;  %v5123_v47 = vsel %vm892_vm5, %v9403_v32, %v5011_v55 }
 0x552   :  { %v5157_v11 = vsel %vm5139_vm8, %v5124_v45, 0.0  ;;  %v5156_v2 = vsel %vm5139_vm8, %v5123_v47, 0.0  ;;  %v9408_v47 = vld [vmem:[#allocation17_spill] sm:$0xff] }
 0x553   :  { %5189 = vst [vmem:[%s9282_s3 + $0x88] sm:$0xff] %v5157_v11  ;;  %5188 = vst [vmem:[%s9282_s3 + $0x80] sm:$0xff] %v5156_v2  ;;  %v9409_v2 = vld [vmem:[#allocation18_spill] sm:$0xff] }
 0x554   :  { %v5017_v41 = vpop.permute.xlu1 %5016  ;;  %v5015_v9 = vpop.permute.xlu0 %5014 }
 0x555   :  { %v5126_v13 = vsel %vm892_vm5, %v9404_v60, %v5017_v41  ;;  %v5125_v4 = vsel %vm892_vm5, %v9405_v20, %v5015_v9 }
 0x556   :  { %v5159_v38 = vsel %vm5139_vm8, %v5126_v13, 0.0  ;;  %v5158_v21 = vsel %vm5139_vm8, %v5125_v4, 0.0 }
 0x557   :  { %5191 = vst [vmem:[%s9282_s3 + $0x98] sm:$0xff] %v5159_v38  ;;  %5190 = vst [vmem:[%s9282_s3 + $0x90] sm:$0xff] %v5158_v21 }
 0x558   :  { %v5021_v19 = vpop.permute.xlu1 %5020  ;;  %v5019_v24 = vpop.permute.xlu0 %5018 }
 0x559   :  { %v5128_v40 = vsel %vm892_vm5, %v9406_v31, %v5021_v19  ;;  %v5127_v57 = vsel %vm892_vm5, %v9407_v49, %v5019_v24 }
 0x55a   :  { %v5161_v55 = vsel %vm5139_vm8, %v5128_v40, 0.0  ;;  %v5160_v43 = vsel %vm5139_vm8, %v5127_v57, 0.0 }
 0x55b   :  { %5193 = vst [vmem:[%s9282_s3 + $0xa8] sm:$0xff] %v5161_v55  ;;  %5192 = vst [vmem:[%s9282_s3 + $0xa0] sm:$0xff] %v5160_v43 }
 0x55c   :  { %v5025_v45 = vpop.permute.xlu1 %5024  ;;  %v5023_v32 = vpop.permute.xlu0 %5022 }
 0x55d   :  { %v5130_v11 = vsel %vm892_vm5, %v9408_v47, %v5025_v45  ;;  %v5129_v41 = vsel %vm892_vm5, %v9409_v2, %v5023_v32 }
 0x55e   :  { %v5163_v9 = vsel %vm5139_vm8, %v5130_v11, 0.0  ;;  %v5162_v60 = vsel %vm5139_vm8, %v5129_v41, 0.0 }
 0x55f   :  { %5195 = vst [vmem:[%s9282_s3 + $0xb8] sm:$0xff] %v5163_v9  ;;  %5194 = vst [vmem:[%s9282_s3 + $0xb0] sm:$0xff] %v5162_v60 }
 0x560   :  { %v5029_v13 = vpop.permute.xlu1 %5028  ;;  %v5027_v20 = vpop.permute.xlu0 %5026 }
 0x561   :  { %v5132_v4 = vsel %vm892_vm5, %v7918_v33, %v5029_v13  ;;  %v5131_v38 = vsel %vm892_vm5, %v7925_v27, %v5027_v20 }
 0x562   :  { %v5165_v21 = vsel %vm5139_vm8, %v5132_v4, 0.0  ;;  %v5164_v19 = vsel %vm5139_vm8, %v5131_v38, 0.0 }
 0x563   :  { %5197 = vst [vmem:[%s9282_s3 + $0xc8] sm:$0xff] %v5165_v21  ;;  %5196 = vst [vmem:[%s9282_s3 + $0xc0] sm:$0xff] %v5164_v19 }
 0x564   :  { %v5033_v24 = vpop.permute.xlu1 %5032  ;;  %v5031_v31 = vpop.permute.xlu0 %5030 }
 0x565   :  { %v5134_v33 = vsel %vm892_vm5, %v7930_v16, %v5033_v24  ;;  %v5133_v27 = vsel %vm892_vm5, %v7935_v6, %v5031_v31  ;;  %v8753_v6 = vld [vmem:[#allocation2 + $0x180] ss:$0 sm:$0xff] }
 0x566   :  { %v5167_v40 = vsel %vm5139_vm8, %v5134_v33, 0.0  ;;  %v5166_v49 = vsel %vm5139_vm8, %v5133_v27, 0.0 }
 0x567   :  { %5199 = vst [vmem:[%s9282_s3 + $0xd8] sm:$0xff] %v5167_v40  ;;  %5198 = vst [vmem:[%s9282_s3 + $0xd0] sm:$0xff] %v5166_v49 }
 0x568   :  { %v5037_v57 = vpop.permute.xlu1 %5036 }
 0x569   :  { %v5136_v55 = vsel %vm892_vm5, %v7940_v50, %v5037_v57 }
 0x56a   :  { %v5169_v16 = vsel %vm5139_vm8, %v5136_v55, 0.0 }
 0x56b   :  { %5201 = vst [vmem:[%s9282_s3 + $0xe8] sm:$0xff] %v5169_v16 }
 0x593   :  { %v6238_v43 = vpop.f32.mrb[64].mxu1 }
 0x594   :  { %v2510_v45 = vadd.f32 %v6238_v43, %v8753_v6  ;;  %v2504_v32 = vpop.f32.mrb[65].mxu1 }
 0x595   :  { %v2505_v47 = vadd.f32 %v8753_v6, %v2504_v32 }
 0x596   :  { %v2664_v41 = vmax.f32 %v2510_v45, 0.0 }
 0x597   :  { %v2663_v11 = vmax.f32 %v2505_v47, 0.0  ;;  %v6241_v2 = vpop.f32.mrb[66].mxu1 }
 0x598   :  { %v2520_v9 = vadd.f32 %v6241_v2, %v8753_v6  ;;  %v2514_v50 = vpop.f32.mrb[67].mxu1 }
 0x599   :  { %v2515_v60 = vadd.f32 %v8753_v6, %v2514_v50  ;;  %6292 = vmatprep.mubr.msk.f32.mxu0 %vm437_vm2, %v2663_v11 }
 0x59a   :  { %6293 = vmatmul.mubr.msk.f32.vlgmr.msra.gmra.mrb[66].mxu0 %vm437_vm2, %v2664_v41  ;;  %v2666_v4 = vmax.f32 %v2520_v9, 0.0 }
 0x59b   :  { %v2665_v13 = vmax.f32 %v2515_v60, 0.0  ;;  %v6244_v20 = vpop.f32.mrb[68].mxu1 }
 0x59c   :  { %v2530_v38 = vadd.f32 %v6244_v20, %v8753_v6  ;;  %v2524_v21 = vpop.f32.mrb[69].mxu1 }
 0x59d   :  { %v2525_v19 = vadd.f32 %v8753_v6, %v2524_v21  ;;  %6295 = vmatprep.mubr.msk.f32.mxu0 %vm437_vm2, %v2665_v13 }
 0x59e   :  { %6296 = vmatmul.mubr.msk.f32.gmra.mrb[68].mxu0 %vm437_vm2, %v2666_v4  ;;  %v2668_v33 = vmax.f32 %v2530_v38, 0.0 }
 0x59f   :  { %v2667_v24 = vmax.f32 %v2525_v19, 0.0  ;;  %v6247_v31 = vpop.f32.mrb[70].mxu1 }
 0x5a0   :  { %v2540_v27 = vadd.f32 %v6247_v31, %v8753_v6  ;;  %v2534_v40 = vpop.f32.mrb[71].mxu1 }
 0x5a1   :  { %v2535_v49 = vadd.f32 %v8753_v6, %v2534_v40  ;;  %6298 = vmatprep.mubr.msk.f32.mxu0 %vm437_vm2, %v2667_v24 }
 0x5a2   :  { %6299 = vmatmul.mubr.msk.f32.gmra.mrb[70].mxu0 %vm437_vm2, %v2668_v33  ;;  %v2670_v16 = vmax.f32 %v2540_v27, 0.0 }
 0x5a3   :  { %v2669_v57 = vmax.f32 %v2535_v49, 0.0  ;;  %v6250_v55 = vpop.f32.mrb[72].mxu1 }
 0x5a4   :  { %v2550_v43 = vadd.f32 %v6250_v55, %v8753_v6  ;;  %v2544_v45 = vpop.f32.mrb[73].mxu1 }
 0x5a5   :  { %v2545_v32 = vadd.f32 %v8753_v6, %v2544_v45  ;;  %6301 = vmatprep.mubr.msk.f32.mxu0 %vm437_vm2, %v2669_v57 }
 0x5a6   :  { %6302 = vmatmul.mubr.msk.f32.gmra.mrb[72].mxu0 %vm437_vm2, %v2670_v16  ;;  %v2672_v2 = vmax.f32 %v2550_v43, 0.0 }
 0x5a7   :  { %v2671_v47 = vmax.f32 %v2545_v32, 0.0  ;;  %v6253_v11 = vpop.f32.mrb[74].mxu1 }
 0x5a8   :  { %v2560_v41 = vadd.f32 %v6253_v11, %v8753_v6  ;;  %v2554_v9 = vpop.f32.mrb[75].mxu1 }
 0x5a9   :  { %v2555_v50 = vadd.f32 %v8753_v6, %v2554_v9  ;;  %6304 = vmatprep.mubr.msk.f32.mxu0 %vm437_vm2, %v2671_v47 }
 0x5aa   :  { %6305 = vmatmul.mubr.msk.f32.gmra.mrb[74].mxu0 %vm437_vm2, %v2672_v2  ;;  %v2674_v20 = vmax.f32 %v2560_v41, 0.0 }
 0x5ab   :  { %v2673_v60 = vmax.f32 %v2555_v50, 0.0  ;;  %v6256_v13 = vpop.f32.mrb[76].mxu1 }
 0x5ac   :  { %v2570_v4 = vadd.f32 %v6256_v13, %v8753_v6  ;;  %v2564_v38 = vpop.f32.mrb[77].mxu1 }
 0x5ad   :  { %v2565_v21 = vadd.f32 %v8753_v6, %v2564_v38  ;;  %6307 = vmatprep.mubr.msk.f32.mxu0 %vm437_vm2, %v2673_v60 }
 0x5ae   :  { %6308 = vmatmul.mubr.msk.f32.gmra.mrb[76].mxu0 %vm437_vm2, %v2674_v20  ;;  %v2676_v31 = vmax.f32 %v2570_v4, 0.0 }
 0x5af   :  { %v2675_v19 = vmax.f32 %v2565_v21, 0.0  ;;  %v6259_v24 = vpop.f32.mrb[78].mxu1 }
 0x5b0   :  { %v2580_v33 = vadd.f32 %v6259_v24, %v8753_v6  ;;  %v2574_v27 = vpop.f32.mrb[79].mxu1 }
 0x5b1   :  { %v2575_v40 = vadd.f32 %v8753_v6, %v2574_v27  ;;  %6310 = vmatprep.mubr.msk.f32.mxu0 %vm437_vm2, %v2675_v19 }
 0x5b2   :  { %6311 = vmatmul.mubr.msk.f32.gmra.mrb[78].mxu0 %vm437_vm2, %v2676_v31  ;;  %v2678_v55 = vmax.f32 %v2580_v33, 0.0 }
 0x5b3   :  { %v2677_v49 = vmax.f32 %v2575_v40, 0.0  ;;  %v6262_v57 = vpop.f32.mrb[80].mxu1 }
 0x5b4   :  { %v2590_v16 = vadd.f32 %v6262_v57, %v8753_v6  ;;  %v2584_v43 = vpop.f32.mrb[81].mxu1 }
 0x5b5   :  { %v2585_v45 = vadd.f32 %v8753_v6, %v2584_v43  ;;  %6313 = vmatprep.mubr.msk.f32.mxu0 %vm437_vm2, %v2677_v49 }
 0x5b6   :  { %6314 = vmatmul.mubr.msk.f32.gmra.mrb[80].mxu0 %vm437_vm2, %v2678_v55  ;;  %v2680_v11 = vmax.f32 %v2590_v16, 0.0 }
 0x5b7   :  { %v2679_v32 = vmax.f32 %v2585_v45, 0.0  ;;  %v6265_v47 = vpop.f32.mrb[82].mxu1 }
 0x5b8   :  { %v2600_v2 = vadd.f32 %v6265_v47, %v8753_v6  ;;  %v2594_v41 = vpop.f32.mrb[83].mxu1 }
 0x5b9   :  { %v2595_v9 = vadd.f32 %v8753_v6, %v2594_v41  ;;  %6316 = vmatprep.mubr.msk.f32.mxu0 %vm437_vm2, %v2679_v32 }
 0x5ba   :  { %6317 = vmatmul.mubr.msk.f32.gmra.mrb[82].mxu0 %vm437_vm2, %v2680_v11  ;;  %v2682_v13 = vmax.f32 %v2600_v2, 0.0 }
 0x5bb   :  { %v2681_v50 = vmax.f32 %v2595_v9, 0.0  ;;  %v6268_v60 = vpop.f32.mrb[84].mxu1 }
 0x5bc   :  { %v2610_v20 = vadd.f32 %v6268_v60, %v8753_v6  ;;  %v2604_v4 = vpop.f32.mrb[85].mxu1 }
 0x5bd   :  { %v2605_v38 = vadd.f32 %v8753_v6, %v2604_v4  ;;  %6319 = vmatprep.mubr.msk.f32.mxu0 %vm437_vm2, %v2681_v50 }
 0x5be   :  { %6320 = vmatmul.mubr.msk.f32.gmra.mrb[84].mxu0 %vm437_vm2, %v2682_v13  ;;  %v2684_v24 = vmax.f32 %v2610_v20, 0.0 }
 0x5bf   :  { %v2683_v21 = vmax.f32 %v2605_v38, 0.0  ;;  %v6271_v19 = vpop.f32.mrb[86].mxu1 }
 0x5c0   :  { %v2620_v31 = vadd.f32 %v6271_v19, %v8753_v6  ;;  %v2614_v33 = vpop.f32.mrb[87].mxu1 }
 0x5c1   :  { %v2615_v27 = vadd.f32 %v8753_v6, %v2614_v33  ;;  %6322 = vmatprep.mubr.msk.f32.mxu0 %vm437_vm2, %v2683_v21 }
 0x5c2   :  { %6323 = vmatmul.mubr.msk.f32.gmra.mrb[86].mxu0 %vm437_vm2, %v2684_v24  ;;  %v2686_v57 = vmax.f32 %v2620_v31, 0.0 }
 0x5c3   :  { %v2685_v40 = vmax.f32 %v2615_v27, 0.0  ;;  %v6274_v49 = vpop.f32.mrb[88].mxu1 }
 0x5c4   :  { %v2630_v55 = vadd.f32 %v6274_v49, %v8753_v6  ;;  %v2624_v16 = vpop.f32.mrb[89].mxu1  ;;  %v3171_v49 = vld [vmem:[#allocation2 + $0x208] sm:$0x7] }
 0x5c5   :  { %v2625_v43 = vadd.f32 %v8753_v6, %v2624_v16  ;;  %6325 = vmatprep.mubr.msk.f32.mxu0 %vm437_vm2, %v2685_v40  ;;  %6341 = vmatpush3.msk.msra.mxu1 %vm895_vm3, %v3171_v49  ;;  %v3165_v16 = vld [vmem:[#allocation2 + $0x1d8] sm:$0xff] }
 0x5c6   :  { %6326 = vmatmul.mubr.msk.f32.gmra.mrb[88].mxu0 %vm437_vm2, %v2686_v57  ;;  %v2688_v47 = vmax.f32 %v2630_v55, 0.0  ;;  %v9410_v57 = vld [vmem:[#allocation6_spill] sm:$0xff]  ;;  %6659 = vmatprep.subr.bf16.mxu1 %v9398_v48  ;;  %v3164_v55 = vld [vmem:[#allocation2 + $0x1d0] sm:$0xff] }
 0x5c7   :  { %v2687_v45 = vmax.f32 %v2625_v43, 0.0  ;;  %v6277_v32 = vpop.f32.mrb[90].mxu1  ;;  %6343 = vmatmul.mubr.msk.f32.vlgmr.msra.gmra.mrb[96].mxu1 %vm892_vm5, %v9410_v57 }
 0x5c8   :  { %v2640_v11 = vadd.f32 %v6277_v32, %v8753_v6  ;;  %v2634_v2 = vpop.f32.mrb[91].mxu1  ;;  %6361 = vmatprep.mubr.msk.f32.mxu1 %vm6869_vm4, %v9363_v10 }
 0x5c9   :  { %v2635_v41 = vadd.f32 %v8753_v6, %v2634_v2  ;;  %6328 = vmatprep.mubr.msk.f32.mxu0 %vm437_vm2, %v2687_v45  ;;  %v3166_v45 = vld [vmem:[#allocation2 + $0x1e0] sm:$0xff] }
 0x5ca   :  { %6329 = vmatmul.mubr.msk.f32.gmra.mrb[90].mxu0 %vm437_vm2, %v2688_v47  ;;  %v2690_v60 = vmax.f32 %v2640_v11, 0.0  ;;  %v6663_v32 = vpack.c.bf16 %v3166_v45, %v3165_v16  ;;  %v3167_v47 = vld [vmem:[#allocation2 + $0x1e8] sm:$0xff]  ;;  %v3168_v11 = vld [vmem:[#allocation2 + $0x1f0] sm:$0xff] }
 0x5cb   :  { %v2689_v9 = vmax.f32 %v2635_v41, 0.0  ;;  %v6280_v50 = vpop.f32.mrb[92].mxu1  ;;  %v6666_v2 = vpack.c.bf16 %v3168_v11, %v3167_v47  ;;  %v3327_v41 = vld [vmem:[#allocation2 + $0x210] sm:$0xff] }
 0x5cc   :  { %v2650_v13 = vadd.f32 %v6280_v50, %v8753_v6  ;;  %v2644_v20 = vpop.f32.mrb[93].mxu1  ;;  %v3329_v50 = vld [vmem:[#allocation2 + $0x220] sm:$0xff] }
 0x5cd   :  { %v2645_v4 = vadd.f32 %v8753_v6, %v2644_v20  ;;  %6331 = vmatprep.mubr.msk.f32.mxu0 %vm437_vm2, %v2689_v9  ;;  %v3328_v9 = vld [vmem:[#allocation2 + $0x218] sm:$0xff] }
 0x5ce   :  { %6332 = vmatmul.mubr.msk.f32.gmra.mrb[92].mxu0 %vm437_vm2, %v2690_v60  ;;  %v2692_v19 = vmax.f32 %v2650_v13, 0.0  ;;  %v3169_v60 = vld [vmem:[#allocation2 + $0x1f8] sm:$0xff]  ;;  %v3170_v13 = vld [vmem:[#allocation2 + $0x200] sm:$0xff]  ;;  %v6672_v20 = vpack.c.bf16 %v3328_v9, %v3327_v41 }
 0x5cf   :  { %v2691_v38 = vmax.f32 %v2645_v4, 0.0  ;;  %v6283_v21 = vpop.f32.mrb[94].mxu1  ;;  %v3330_v4 = vld [vmem:[#allocation2 + $0x228] sm:$0xff] }
 0x5d0   :  { %v2660_v24 = vadd.f32 %v6283_v21, %v8753_v6  ;;  %v2654_v31 = vpop.f32.mrb[95].mxu1  ;;  %6673 = vmatpush3.bf16.msra.mxu0 %v6672_v20  ;;  %v6669_v21 = vpack.c.bf16 %v3170_v13, %v3169_v60  ;;  %v9411_v60 = vld [vmem:[#allocation23_spill] sm:$0xff] }
 0x5d1   :  { %v2655_v33 = vadd.f32 %v8753_v6, %v2654_v31  ;;  %6334 = vmatprep.mubr.msk.f32.mxu0 %vm437_vm2, %v2691_v38  ;;  %v3163_v6 = vld [vmem:[#allocation2 + $0x1c8] sm:$0xff]  ;;  %v6675_v38 = vpack.c.bf16 %v3330_v4, %v3329_v50  ;;  %6674 = vmatprep.subr.bf16.mxu0 %v9398_v48 }
 0x5d2   :  { %6335 = vmatmul.mubr.msk.f32.gmra.mrb[94].mxu0 %vm437_vm2, %v2692_v19  ;;  %v2694_v40 = vmax.f32 %v2660_v24, 0.0  ;;  %v6660_v43 = vpack.c.bf16 %v3164_v55, %v3163_v6  ;;  %v8831_v19 = vld [vmem:[#allocation2 + $0x188] ss:$0 sm:$0xff] }
 0x5d3   :  { %v2693_v27 = vmax.f32 %v2655_v33, 0.0 }
 0x5d4   :  { %6661 = vmatpush3.bf16.msra.mxu1 %v6660_v43  ;;  %6676 = vmatpush3.bf16.msra.mxu0 %v6675_v38 }
 0x5d5   :  { %6337 = vmatprep.mubr.msk.f32.mxu0 %vm437_vm2, %v2693_v27  ;;  %6662 = vmatprep.subr.bf16.mxu1 %v9398_v48 }
 0x5d6   :  { %6338 = vmatmul.mubr.msk.f32.gmra.mrb[96].mxu0 %vm437_vm2, %v2694_v40 }
 0x5d7   :  { %6372 = vmatprep.mubr.msk.f32.mxu0 %vm6869_vm4, %v9363_v10 }
 0x5d8   :  { %6664 = vmatpush3.bf16.msra.mxu1 %v6663_v32 }
 0x5d9   :  { %6665 = vmatprep.subr.bf16.mxu1 %v9398_v48 }
 0x5dc   :  { %6667 = vmatpush3.bf16.msra.mxu1 %v6666_v2 }
 0x5dd   :  { %6668 = vmatprep.subr.bf16.mxu1 %v9398_v48 }
 0x5e0   :  { %6670 = vmatpush3.bf16.msra.mxu1 %v6669_v21 }
 0x66d   :  { %v6294_v24 = vpop.f32.mrb[66].mxu0 }
 0x66e   :  { %v2872_v31 = vadd.f32 %v6294_v24, %v8831_v19  ;;  %v2866_v33 = vpop.f32.mrb[67].mxu0 }
 0x66f   :  { %v2867_v27 = vadd.f32 %v8831_v19, %v2866_v33 }
 0x670   :  { %v3026_v40 = vmax.f32 %v2872_v31, 0.0 }
 0x671   :  { %v3025_v49 = vmax.f32 %v2867_v27, 0.0  ;;  %v6297_v6 = vpop.f32.mrb[68].mxu0 }
 0x672   :  { %v2882_v55 = vadd.f32 %v6297_v6, %v8831_v19  ;;  %v2876_v16 = vpop.f32.mrb[69].mxu0  ;;  %v3058_v45 = vmul.f32 %v8014_v8, %v3026_v40  ;;  %v9412_v6 = vld [vmem:[#allocation24_spill] sm:$0xff] }
 0x673   :  { %v2877_v43 = vadd.f32 %v8831_v19, %v2876_v16  ;;  %v3057_v47 = vmul.f32 %v8016_v15, %v3025_v49 }
 0x674   :  { %v3028_v32 = vmax.f32 %v2882_v55, 0.0  ;;  %v3090_v4 = vsel %vm791_vm6, %v3058_v45, -inf }
 0x675   :  { %v3027_v11 = vmax.f32 %v2877_v43, 0.0  ;;  %v6300_v2 = vpop.f32.mrb[70].mxu0  ;;  %v3089_v24 = vsel %vm791_vm6, %v3057_v47, -inf }
 0x676   :  { %v3060_v41 = vmul.f32 %v8036_v23, %v3028_v32  ;;  %v2892_v9 = vadd.f32 %v6300_v2, %v8831_v19  ;;  %v2886_v50 = vpop.f32.mrb[71].mxu0  ;;  %v9413_v32 = vld [vmem:[#allocation22_spill] sm:$0xff] }
 0x677   :  { %v3059_v13 = vmul.f32 %v9411_v60, %v3027_v11  ;;  %v2887_v20 = vadd.f32 %v8831_v19, %v2886_v50 }
 0x678   :  { %v3093_v38 = vsel %vm791_vm6, %v3060_v41, -inf  ;;  %v3030_v21 = vmax.f32 %v2892_v9, 0.0 }
 0x679   :  { %v3094_v31 = vmax.f32 %v3090_v4, %v3093_v38  ;;  %v3091_v33 = vsel %vm791_vm6, %v3059_v13, -inf  ;;  %v3029_v27 = vmax.f32 %v2887_v20, 0.0  ;;  %v6303_v40 = vpop.f32.mrb[72].mxu0  ;;  %v9414_v4 = vld [vmem:[#allocation26_spill] sm:$0xff] }
 0x67a   :  { %v3092_v49 = vmax.f32 %v3089_v24, %v3091_v33  ;;  %v3062_v55 = vmul.f32 %v9412_v6, %v3030_v21  ;;  %v2902_v16 = vadd.f32 %v6303_v40, %v8831_v19  ;;  %v2896_v43 = vpop.f32.mrb[73].mxu0  ;;  %v9415_v33 = vld [vmem:[#allocation25_spill] sm:$0xff] }
 0x67b   :  { %v3061_v11 = vmul.f32 %v9413_v32, %v3029_v27  ;;  %v2897_v45 = vadd.f32 %v8831_v19, %v2896_v43 }
 0x67c   :  { %v3097_v2 = vsel %vm791_vm6, %v3062_v55, -inf  ;;  %v3032_v41 = vmax.f32 %v2902_v16, 0.0 }
 0x67d   :  { %v3098_v9 = vmax.f32 %v3094_v31, %v3097_v2  ;;  %v3095_v47 = vsel %vm791_vm6, %v3061_v11, -inf  ;;  %v3031_v50 = vmax.f32 %v2897_v45, 0.0  ;;  %v6306_v13 = vpop.f32.mrb[74].mxu0  ;;  %v9416_v2 = vld [vmem:[#allocation28_spill] sm:$0xff] }
 0x67e   :  { %v3096_v20 = vmax.f32 %v3092_v49, %v3095_v47  ;;  %v3064_v38 = vmul.f32 %v9414_v4, %v3032_v41  ;;  %v2912_v21 = vadd.f32 %v6306_v13, %v8831_v19  ;;  %v2906_v24 = vpop.f32.mrb[75].mxu0  ;;  %v9417_v13 = vld [vmem:[#allocation27_spill] sm:$0xff] }
 0x67f   :  { %v3063_v40 = vmul.f32 %v9415_v33, %v3031_v50  ;;  %v2907_v27 = vadd.f32 %v8831_v19, %v2906_v24 }
 0x680   :  { %v3101_v43 = vsel %vm791_vm6, %v3064_v38, -inf  ;;  %v3034_v32 = vmax.f32 %v2912_v21, 0.0 }
 0x681   :  { %v3102_v55 = vmax.f32 %v3098_v9, %v3101_v43  ;;  %v3099_v31 = vsel %vm791_vm6, %v3063_v40, -inf  ;;  %v3033_v16 = vmax.f32 %v2907_v27, 0.0  ;;  %v6309_v11 = vpop.f32.mrb[76].mxu0  ;;  %v9418_v43 = vld [vmem:[#allocation30_spill] sm:$0xff] }
 0x682   :  { %v3100_v45 = vmax.f32 %v3096_v20, %v3099_v31  ;;  %v3066_v49 = vmul.f32 %v9416_v2, %v3034_v32  ;;  %v2922_v41 = vadd.f32 %v6309_v11, %v8831_v19  ;;  %v2916_v47 = vpop.f32.mrb[77].mxu0  ;;  %v9419_v11 = vld [vmem:[#allocation29_spill] sm:$0xff] }
 0x683   :  { %v3065_v4 = vmul.f32 %v9417_v13, %v3033_v16  ;;  %v2917_v50 = vadd.f32 %v8831_v19, %v2916_v47 }
 0x684   :  { %v3105_v24 = vsel %vm791_vm6, %v3066_v49, -inf  ;;  %v3036_v33 = vmax.f32 %v2922_v41, 0.0 }
 0x685   :  { %v3106_v38 = vmax.f32 %v3102_v55, %v3105_v24  ;;  %v3103_v9 = vsel %vm791_vm6, %v3065_v4, -inf  ;;  %v3035_v21 = vmax.f32 %v2917_v50, 0.0  ;;  %v6312_v40 = vpop.f32.mrb[78].mxu0  ;;  %v9420_v24 = vld [vmem:[#allocation32_spill] sm:$0xff] }
 0x686   :  { %v3104_v27 = vmax.f32 %v3100_v45, %v3103_v9  ;;  %v3068_v20 = vmul.f32 %v9418_v43, %v3036_v33  ;;  %v2932_v32 = vadd.f32 %v6312_v40, %v8831_v19  ;;  %v2926_v31 = vpop.f32.mrb[79].mxu0  ;;  %v9421_v40 = vld [vmem:[#allocation31_spill] sm:$0xff] }
 0x687   :  { %v3067_v2 = vmul.f32 %v9419_v11, %v3035_v21  ;;  %v2927_v16 = vadd.f32 %v8831_v19, %v2926_v31 }
 0x688   :  { %v3109_v47 = vsel %vm791_vm6, %v3068_v20, -inf  ;;  %v3038_v13 = vmax.f32 %v2932_v32, 0.0 }
 0x689   :  { %v3110_v49 = vmax.f32 %v3106_v38, %v3109_v47  ;;  %v3107_v55 = vsel %vm791_vm6, %v3067_v2, -inf  ;;  %v3037_v41 = vmax.f32 %v2927_v16, 0.0  ;;  %v6315_v4 = vpop.f32.mrb[80].mxu0  ;;  %v9422_v47 = vld [vmem:[#allocation35_spill] sm:$0xff] }
 0x68a   :  { %v3108_v50 = vmax.f32 %v3104_v27, %v3107_v55  ;;  %v3070_v45 = vmul.f32 %v9420_v24, %v3038_v13  ;;  %v2942_v33 = vadd.f32 %v6315_v4, %v8831_v19  ;;  %v2936_v9 = vpop.f32.mrb[81].mxu0  ;;  %v9423_v4 = vld [vmem:[#allocation33_spill] sm:$0xff] }
 0x68b   :  { %v3069_v43 = vmul.f32 %v9421_v40, %v3037_v41  ;;  %v2937_v21 = vadd.f32 %v8831_v19, %v2936_v9 }
 0x68c   :  { %v3113_v31 = vsel %vm791_vm6, %v3070_v45, -inf  ;;  %v3040_v11 = vmax.f32 %v2942_v33, 0.0 }
 0x68d   :  { %v3114_v20 = vmax.f32 %v3110_v49, %v3113_v31  ;;  %v3111_v38 = vsel %vm791_vm6, %v3069_v43, -inf  ;;  %v3039_v32 = vmax.f32 %v2937_v21, 0.0  ;;  %v6318_v2 = vpop.f32.mrb[82].mxu0 }
 0x68e   :  { %v3112_v16 = vmax.f32 %v3108_v50, %v3111_v38  ;;  %v3072_v27 = vmul.f32 %v9422_v47, %v3040_v11  ;;  %v2952_v13 = vadd.f32 %v6318_v2, %v8831_v19  ;;  %v2946_v55 = vpop.f32.mrb[83].mxu0  ;;  %v9424_v2 = vld [vmem:[#allocation36_spill] sm:$0xff] }
 0x68f   :  { %v3071_v24 = vmul.f32 %v9423_v4, %v3039_v32  ;;  %v2947_v41 = vadd.f32 %v8831_v19, %v2946_v55  ;;  %v9425_v55 = vld [vmem:[#allocation37_spill] sm:$0xff] }
 0x690   :  { %v3117_v9 = vsel %vm791_vm6, %v3072_v27, -inf  ;;  %v3042_v40 = vmax.f32 %v2952_v13, 0.0 }
 0x691   :  { %v3118_v45 = vmax.f32 %v3114_v20, %v3117_v9  ;;  %v3115_v49 = vsel %vm791_vm6, %v3071_v24, -inf  ;;  %v3041_v33 = vmax.f32 %v2947_v41, 0.0  ;;  %v6321_v43 = vpop.f32.mrb[84].mxu0  ;;  %v9426_v20 = vld [vmem:[#allocation38_spill] sm:$0xff] }
 0x692   :  { %v3116_v21 = vmax.f32 %v3112_v16, %v3115_v49  ;;  %v2962_v50 = vadd.f32 %v6321_v43, %v8831_v19  ;;  %v2956_v31 = vpop.f32.mrb[85].mxu0  ;;  %v3074_v32 = vmul.f32 %v9424_v2, %v3042_v40  ;;  %v9427_v16 = vld [vmem:[#allocation34_spill] sm:$0xff] }
 0x693   :  { %v2957_v11 = vadd.f32 %v8831_v19, %v2956_v31  ;;  %v3073_v47 = vmul.f32 %v9425_v55, %v3041_v33 }
 0x694   :  { %v8885_v38 = vmax.f32 %v3116_v21, %v3118_v45  ;;  %v3044_v4 = vmax.f32 %v2962_v50, 0.0  ;;  %v3127_v31 = vsel %vm791_vm6, %v3074_v32, -inf }
 0x695   :  { %v3043_v27 = vmax.f32 %v2957_v11, 0.0  ;;  %v6324_v13 = vpop.f32.mrb[86].mxu0  ;;  %v3126_v40 = vsel %vm791_vm6, %v3073_v47, -inf }
 0x696   :  { %v3076_v9 = vmul.f32 %v3044_v4, %v9426_v20  ;;  %v2972_v24 = vadd.f32 %v6324_v13, %v8831_v19  ;;  %v2966_v41 = vpop.f32.mrb[87].mxu0  ;;  %v9428_v20 = vld [vmem:[#allocation39_spill] sm:$0xff] }
 0x697   :  { %v3075_v49 = vmul.f32 %v3043_v27, %v9427_v16  ;;  %v2967_v43 = vadd.f32 %v8831_v19, %v2966_v41  ;;  %v9429_v16 = vld [vmem:[#allocation41_spill] sm:$0xff] }
 0x698   :  { %v3130_v45 = vsel %vm791_vm6, %v3076_v9, -inf  ;;  %v3046_v21 = vmax.f32 %v2972_v24, 0.0 }
 0x699   :  { %v3131_v50 = vmax.f32 %v3127_v31, %v3130_v45  ;;  %v3128_v33 = vsel %vm791_vm6, %v3075_v49, -inf  ;;  %v3045_v11 = vmax.f32 %v2967_v43, 0.0  ;;  %v6327_v55 = vpop.f32.mrb[88].mxu0  ;;  %v9430_v45 = vld [vmem:[#allocation40_spill] sm:$0xff] }
 0x69a   :  { %v3129_v4 = vmax.f32 %v3126_v40, %v3128_v33  ;;  %v3078_v13 = vmul.f32 %v3046_v21, %v9428_v20  ;;  %v2982_v2 = vadd.f32 %v6327_v55, %v8831_v19  ;;  %v2976_v27 = vpop.f32.mrb[89].mxu0 }
 0x69b   :  { %v3077_v41 = vmul.f32 %v3045_v11, %v9429_v16  ;;  %v2977_v32 = vadd.f32 %v8831_v19, %v2976_v27 }
 0x69c   :  { %v3134_v9 = vsel %vm791_vm6, %v3078_v13, -inf  ;;  %v3048_v24 = vmax.f32 %v2982_v2, 0.0 }
 0x69d   :  { %v3135_v6 = vmax.f32 %v3131_v50, %v3134_v9  ;;  %v3132_v47 = vsel %vm791_vm6, %v3077_v41, -inf  ;;  %v3047_v31 = vmax.f32 %v2977_v32, 0.0  ;;  %v6330_v49 = vpop.f32.mrb[90].mxu0 }
 0x69e   :  { %v3133_v43 = vmax.f32 %v3129_v4, %v3132_v47  ;;  %v3080_v40 = vmul.f32 %v3048_v24, %v9430_v45  ;;  %v2992_v21 = vadd.f32 %v6330_v49, %v8831_v19  ;;  %v2986_v33 = vpop.f32.mrb[91].mxu0 }
 0x69f   :  { %v3079_v55 = vmul.f32 %v3047_v31, %v8237_v17  ;;  %v2987_v11 = vadd.f32 %v8831_v19, %v2986_v33 }
 0x6a0   :  { %v3138_v27 = vsel %vm791_vm6, %v3080_v40, -inf  ;;  %v3050_v16 = vmax.f32 %v2992_v21, 0.0 }
 0x6a1   :  { %v3139_v13 = vmax.f32 %v3135_v6, %v3138_v27  ;;  %v3136_v2 = vsel %vm791_vm6, %v3079_v55, -inf  ;;  %v3049_v50 = vmax.f32 %v2987_v11, 0.0  ;;  %v6333_v41 = vpop.f32.mrb[92].mxu0  ;;  %v9431_v27 = vld [vmem:[#allocation42_spill] sm:$0xff] }
 0x6a2   :  { %v3137_v32 = vmax.f32 %v3133_v43, %v3136_v2  ;;  %v3082_v4 = vmul.f32 %v3050_v16, %v8219_v39  ;;  %v3002_v9 = vadd.f32 %v6333_v41, %v8831_v19  ;;  %v2996_v24 = vpop.f32.mrb[93].mxu0 }
 0x6a3   :  { %v3081_v47 = vmul.f32 %v3049_v50, %v8259_v25  ;;  %v2997_v31 = vadd.f32 %v8831_v19, %v2996_v24 }
 0x6a4   :  { %v3142_v49 = vsel %vm791_vm6, %v3082_v4, -inf  ;;  %v3052_v33 = vmax.f32 %v3002_v9, 0.0 }
 0x6a5   :  { %v3143_v40 = vmax.f32 %v3139_v13, %v3142_v49  ;;  %v3140_v6 = vsel %vm791_vm6, %v3081_v47, -inf  ;;  %v3051_v21 = vmax.f32 %v2997_v31, 0.0  ;;  %v6336_v55 = vpop.f32.mrb[94].mxu0  ;;  %v9432_v49 = vld [vmem:[#allocation46_spill] sm:$0xff] }
 0x6a6   :  { %v3141_v11 = vmax.f32 %v3137_v32, %v3140_v6  ;;  %v3084_v43 = vmul.f32 %v3052_v33, %v9431_v27  ;;  %v3012_v16 = vadd.f32 %v6336_v55, %v8831_v19  ;;  %v3006_v2 = vpop.f32.mrb[95].mxu0  ;;  %v9433_v55 = vld [vmem:[#allocation49_spill] sm:$0xff] }
 0x6a7   :  { %v3083_v41 = vmul.f32 %v3051_v21, %v8291_v28  ;;  %v3007_v50 = vadd.f32 %v8831_v19, %v3006_v2  ;;  %v3120_v2 = vrot.slane %v8885_v38, 4 }
 0x6a8   :  { %v3146_v24 = vsel %vm791_vm6, %v3084_v43, -inf  ;;  %v3054_v25 = vmax.f32 %v3012_v16, 0.0 }
 0x6a9   :  { %v3147_v4 = vmax.f32 %v3143_v40, %v3146_v24  ;;  %v3144_v13 = vsel %vm791_vm6, %v3083_v41, -inf  ;;  %v3053_v9 = vmax.f32 %v3007_v50, 0.0  ;;  %v6339_v47 = vpop.f32.mrb[96].mxu0 }
 0x6aa   :  { %v3145_v31 = vmax.f32 %v3141_v11, %v3144_v13  ;;  %v3086_v32 = vmul.f32 %v3054_v25, %v9432_v49  ;;  %v3022_v33 = vadd.f32 %v6339_v47, %v8831_v19  ;;  %v3016_v6 = vpop.f32.mrb[97].mxu0  ;;  %v9434_v11 = vld [vmem:[#allocation51_spill] sm:$0xff]  ;;  %v3121_v47 = vmax.f32 %v8885_v38, %v3120_v2  ;;  %v3241_v38 = vpop.f32.mrb[96].mxu1 }
 0x6ab   :  { %v3085_v27 = vmul.f32 %v3053_v9, %v9433_v55  ;;  %v3017_v21 = vadd.f32 %v8831_v19, %v3016_v6  ;;  %v6344_v2 = vpop.f32.mrb[97].mxu1 }
 0x6ac   :  { %v3150_v43 = vsel %vm791_vm6, %v3086_v32, -inf  ;;  %v3056_v16 = vmax.f32 %v3022_v33, 0.0  ;;  %v3122_v49 = vrot.slane %v3121_v47, 2 }
 0x6ad   :  { %v3151_v40 = vmax.f32 %v3147_v4, %v3150_v43  ;;  %v3148_v41 = vsel %vm791_vm6, %v3085_v27, -inf  ;;  %v3055_v50 = vmax.f32 %v3017_v21, 0.0 }
 0x6ae   :  { %v3149_v24 = vmax.f32 %v3145_v31, %v3148_v41  ;;  %v3088_v13 = vmul.f32 %v3056_v16, %v9434_v11  ;;  %v3123_v4 = vmax.f32 %v3121_v47, %v3122_v49  ;;  %v3474_v49 = vld [vmem:[#allocation2 + $0x30] sm:$0x7]  ;;  %v5502_v47 = vld [vmem:[#allocation2 + $0x198] ss:$0 sm:$0xff] }
 0x6af   :  { %v3087_v25 = vmul.f32 %v3055_v50, %v8363_v59  ;;  %6375 = vmatprep.subr.msk.mxu1 %vm895_vm3, %v3474_v49 }
 0x6b0   :  { %v3154_v9 = vsel %vm791_vm6, %v3088_v13, -inf  ;;  %v3124_v31 = vrot.slane %v3123_v4, 1  ;;  %v5501_v13 = vld [vmem:[#allocation2 + $0x190] ss:$0 sm:$0xff] }
 0x6b1   :  { %v3155_v55 = vmax.f32 %v3151_v40, %v3154_v9  ;;  %v3152_v19 = vsel %vm791_vm6, %v3087_v25, -inf }
 0x6b2   :  { %v3153_v6 = vmax.f32 %v3149_v24, %v3152_v19  ;;  %v3125_v16 = vmax.f32 %v3123_v4, %v3124_v31  ;;  %v9436_v31 = vld [vmem:[#allocation7_spill] sm:$0xff] }
 0x6b4   :  { %v3156_v32 = vmax.f32 %v3153_v6, %v3155_v55  ;;  %v3837_v6 = vld [vmem:[#allocation2 + $0x40] sm:$0xff] }
 0x6b6   :  { %v3157_v33 = vrot.slane %v3156_v32, 4 }
 0x6b8   :  { %v3158_v43 = vmax.f32 %v3156_v32, %v3157_v33 }
 0x6ba   :  { %v3159_v27 = vrot.slane %v3158_v43, 2 }
 0x6bc   :  { %v3160_v21 = vmax.f32 %v3158_v43, %v3159_v27  ;;  %v9435_v43 = vld [vmem:[#allocation5_spill] sm:$0xff] }
 0x6be   :  { %v3161_v41 = vrot.slane %v3160_v21, 1 }
 0x6c0   :  { %v3162_v11 = vmax.f32 %v3160_v21, %v3161_v41 }
 0x6c2   :  { %v3247_v50 = vsel %vm971_vm7, %v3162_v11, %v3125_v16  ;;  %v3836_v11 = vld [vmem:[#allocation2 + $0x38] sm:$0xff]  ;;  %v9437_v16 = vld [vmem:[#allocation45_spill] sm:$0xff] }
 0x6c3   :  { %6362 = vmatmul.mubr.msk.f32.vlgmr.msra.gmra.mrb[98].mxu1 %vm791_vm6, %v3247_v50  ;;  %v6677_v4 = vpack.c.bf16 %v3837_v6, %v3836_v11 }
 0x6c4   :  { %6376 = vmatpush3.msk.msra.mxu1 %vm895_vm3, %v3474_v49 }
 0x6c5   :  { %6678 = vmatprep.subr.bf16.mxu0 %v6677_v4 }
 0x796   :  { %v3316_v40 = vpop.f32.mrb[98].mxu1 }
 0x797   :  { %v3317_v24 = vadd.f32 %v3316_v40, %v3241_v38  ;;  %v6363_v25 = vpop.f32.mrb[99].mxu1  ;;  %v9438_v38 = vld [vmem:[#allocation44_spill] sm:$0xff]  ;;  %v9439_v40 = vld [vmem:[#allocation47_spill] sm:$0xff] }
 0x799   :  { %v3325_v55 = vadd.f32 %v5501_v13, %v3317_v24  ;;  %v9440_v24 = vld [vmem:[#allocation48_spill] sm:$0xff] }
 0x79b   :  { %v3326_v9 = vmax.f32 %v3325_v55, 0.0  ;;  %v9441_v55 = vld [vmem:[#allocation50_spill] sm:$0xff] }
 0x79d   :  { %6373 = vmatmul.mubr.msk.f32.vlgmr.msra.gmra.mrb[98].mxu0 %vm437_vm2, %v3326_v9 }
 0x79e   :  { %6680 = vmatpush3.bf16.msra.mxu0 %v6677_v4 }
 0x870   :  { %v3405_v19 = vpop.f32.mrb[98].mxu0 }
 0x871   :  { %v3406_v32 = vadd.f32 %v5502_v47, %v3405_v19  ;;  %v6374_v33 = vpop.f32.mrb[99].mxu0 }
 0x873   :  { %v3416_v27 = vrot.slane %v3406_v32, %v9435_v43  ;;  %5214 = vrot.lane.b32.xlu0 %v3406_v32, %s6874_s26 }
 0x875   :  { %v3424_v21 = vrot.slane %v3416_v27, %v9435_v43  ;;  %v3417_v32 = vcombine.high %v3416_v27, %v3416_v27 }
 0x877   :  { %v3435_v41 = vrot.slane %v3424_v21, %v9436_v31  ;;  %5034 = vrot.lane.b32.xlu0 %v8552_v44, %s6873_s13 }
 0x879   :  { %v3442_v50 = vsub.f32 %v9437_v16, %v3435_v41  ;;  %v3443_v2 = vsub.f32 %v9438_v38, %v3435_v41  ;;  %v3444_v13 = vsub.f32 %v9439_v40, %v3435_v41  ;;  %v3445_v25 = vsub.f32 %v9440_v24, %v3435_v41 }
 0x87a   :  { %v3446_v9 = vsub.f32 %v9441_v55, %v3435_v41  ;;  %v3447_v49 = vsub.f32 %v8354_v46, %v3435_v41  ;;  %v3448_v47 = vsub.f32 %v8382_v54, %v3435_v41  ;;  %v3449_v19 = vsub.f32 %v8388_v22, %v3435_v41  ;;  %v9442_v22 = vld [vmem:[#allocation52_spill] sm:$0xff]  ;;  %v4200_v55 = vld [vmem:[#allocation2 + $0x68] sm:$0xff] }
 0x87b   :  { %5038 = vrot.lane.b32.xlu0 %v8564_v12, %s6873_s13  ;;  %6377 = vmatprep.mubr.msk.f32.mxu1 %vm892_vm5, %v3442_v50  ;;  %v3450_v11 = vsub.f32 %v8400_v29, %v3435_v41  ;;  %v3451_v6 = vsub.f32 %v8406_v51, %v3435_v41  ;;  %v3452_v33 = vsub.f32 %v8416_v42, %v3435_v41  ;;  %v9443_v50 = vld [vmem:[#allocation19_spill] sm:$0xff] }
 0x87c   :  { %6378 = vmatmul.mubr.msk.f32.vlgmr.msra.gmra.mrb[100].mxu1 %vm892_vm5, %v3443_v2  ;;  %v3453_v46 = vsub.f32 %v8422_v36, %v3435_v41  ;;  %v3431_v54 = vrot.slane %v3417_v32, %v9435_v43  ;;  %v3454_v4 = vsub.f32 %v9442_v22, %v3435_v41  ;;  %v3455_v29 = vsub.f32 %v8438_v58, %v3435_v41  ;;  %v4204_v32 = vld [vmem:[#allocation2 + $0x88] sm:$0xff] }
 0x87d   :  { %6380 = vmatprep.mubr.msk.f32.mxu1 %vm892_vm5, %v3444_v13  ;;  %v3456_v42 = vsub.f32 %v8448_v61, %v3435_v41  ;;  %v3457_v36 = vsub.f32 %v8454_v0, %v3435_v41  ;;  %v9444_v13 = vld [vmem:[#allocation20_spill] sm:$0xff] }
 0x87e   :  { %v3439_v51 = vrot.slane %v3431_v54, %v9436_v31  ;;  %v9030_v54 = vld [vmem:[#allocation2] ss:$0 sm:$0xff] }
 0x880   :  { %6381 = vmatmul.mubr.msk.f32.gmra.mrb[102].mxu1 %vm892_vm5, %v3445_v25  ;;  %v3458_v27 = vsub.f32 %v8468_v14, %v3439_v51  ;;  %v3459_v21 = vsub.f32 %v8465_v18, %v3439_v51  ;;  %v3460_v58 = vsub.f32 %v8477_v52, %v3439_v51  ;;  %v3461_v61 = vsub.f32 %v8482_v1, %v3439_v51  ;;  %v4199_v25 = vld [vmem:[#allocation2 + $0x60] sm:$0xff] }
 0x881   :  { %6383 = vmatprep.mubr.msk.f32.mxu1 %vm892_vm5, %v3446_v9  ;;  %v3462_v31 = vsub.f32 %v8495_v37, %v3439_v51  ;;  %v3463_v0 = vsub.f32 %v8500_v7, %v3439_v51  ;;  %v3464_v14 = vsub.f32 %v8509_v26, %v3439_v51  ;;  %v3465_v18 = vsub.f32 %v8514_v5, %v3439_v51 }
 0x882   :  { %v3466_v52 = vsub.f32 %v8523_v56, %v3439_v51  ;;  %v3467_v1 = vsub.f32 %v8528_v62, %v3439_v51  ;;  %v3468_v37 = vsub.f32 %v8537_v63, %v3439_v51  ;;  %v3469_v7 = vsub.f32 %v8542_v34, %v3439_v51  ;;  %v3838_v63 = vld [vmem:[#allocation2 + $0x48] sm:$0xff]  ;;  %v3839_v34 = vld [vmem:[#allocation2 + $0x50] sm:$0xff] }
 0x883   :  { %v3470_v26 = vsub.f32 %v8552_v44, %v3439_v51  ;;  %v3471_v5 = vsub.f32 %v8557_v30, %v3439_v51  ;;  %v3472_v56 = vsub.f32 %v8564_v12, %v3439_v51  ;;  %v3473_v62 = vsub.f32 %v8571_v53, %v3439_v51 }
 0x884   :  { %6384 = vmatmul.mubr.msk.f32.gmra.mrb[104].mxu1 %vm892_vm5, %v3447_v49  ;;  %v6681_v41 = vpack.c.bf16 %v3839_v34, %v3838_v63  ;;  %v5221_v44 = vsel %vm892_vm5, %v8486_v3, %v8577_v35  ;;  %v4198_v35 = vld [vmem:[#allocation2 + $0x58] sm:$0xff]  ;;  %v4201_v49 = vld [vmem:[#allocation2 + $0x70] sm:$0xff] }
 0x885   :  { %6386 = vmatprep.mubr.msk.f32.mxu1 %vm892_vm5, %v3448_v47  ;;  %v6685_v9 = vpack.c.bf16 %v4199_v25, %v4198_v35  ;;  %v6689_v47 = vpack.c.bf16 %v4201_v49, %v4200_v55 }
 0x886   :  { %6682 = vmatprep.subr.bf16.mxu0 %v6681_v41 }
 0x887   :  { %6684 = vmatpush3.bf16.msra.mxu0 %v6681_v41  ;;  %6686 = vmatprep.subr.bf16.mxu1 %v6685_v9 }
 0x888   :  { %6387 = vmatmul.mubr.msk.f32.gmra.mrb[106].mxu1 %vm892_vm5, %v3449_v19  ;;  %6545 = vmatprep.subr.mxu0 %v9363_v10  ;;  %v4202_v19 = vld [vmem:[#allocation2 + $0x78] sm:$0xff] }
 0x889   :  { %6389 = vmatprep.mubr.msk.f32.mxu1 %vm892_vm5, %v3450_v11  ;;  %v4203_v11 = vld [vmem:[#allocation2 + $0x80] sm:$0xff]  ;;  %6688 = vmatpush3.bf16.msra.mxu1 %v6685_v9 }
 0x88a   :  { %6690 = vmatprep.subr.bf16.mxu1 %v6689_v47 }
 0x88c   :  { %6390 = vmatmul.mubr.msk.f32.gmra.mrb[108].mxu1 %vm892_vm5, %v3451_v6  ;;  %v6693_v6 = vpack.c.bf16 %v4203_v11, %v4202_v19 }
 0x88d   :  { %6392 = vmatprep.mubr.msk.f32.mxu1 %vm892_vm5, %v3452_v33  ;;  %v4205_v33 = vld [vmem:[#allocation2 + $0x90] sm:$0xff]  ;;  %6692 = vmatpush3.bf16.msra.mxu1 %v6689_v47 }
 0x88e   :  { %6694 = vmatprep.subr.bf16.mxu1 %v6693_v6 }
 0x890   :  { %6393 = vmatmul.mubr.msk.f32.gmra.mrb[110].mxu1 %vm892_vm5, %v3453_v46  ;;  %v6697_v46 = vpack.c.bf16 %v4205_v33, %v4204_v32 }
 0x891   :  { %6395 = vmatprep.mubr.msk.f32.mxu1 %vm892_vm5, %v3454_v4  ;;  %6696 = vmatpush3.bf16.msra.mxu1 %v6693_v6 }
 0x892   :  { %6698 = vmatprep.subr.bf16.mxu1 %v6697_v46 }
 0x894   :  { %6396 = vmatmul.mubr.msk.f32.gmra.mrb[112].mxu1 %vm892_vm5, %v3455_v29 }
 0x895   :  { %6398 = vmatprep.mubr.msk.f32.mxu1 %vm892_vm5, %v3456_v42  ;;  %6700 = vmatpush3.bf16.msra.mxu1 %v6697_v46 }
 0x898   :  { %6399 = vmatmul.mubr.msk.f32.gmra.mrb[114].mxu1 %vm892_vm5, %v3457_v36 }
 0x899   :  { %6401 = vmatprep.mubr.msk.f32.mxu1 %vm892_vm5, %v3458_v27 }
 0x89c   :  { %6402 = vmatmul.mubr.msk.f32.gmra.mrb[116].mxu1 %vm892_vm5, %v3459_v21 }
 0x89d   :  { %6404 = vmatprep.mubr.msk.f32.mxu1 %vm892_vm5, %v3460_v58 }
 0x8a0   :  { %6405 = vmatmul.mubr.msk.f32.gmra.mrb[118].mxu1 %vm892_vm5, %v3461_v61 }
 0x8a1   :  { %6407 = vmatprep.mubr.msk.f32.mxu1 %vm892_vm5, %v3462_v31 }
 0x8a4   :  { %6408 = vmatmul.mubr.msk.f32.gmra.mrb[120].mxu1 %vm892_vm5, %v3463_v0 }
 0x8a5   :  { %6410 = vmatprep.mubr.msk.f32.mxu1 %vm892_vm5, %v3464_v14 }
 0x8a8   :  { %6411 = vmatmul.mubr.msk.f32.gmra.mrb[122].mxu1 %vm892_vm5, %v3465_v18 }
 0x8a9   :  { %6413 = vmatprep.mubr.msk.f32.mxu1 %vm892_vm5, %v3466_v52 }
 0x8ac   :  { %6414 = vmatmul.mubr.msk.f32.gmra.mrb[124].mxu1 %vm892_vm5, %v3467_v1 }
 0x8ad   :  { %6416 = vmatprep.mubr.msk.f32.mxu1 %vm892_vm5, %v3468_v37 }
 0x8b0   :  { %6417 = vmatmul.mubr.msk.f32.gmra.mrb[126].mxu1 %vm892_vm5, %v3469_v7 }
 0x8b1   :  { %6419 = vmatprep.mubr.msk.f32.mxu1 %vm892_vm5, %v3470_v26 }
 0x8b4   :  { %6420 = vmatmul.mubr.msk.f32.gmra.mrb[128].mxu1 %vm892_vm5, %v3471_v5 }
 0x8b5   :  { %6422 = vmatprep.mubr.msk.f32.mxu1 %vm892_vm5, %v3472_v56 }
 0x8b8   :  { %6423 = vmatmul.mubr.msk.f32.gmra.mrb[130].mxu1 %vm892_vm5, %v3473_v62 }
 0x8e5   :  { %v5215_v30 = vpop.permute.xlu0 %5214 }
 0x8e6   :  { %v9016_v12 = vsel %vm70_vm1, %v5221_v44, %v5215_v30  ;;  %vm5223_vm1 = vcmask 56320  }
 0x8e9   :  { %v5035_v16 = vpop.permute.xlu0 %5034 }
 0x8ea   :  { %v5135_v38 = vsel %vm892_vm5, %v9443_v50, %v5035_v16 }
 0x8eb   :  { %v5168_v2 = vsel %vm5139_vm8, %v5135_v38, 0.0 }
 0x8ec   :  { %5200 = vst [vmem:[%s9282_s3 + $0xe0] sm:$0xff] %v5168_v2 }
 0x8ed   :  { %v5039_v40 = vpop.permute.xlu0 %5038 }
 0x8ee   :  { %v5137_v24 = vsel %vm892_vm5, %v9444_v13, %v5039_v40 }
 0x8ef   :  { %v5170_v3 = vsel %vm5139_vm8, %v5137_v24, 0.0 }
 0x8f0   :  { %5202 = vst [vmem:[%s9282_s3 + $0xf0] sm:$0xff] %v5170_v3 }
 0x94f   :  { %v6379_v22 = vpop.f32.mrb[100].mxu1 }
 0x950   :  { %v3651_v4 = vadd.f32 %v6379_v22, %v9030_v54  ;;  %v3645_v29 = vpop.f32.mrb[101].mxu1 }
 0x951   :  { %v3646_v51 = vadd.f32 %v9030_v54, %v3645_v29 }
 0x952   :  { %v3805_v27 = vmax.f32 %v3651_v4, 0.0 }
 0x953   :  { %v3804_v42 = vmax.f32 %v3646_v51, 0.0  ;;  %v6382_v36 = vpop.f32.mrb[102].mxu1 }
 0x954   :  { %v3661_v21 = vadd.f32 %v6382_v36, %v9030_v54  ;;  %v3655_v58 = vpop.f32.mrb[103].mxu1 }
 0x955   :  { %v3656_v61 = vadd.f32 %v9030_v54, %v3655_v58  ;;  %6433 = vmatprep.mubr.msk.f32.mxu0 %vm437_vm2, %v3804_v42 }
 0x956   :  { %6434 = vmatmul.mubr.msk.f32.vlgmr.msra.gmra.mrb[100].mxu0 %vm437_vm2, %v3805_v27  ;;  %v3807_v14 = vmax.f32 %v3661_v21, 0.0 }
 0x957   :  { %v3806_v31 = vmax.f32 %v3656_v61, 0.0  ;;  %v6385_v0 = vpop.f32.mrb[104].mxu1 }
 0x958   :  { %v3671_v18 = vadd.f32 %v6385_v0, %v9030_v54  ;;  %v3665_v52 = vpop.f32.mrb[105].mxu1 }
 0x959   :  { %v3666_v1 = vadd.f32 %v9030_v54, %v3665_v52  ;;  %6436 = vmatprep.mubr.msk.f32.mxu0 %vm437_vm2, %v3806_v31 }
 0x95a   :  { %6437 = vmatmul.mubr.msk.f32.gmra.mrb[102].mxu0 %vm437_vm2, %v3807_v14  ;;  %v3809_v26 = vmax.f32 %v3671_v18, 0.0 }
 0x95b   :  { %v3808_v37 = vmax.f32 %v3666_v1, 0.0  ;;  %v6388_v7 = vpop.f32.mrb[106].mxu1 }
 0x95c   :  { %v3681_v5 = vadd.f32 %v6388_v7, %v9030_v54  ;;  %v3675_v56 = vpop.f32.mrb[107].mxu1 }
 0x95d   :  { %v3676_v62 = vadd.f32 %v9030_v54, %v3675_v56  ;;  %6439 = vmatprep.mubr.msk.f32.mxu0 %vm437_vm2, %v3808_v37 }
 0x95e   :  { %6440 = vmatmul.mubr.msk.f32.gmra.mrb[104].mxu0 %vm437_vm2, %v3809_v26  ;;  %v3811_v41 = vmax.f32 %v3681_v5, 0.0 }
 0x95f   :  { %v3810_v63 = vmax.f32 %v3676_v62, 0.0  ;;  %v6391_v34 = vpop.f32.mrb[108].mxu1 }
 0x960   :  { %v3691_v44 = vadd.f32 %v6391_v34, %v9030_v54  ;;  %v3685_v30 = vpop.f32.mrb[109].mxu1 }
 0x961   :  { %v3686_v16 = vadd.f32 %v9030_v54, %v3685_v30  ;;  %6442 = vmatprep.mubr.msk.f32.mxu0 %vm437_vm2, %v3810_v63 }
 0x962   :  { %6443 = vmatmul.mubr.msk.f32.gmra.mrb[106].mxu0 %vm437_vm2, %v3811_v41  ;;  %v3813_v2 = vmax.f32 %v3691_v44, 0.0 }
 0x963   :  { %v3812_v50 = vmax.f32 %v3686_v16, 0.0  ;;  %v6394_v38 = vpop.f32.mrb[110].mxu1 }
 0x964   :  { %v3701_v40 = vadd.f32 %v6394_v38, %v9030_v54  ;;  %v3695_v13 = vpop.f32.mrb[111].mxu1 }
 0x965   :  { %v3696_v24 = vadd.f32 %v9030_v54, %v3695_v13  ;;  %6445 = vmatprep.mubr.msk.f32.mxu0 %vm437_vm2, %v3812_v50 }
 0x966   :  { %6446 = vmatmul.mubr.msk.f32.gmra.mrb[108].mxu0 %vm437_vm2, %v3813_v2  ;;  %v3815_v25 = vmax.f32 %v3701_v40, 0.0 }
 0x967   :  { %v3814_v3 = vmax.f32 %v3696_v24, 0.0  ;;  %v6397_v35 = vpop.f32.mrb[112].mxu1 }
 0x968   :  { %v3711_v55 = vadd.f32 %v6397_v35, %v9030_v54  ;;  %v3705_v9 = vpop.f32.mrb[113].mxu1 }
 0x969   :  { %v3706_v49 = vadd.f32 %v9030_v54, %v3705_v9  ;;  %6448 = vmatprep.mubr.msk.f32.mxu0 %vm437_vm2, %v3814_v3 }
 0x96a   :  { %6449 = vmatmul.mubr.msk.f32.gmra.mrb[110].mxu0 %vm437_vm2, %v3815_v25  ;;  %v3817_v11 = vmax.f32 %v3711_v55, 0.0 }
 0x96b   :  { %v3816_v47 = vmax.f32 %v3706_v49, 0.0  ;;  %v6400_v19 = vpop.f32.mrb[114].mxu1 }
 0x96c   :  { %v3721_v6 = vadd.f32 %v6400_v19, %v9030_v54  ;;  %v3715_v32 = vpop.f32.mrb[115].mxu1 }
 0x96d   :  { %v3716_v33 = vadd.f32 %v9030_v54, %v3715_v32  ;;  %6451 = vmatprep.mubr.msk.f32.mxu0 %vm437_vm2, %v3816_v47 }
 0x96e   :  { %6452 = vmatmul.mubr.msk.f32.gmra.mrb[112].mxu0 %vm437_vm2, %v3817_v11  ;;  %v3819_v4 = vmax.f32 %v3721_v6, 0.0 }
 0x96f   :  { %v3818_v46 = vmax.f32 %v3716_v33, 0.0  ;;  %v6403_v22 = vpop.f32.mrb[116].mxu1 }
 0x970   :  { %v3731_v29 = vadd.f32 %v6403_v22, %v9030_v54  ;;  %v3725_v51 = vpop.f32.mrb[117].mxu1 }
 0x971   :  { %v3726_v42 = vadd.f32 %v9030_v54, %v3725_v51  ;;  %6454 = vmatprep.mubr.msk.f32.mxu0 %vm437_vm2, %v3818_v46 }
 0x972   :  { %6455 = vmatmul.mubr.msk.f32.gmra.mrb[114].mxu0 %vm437_vm2, %v3819_v4  ;;  %v3821_v21 = vmax.f32 %v3731_v29, 0.0  ;;  %v4654_v29 = vld [vmem:[#allocation2 + $0x118] sm:$0x7] }
 0x973   :  { %v3820_v36 = vmax.f32 %v3726_v42, 0.0  ;;  %v6406_v27 = vpop.f32.mrb[118].mxu1  ;;  %6546 = vmatpush3.msk.msra.mxu0 %vm895_vm3, %v4654_v29  ;;  %vm5225_vm3 = vcmask 244736  }
 0x974   :  { %v3741_v58 = vadd.f32 %v6406_v27, %v9030_v54  ;;  %v3735_v61 = vpop.f32.mrb[119].mxu1  ;;  %6701 = vmatprep.subr.bf16.mxu0 %v9398_v48 }
 0x975   :  { %v3736_v31 = vadd.f32 %v9030_v54, %v3735_v61  ;;  %6457 = vmatprep.mubr.msk.f32.mxu0 %vm437_vm2, %v3820_v36 }
 0x976   :  { %6458 = vmatmul.mubr.msk.f32.gmra.mrb[116].mxu0 %vm437_vm2, %v3821_v21  ;;  %v3823_v18 = vmax.f32 %v3741_v58, 0.0 }
 0x977   :  { %v3822_v0 = vmax.f32 %v3736_v31, 0.0  ;;  %v6409_v14 = vpop.f32.mrb[120].mxu1 }
 0x978   :  { %v3751_v52 = vadd.f32 %v6409_v14, %v9030_v54  ;;  %v3745_v1 = vpop.f32.mrb[121].mxu1 }
 0x979   :  { %v3746_v37 = vadd.f32 %v9030_v54, %v3745_v1  ;;  %6460 = vmatprep.mubr.msk.f32.mxu0 %vm437_vm2, %v3822_v0 }
 0x97a   :  { %6461 = vmatmul.mubr.msk.f32.gmra.mrb[118].mxu0 %vm437_vm2, %v3823_v18  ;;  %v3825_v5 = vmax.f32 %v3751_v52, 0.0 }
 0x97b   :  { %v3824_v7 = vmax.f32 %v3746_v37, 0.0  ;;  %v6412_v26 = vpop.f32.mrb[122].mxu1 }
 0x97c   :  { %v3761_v56 = vadd.f32 %v6412_v26, %v9030_v54  ;;  %v3755_v62 = vpop.f32.mrb[123].mxu1 }
 0x97d   :  { %v3756_v63 = vadd.f32 %v9030_v54, %v3755_v62  ;;  %6463 = vmatprep.mubr.msk.f32.mxu0 %vm437_vm2, %v3824_v7 }
 0x97e   :  { %6464 = vmatmul.mubr.msk.f32.gmra.mrb[120].mxu0 %vm437_vm2, %v3825_v5  ;;  %v3827_v44 = vmax.f32 %v3761_v56, 0.0 }
 0x97f   :  { %v3826_v34 = vmax.f32 %v3756_v63, 0.0  ;;  %v6415_v41 = vpop.f32.mrb[124].mxu1 }
 0x980   :  { %v3771_v30 = vadd.f32 %v6415_v41, %v9030_v54  ;;  %v3765_v16 = vpop.f32.mrb[125].mxu1 }
 0x981   :  { %v3766_v50 = vadd.f32 %v9030_v54, %v3765_v16  ;;  %6466 = vmatprep.mubr.msk.f32.mxu0 %vm437_vm2, %v3826_v34 }
 0x982   :  { %6467 = vmatmul.mubr.msk.f32.gmra.mrb[122].mxu0 %vm437_vm2, %v3827_v44  ;;  %v3829_v40 = vmax.f32 %v3771_v30, 0.0 }
 0x983   :  { %v3828_v38 = vmax.f32 %v3766_v50, 0.0  ;;  %v6418_v2 = vpop.f32.mrb[126].mxu1 }
 0x984   :  { %v3781_v13 = vadd.f32 %v6418_v2, %v9030_v54  ;;  %v3775_v24 = vpop.f32.mrb[127].mxu1 }
 0x985   :  { %v3776_v3 = vadd.f32 %v9030_v54, %v3775_v24  ;;  %6469 = vmatprep.mubr.msk.f32.mxu0 %vm437_vm2, %v3828_v38 }
 0x986   :  { %6470 = vmatmul.mubr.msk.f32.gmra.mrb[124].mxu0 %vm437_vm2, %v3829_v40  ;;  %v3831_v55 = vmax.f32 %v3781_v13, 0.0 }
 0x987   :  { %v3830_v35 = vmax.f32 %v3776_v3, 0.0  ;;  %v6421_v25 = vpop.f32.mrb[128].mxu1 }
 0x988   :  { %v3791_v9 = vadd.f32 %v6421_v25, %v9030_v54  ;;  %v3785_v49 = vpop.f32.mrb[129].mxu1 }
 0x989   :  { %v3786_v47 = vadd.f32 %v9030_v54, %v3785_v49  ;;  %6472 = vmatprep.mubr.msk.f32.mxu0 %vm437_vm2, %v3830_v35 }
 0x98a   :  { %6473 = vmatmul.mubr.msk.f32.gmra.mrb[126].mxu0 %vm437_vm2, %v3831_v55  ;;  %v3833_v6 = vmax.f32 %v3791_v9, 0.0 }
 0x98b   :  { %v3832_v19 = vmax.f32 %v3786_v47, 0.0  ;;  %v6424_v11 = vpop.f32.mrb[130].mxu1 }
 0x98c   :  { %v3801_v32 = vadd.f32 %v6424_v11, %v9030_v54  ;;  %v3795_v33 = vpop.f32.mrb[131].mxu1 }
 0x98d   :  { %v3796_v46 = vadd.f32 %v9030_v54, %v3795_v33  ;;  %6475 = vmatprep.mubr.msk.f32.mxu0 %vm437_vm2, %v3832_v19  ;;  %v9104_v54 = vld [vmem:[#allocation2 + $0x8] ss:$0 sm:$0xff] }
 0x98e   :  { %6476 = vmatmul.mubr.msk.f32.gmra.mrb[128].mxu0 %vm437_vm2, %v3833_v6  ;;  %v3835_v4 = vmax.f32 %v3801_v32, 0.0 }
 0x98f   :  { %v3834_v22 = vmax.f32 %v3796_v46, 0.0 }
 0x991   :  { %6478 = vmatprep.mubr.msk.f32.mxu0 %vm437_vm2, %v3834_v22 }
 0x992   :  { %6479 = vmatmul.mubr.msk.f32.gmra.mrb[130].mxu0 %vm437_vm2, %v3835_v4 }
 0x993   :  { %6547 = vmatprep.mubr.msk.f32.mxu0 %vm6869_vm4, %v9363_v10 }
 0x996   :  { %6548 = vmatmul.mubr.msk.f32.vlgmr.msra.gmra.mrb[132].mxu0 %vm892_vm5, %v9410_v57 }
 0x997   :  { %6582 = vmatprep.mubr.msk.f32.mxu0 %vm6869_vm4, %v9363_v10 }
 0xa29   :  { %v6435_v51 = vpop.f32.mrb[100].mxu0 }
 0xa2a   :  { %v4013_v42 = vadd.f32 %v6435_v51, %v9104_v54  ;;  %v4007_v36 = vpop.f32.mrb[101].mxu0 }
 0xa2b   :  { %v4008_v27 = vadd.f32 %v9104_v54, %v4007_v36 }
 0xa2c   :  { %v4167_v61 = vmax.f32 %v4013_v42, 0.0 }
 0xa2d   :  { %v4166_v21 = vmax.f32 %v4008_v27, 0.0  ;;  %v6438_v58 = vpop.f32.mrb[102].mxu0 }
 0xa2e   :  { %v4023_v31 = vadd.f32 %v6438_v58, %v9104_v54  ;;  %v4017_v0 = vpop.f32.mrb[103].mxu0 }
 0xa2f   :  { %v4018_v57 = vadd.f32 %v9104_v54, %v4017_v0  ;;  %6497 = vmatprep.mubr.msk.f32.mxu1 %vm791_vm6, %v4166_v21 }
 0xa30   :  { %6498 = vmatmul.mubr.msk.f32.vlgmr.msra.gmra.mrb[132].mxu1 %vm791_vm6, %v4167_v61  ;;  %v4169_v52 = vmax.f32 %v4023_v31, 0.0 }
 0xa31   :  { %v4168_v14 = vmax.f32 %v4018_v57, 0.0  ;;  %v6441_v18 = vpop.f32.mrb[104].mxu0 }
 0xa32   :  { %v4033_v1 = vadd.f32 %v6441_v18, %v9104_v54  ;;  %v4027_v37 = vpop.f32.mrb[105].mxu0 }
 0xa33   :  { %v4028_v7 = vadd.f32 %v9104_v54, %v4027_v37  ;;  %6500 = vmatprep.mubr.msk.f32.mxu1 %vm791_vm6, %v4168_v14 }
 0xa34   :  { %6501 = vmatmul.mubr.msk.f32.gmra.mrb[134].mxu1 %vm791_vm6, %v4169_v52  ;;  %v4171_v56 = vmax.f32 %v4033_v1, 0.0 }
 0xa35   :  { %v4170_v26 = vmax.f32 %v4028_v7, 0.0  ;;  %v6444_v5 = vpop.f32.mrb[106].mxu0 }
 0xa36   :  { %v4043_v62 = vadd.f32 %v6444_v5, %v9104_v54  ;;  %v4037_v63 = vpop.f32.mrb[107].mxu0 }
 0xa37   :  { %v4038_v34 = vadd.f32 %v9104_v54, %v4037_v63  ;;  %6503 = vmatprep.mubr.msk.f32.mxu1 %vm791_vm6, %v4170_v26 }
 0xa38   :  { %6504 = vmatmul.mubr.msk.f32.gmra.mrb[136].mxu1 %vm791_vm6, %v4171_v56  ;;  %v4173_v30 = vmax.f32 %v4043_v62, 0.0 }
 0xa39   :  { %v4172_v41 = vmax.f32 %v4038_v34, 0.0  ;;  %v6447_v44 = vpop.f32.mrb[108].mxu0 }
 0xa3a   :  { %v4053_v16 = vadd.f32 %v6447_v44, %v9104_v54  ;;  %v4047_v50 = vpop.f32.mrb[109].mxu0 }
 0xa3b   :  { %v4048_v38 = vadd.f32 %v9104_v54, %v4047_v50  ;;  %6506 = vmatprep.mubr.msk.f32.mxu1 %vm791_vm6, %v4172_v41 }
 0xa3c   :  { %6507 = vmatmul.mubr.msk.f32.gmra.mrb[138].mxu1 %vm791_vm6, %v4173_v30  ;;  %v4175_v13 = vmax.f32 %v4053_v16, 0.0 }
 0xa3d   :  { %v4174_v2 = vmax.f32 %v4048_v38, 0.0  ;;  %v6450_v40 = vpop.f32.mrb[110].mxu0 }
 0xa3e   :  { %v4063_v24 = vadd.f32 %v6450_v40, %v9104_v54  ;;  %v4057_v3 = vpop.f32.mrb[111].mxu0 }
 0xa3f   :  { %v4058_v35 = vadd.f32 %v9104_v54, %v4057_v3  ;;  %6509 = vmatprep.mubr.msk.f32.mxu1 %vm791_vm6, %v4174_v2 }
 0xa40   :  { %6510 = vmatmul.mubr.msk.f32.gmra.mrb[140].mxu1 %vm791_vm6, %v4175_v13  ;;  %v4177_v9 = vmax.f32 %v4063_v24, 0.0 }
 0xa41   :  { %v4176_v25 = vmax.f32 %v4058_v35, 0.0  ;;  %v6453_v55 = vpop.f32.mrb[112].mxu0 }
 0xa42   :  { %v4073_v49 = vadd.f32 %v6453_v55, %v9104_v54  ;;  %v4067_v47 = vpop.f32.mrb[113].mxu0 }
 0xa43   :  { %v4068_v19 = vadd.f32 %v9104_v54, %v4067_v47  ;;  %6512 = vmatprep.mubr.msk.f32.mxu1 %vm791_vm6, %v4176_v25 }
 0xa44   :  { %6513 = vmatmul.mubr.msk.f32.gmra.mrb[142].mxu1 %vm791_vm6, %v4177_v9  ;;  %v4179_v32 = vmax.f32 %v4073_v49, 0.0 }
 0xa45   :  { %v4178_v11 = vmax.f32 %v4068_v19, 0.0  ;;  %v6456_v6 = vpop.f32.mrb[114].mxu0 }
 0xa46   :  { %v4083_v33 = vadd.f32 %v6456_v6, %v9104_v54  ;;  %v4077_v46 = vpop.f32.mrb[115].mxu0 }
 0xa47   :  { %v4078_v22 = vadd.f32 %v9104_v54, %v4077_v46  ;;  %6515 = vmatprep.mubr.msk.f32.mxu1 %vm791_vm6, %v4178_v11 }
 0xa48   :  { %6516 = vmatmul.mubr.msk.f32.gmra.mrb[144].mxu1 %vm791_vm6, %v4179_v32  ;;  %v4181_v51 = vmax.f32 %v4083_v33, 0.0 }
 0xa49   :  { %v4180_v4 = vmax.f32 %v4078_v22, 0.0  ;;  %v6459_v29 = vpop.f32.mrb[116].mxu0 }
 0xa4a   :  { %v4093_v42 = vadd.f32 %v6459_v29, %v9104_v54  ;;  %v4087_v36 = vpop.f32.mrb[117].mxu0 }
 0xa4b   :  { %v4088_v27 = vadd.f32 %v9104_v54, %v4087_v36  ;;  %6518 = vmatprep.mubr.msk.f32.mxu1 %vm791_vm6, %v4180_v4 }
 0xa4c   :  { %6519 = vmatmul.mubr.msk.f32.gmra.mrb[146].mxu1 %vm791_vm6, %v4181_v51  ;;  %v4183_v61 = vmax.f32 %v4093_v42, 0.0  ;;  %v4638_v51 = vld [vmem:[#allocation2 + $0x98] sm:$0xff]  ;;  %v4639_v42 = vld [vmem:[#allocation2 + $0xa0] sm:$0xff] }
 0xa4d   :  { %v4182_v21 = vmax.f32 %v4088_v27, 0.0  ;;  %v6462_v58 = vpop.f32.mrb[118].mxu0  ;;  %v6702_v36 = vpack.c.bf16 %v4639_v42, %v4638_v51  ;;  %v4640_v27 = vld [vmem:[#allocation2 + $0xa8] sm:$0xff] }
 0xa4e   :  { %v4103_v31 = vadd.f32 %v6462_v58, %v9104_v54  ;;  %v4097_v0 = vpop.f32.mrb[119].mxu0 }
 0xa4f   :  { %v4098_v57 = vadd.f32 %v9104_v54, %v4097_v0  ;;  %6521 = vmatprep.mubr.msk.f32.mxu1 %vm791_vm6, %v4182_v21  ;;  %6703 = vmatpush3.bf16.msra.mxu0 %v6702_v36  ;;  %v4641_v21 = vld [vmem:[#allocation2 + $0xb0] sm:$0xff]  ;;  %v4644_v0 = vld [vmem:[#allocation2 + $0xc8] sm:$0xff] }
 0xa50   :  { %6522 = vmatmul.mubr.msk.f32.gmra.mrb[148].mxu1 %vm791_vm6, %v4183_v61  ;;  %v4185_v52 = vmax.f32 %v4103_v31, 0.0  ;;  %6704 = vmatprep.subr.bf16.mxu0 %v9398_v48  ;;  %v6705_v58 = vpack.c.bf16 %v4641_v21, %v4640_v27  ;;  %v4643_v61 = vld [vmem:[#allocation2 + $0xc0] sm:$0xff]  ;;  %v9445_v27 = vld [vmem:[#allocation24_spill] sm:$0xff] }
 0xa51   :  { %v4184_v14 = vmax.f32 %v4098_v57, 0.0  ;;  %v6465_v18 = vpop.f32.mrb[120].mxu0  ;;  %v4645_v57 = vld [vmem:[#allocation2 + $0xd0] sm:$0xff] }
 0xa52   :  { %v4113_v1 = vadd.f32 %v6465_v18, %v9104_v54  ;;  %v4107_v37 = vpop.f32.mrb[121].mxu0  ;;  %v6711_v18 = vpack.c.bf16 %v4645_v57, %v4644_v0 }
 0xa53   :  { %v4108_v7 = vadd.f32 %v9104_v54, %v4107_v37  ;;  %6524 = vmatprep.mubr.msk.f32.mxu1 %vm791_vm6, %v4184_v14  ;;  %6706 = vmatpush3.bf16.msra.mxu0 %v6705_v58  ;;  %v4646_v14 = vld [vmem:[#allocation2 + $0xd8] sm:$0xff]  ;;  %v4648_v37 = vld [vmem:[#allocation2 + $0xe8] sm:$0xff] }
 0xa54   :  { %6525 = vmatmul.mubr.msk.f32.gmra.mrb[150].mxu1 %vm791_vm6, %v4185_v52  ;;  %v4187_v56 = vmax.f32 %v4113_v1, 0.0  ;;  %6707 = vmatprep.subr.bf16.mxu0 %v9398_v48  ;;  %v4647_v52 = vld [vmem:[#allocation2 + $0xe0] sm:$0xff] }
 0xa55   :  { %v4186_v26 = vmax.f32 %v4108_v7, 0.0  ;;  %v6468_v5 = vpop.f32.mrb[122].mxu0  ;;  %v6714_v1 = vpack.c.bf16 %v4647_v52, %v4646_v14  ;;  %v4649_v7 = vld [vmem:[#allocation2 + $0xf0] sm:$0xff]  ;;  %v9447_v14 = vld [vmem:[#allocation26_spill] sm:$0xff] }
 0xa56   :  { %v4123_v62 = vadd.f32 %v6468_v5, %v9104_v54  ;;  %v4117_v63 = vpop.f32.mrb[123].mxu0  ;;  %v4650_v5 = vld [vmem:[#allocation2 + $0xf8] sm:$0xff] }
 0xa57   :  { %v4118_v34 = vadd.f32 %v9104_v54, %v4117_v63  ;;  %6527 = vmatprep.mubr.msk.f32.mxu1 %vm791_vm6, %v4186_v26  ;;  %v6717_v26 = vpack.c.bf16 %v4649_v7, %v4648_v37  ;;  %v9448_v37 = vld [vmem:[#allocation25_spill] sm:$0xff] }
 0xa58   :  { %6528 = vmatmul.mubr.msk.f32.gmra.mrb[152].mxu1 %vm791_vm6, %v4187_v56  ;;  %v4189_v30 = vmax.f32 %v4123_v62, 0.0  ;;  %v4651_v56 = vld [vmem:[#allocation2 + $0x100] sm:$0xff] }
 0xa59   :  { %v4188_v41 = vmax.f32 %v4118_v34, 0.0  ;;  %v6471_v44 = vpop.f32.mrb[124].mxu0  ;;  %v6720_v34 = vpack.c.bf16 %v4651_v56, %v4650_v5 }
 0xa5a   :  { %v4133_v16 = vadd.f32 %v6471_v44, %v9104_v54  ;;  %v4127_v50 = vpop.f32.mrb[125].mxu0  ;;  %v4653_v44 = vld [vmem:[#allocation2 + $0x110] sm:$0xff] }
 0xa5b   :  { %v4128_v38 = vadd.f32 %v9104_v54, %v4127_v50  ;;  %6530 = vmatprep.mubr.msk.f32.mxu1 %vm791_vm6, %v4188_v41  ;;  %v4652_v41 = vld [vmem:[#allocation2 + $0x108] sm:$0xff] }
 0xa5c   :  { %6531 = vmatmul.mubr.msk.f32.gmra.mrb[154].mxu1 %vm791_vm6, %v4189_v30  ;;  %v4191_v13 = vmax.f32 %v4133_v16, 0.0  ;;  %v6723_v30 = vpack.c.bf16 %v4653_v44, %v4652_v41  ;;  %v9180_v16 = vld [vmem:[#allocation2 + $0x10] ss:$0 sm:$0xff]  ;;  %v9449_v44 = vld [vmem:[#allocation28_spill] sm:$0xff] }
 0xa5d   :  { %v4190_v2 = vmax.f32 %v4128_v38, 0.0  ;;  %v6474_v40 = vpop.f32.mrb[126].mxu0 }
 0xa5e   :  { %v4143_v24 = vadd.f32 %v6474_v40, %v9104_v54  ;;  %v4137_v3 = vpop.f32.mrb[127].mxu0 }
 0xa5f   :  { %v4138_v35 = vadd.f32 %v9104_v54, %v4137_v3  ;;  %6533 = vmatprep.mubr.msk.f32.mxu1 %vm791_vm6, %v4190_v2 }
 0xa60   :  { %6534 = vmatmul.mubr.msk.f32.gmra.mrb[156].mxu1 %vm791_vm6, %v4191_v13  ;;  %v4193_v9 = vmax.f32 %v4143_v24, 0.0 }
 0xa61   :  { %v4192_v25 = vmax.f32 %v4138_v35, 0.0  ;;  %v6477_v55 = vpop.f32.mrb[128].mxu0 }
 0xa62   :  { %v4153_v49 = vadd.f32 %v6477_v55, %v9104_v54  ;;  %v4147_v47 = vpop.f32.mrb[129].mxu0 }
 0xa63   :  { %v4148_v19 = vadd.f32 %v9104_v54, %v4147_v47  ;;  %6536 = vmatprep.mubr.msk.f32.mxu1 %vm791_vm6, %v4192_v25 }
 0xa64   :  { %6537 = vmatmul.mubr.msk.f32.gmra.mrb[158].mxu1 %vm791_vm6, %v4193_v9  ;;  %v4195_v32 = vmax.f32 %v4153_v49, 0.0 }
 0xa65   :  { %v4194_v11 = vmax.f32 %v4148_v19, 0.0  ;;  %v6480_v6 = vpop.f32.mrb[130].mxu0 }
 0xa66   :  { %v4163_v33 = vadd.f32 %v6480_v6, %v9104_v54  ;;  %v4157_v46 = vpop.f32.mrb[131].mxu0 }
 0xa67   :  { %v4158_v22 = vadd.f32 %v9104_v54, %v4157_v46  ;;  %6539 = vmatprep.mubr.msk.f32.mxu1 %vm791_vm6, %v4194_v11  ;;  %v4642_v54 = vld [vmem:[#allocation2 + $0xb8] sm:$0xff] }
 0xa68   :  { %6540 = vmatmul.mubr.msk.f32.gmra.mrb[160].mxu1 %vm791_vm6, %v4195_v32  ;;  %v4197_v29 = vmax.f32 %v4163_v33, 0.0  ;;  %v6708_v31 = vpack.c.bf16 %v4643_v61, %v4642_v54 }
 0xa69   :  { %v4196_v4 = vmax.f32 %v4158_v22, 0.0  ;;  %v9175_v62 = vpop.f32.mrb[132].mxu0 }
 0xa6a   :  { %6709 = vmatpush3.bf16.msra.mxu0 %v6708_v31  ;;  %v6549_v63 = vpop.f32.mrb[133].mxu0 }
 0xa6b   :  { %6542 = vmatprep.mubr.msk.f32.mxu1 %vm791_vm6, %v4196_v4  ;;  %6710 = vmatprep.subr.bf16.mxu0 %v9398_v48 }
 0xa6c   :  { %6543 = vmatmul.mubr.msk.f32.gmra.mrb[162].mxu1 %vm791_vm6, %v4197_v29 }
 0xa6e   :  { %6712 = vmatpush3.bf16.msra.mxu0 %v6711_v18 }
 0xa6f   :  { %6713 = vmatprep.subr.bf16.mxu0 %v9398_v48 }
 0xa72   :  { %6715 = vmatpush3.bf16.msra.mxu0 %v6714_v1 }
 0xa73   :  { %6716 = vmatprep.subr.bf16.mxu0 %v9398_v48 }
 0xa76   :  { %6718 = vmatpush3.bf16.msra.mxu0 %v6717_v26 }
 0xa77   :  { %6719 = vmatprep.subr.bf16.mxu0 %v9398_v48 }
 0xa7a   :  { %6721 = vmatpush3.bf16.msra.mxu0 %v6720_v34 }
 0xa7b   :  { %6722 = vmatprep.subr.bf16.mxu0 %v9398_v48 }
 0xa7e   :  { %6724 = vmatpush3.bf16.msra.mxu0 %v6723_v30 }
 0xa7f   :  { %6725 = vmatprep.subr.bf16.mxu0 %v9398_v48 }
 0xb03   :  { %v6499_v50 = vpop.f32.mrb[132].mxu1 }
 0xb04   :  { %v4379_v38 = vadd.f32 %v6499_v50, %v9180_v16  ;;  %v4373_v2 = vpop.f32.mrb[133].mxu1 }
 0xb05   :  { %v4374_v40 = vadd.f32 %v9180_v16, %v4373_v2  ;;  %v9450_v2 = vld [vmem:[#allocation27_spill] sm:$0xff] }
 0xb06   :  { %v4533_v24 = vmax.f32 %v4379_v38, 0.0 }
 0xb07   :  { %v6502_v13 = vpop.f32.mrb[134].mxu1  ;;  %v4532_v25 = vmax.f32 %v4374_v40, 0.0 }
 0xb08   :  { %v4389_v3 = vadd.f32 %v6502_v13, %v9180_v16  ;;  %v4383_v35 = vpop.f32.mrb[135].mxu1  ;;  %v4565_v19 = vmul.f32 %v8014_v8, %v4533_v24 }
 0xb09   :  { %v4384_v55 = vadd.f32 %v9180_v16, %v4383_v35  ;;  %v4564_v33 = vmul.f32 %v8016_v15, %v4532_v25 }
 0xb0a   :  { %v4535_v9 = vmax.f32 %v4389_v3, 0.0 }
 0xb0b   :  { %v4534_v49 = vmax.f32 %v4384_v55, 0.0  ;;  %v6505_v47 = vpop.f32.mrb[136].mxu1 }
 0xb0c   :  { %v4567_v11 = vmul.f32 %v8036_v23, %v4535_v9  ;;  %v4399_v6 = vadd.f32 %v6505_v47, %v9180_v16  ;;  %v4393_v32 = vpop.f32.mrb[137].mxu1  ;;  %v9446_v23 = vld [vmem:[#allocation22_spill] sm:$0xff] }
 0xb0d   :  { %v4566_v46 = vmul.f32 %v9411_v60, %v4534_v49  ;;  %v4394_v22 = vadd.f32 %v9180_v16, %v4393_v32  ;;  %v9451_v9 = vld [vmem:[#allocation30_spill] sm:$0xff] }
 0xb0e   :  { %v4597_v4 = vmax.f32 %v4565_v19, %v4567_v11  ;;  %v4537_v29 = vmax.f32 %v4399_v6, 0.0  ;;  %v9452_v11 = vld [vmem:[#allocation29_spill] sm:$0xff] }
 0xb0f   :  { %v4596_v51 = vmax.f32 %v4564_v33, %v4566_v46  ;;  %v4536_v42 = vmax.f32 %v4394_v22, 0.0  ;;  %v6508_v36 = vpop.f32.mrb[138].mxu1 }
 0xb10   :  { %v4569_v21 = vmul.f32 %v9445_v27, %v4537_v29  ;;  %v4409_v8 = vadd.f32 %v6508_v36, %v9180_v16  ;;  %v4403_v58 = vpop.f32.mrb[139].mxu1 }
 0xb11   :  { %v4568_v54 = vmul.f32 %v9446_v23, %v4536_v42  ;;  %v4404_v61 = vadd.f32 %v9180_v16, %v4403_v58 }
 0xb12   :  { %v4599_v31 = vmax.f32 %v4597_v4, %v4569_v21  ;;  %v4539_v15 = vmax.f32 %v4409_v8, 0.0  ;;  %v9454_v21 = vld [vmem:[#allocation31_spill] sm:$0xff] }
 0xb13   :  { %v4598_v0 = vmax.f32 %v4596_v51, %v4568_v54  ;;  %v4538_v60 = vmax.f32 %v4404_v61, 0.0  ;;  %v6511_v57 = vpop.f32.mrb[140].mxu1  ;;  %v9453_v51 = vld [vmem:[#allocation32_spill] sm:$0xff] }
 0xb14   :  { %v4571_v18 = vmul.f32 %v9447_v14, %v4539_v15  ;;  %v4419_v52 = vadd.f32 %v6511_v57, %v9180_v16  ;;  %v4413_v1 = vpop.f32.mrb[141].mxu1 }
 0xb15   :  { %v4570_v7 = vmul.f32 %v9448_v37, %v4538_v60  ;;  %v4414_v26 = vadd.f32 %v9180_v16, %v4413_v1 }
 0xb16   :  { %v4601_v5 = vmax.f32 %v4599_v31, %v4571_v18  ;;  %v4541_v56 = vmax.f32 %v4419_v52, 0.0  ;;  %v9456_v18 = vld [vmem:[#allocation33_spill] sm:$0xff] }
 0xb17   :  { %v4600_v63 = vmax.f32 %v4598_v0, %v4570_v7  ;;  %v4540_v34 = vmax.f32 %v4414_v26, 0.0  ;;  %v6514_v41 = vpop.f32.mrb[142].mxu1  ;;  %v9455_v0 = vld [vmem:[#allocation35_spill] sm:$0xff] }
 0xb18   :  { %v4573_v30 = vmul.f32 %v9449_v44, %v4541_v56  ;;  %v4429_v50 = vadd.f32 %v6514_v41, %v9180_v16  ;;  %v4423_v38 = vpop.f32.mrb[143].mxu1 }
 0xb19   :  { %v4572_v40 = vmul.f32 %v9450_v2, %v4540_v34  ;;  %v4424_v13 = vadd.f32 %v9180_v16, %v4423_v38  ;;  %v9457_v2 = vld [vmem:[#allocation36_spill] sm:$0xff] }
 0xb1a   :  { %v4603_v24 = vmax.f32 %v4601_v5, %v4573_v30  ;;  %v4543_v3 = vmax.f32 %v4429_v50, 0.0 }
 0xb1b   :  { %v4602_v35 = vmax.f32 %v4600_v63, %v4572_v40  ;;  %v4542_v25 = vmax.f32 %v4424_v13, 0.0  ;;  %v6517_v55 = vpop.f32.mrb[144].mxu1  ;;  %v9458_v13 = vld [vmem:[#allocation38_spill] sm:$0xff] }
 0xb1c   :  { %v4575_v49 = vmul.f32 %v9451_v9, %v4543_v3  ;;  %v4439_v47 = vadd.f32 %v6517_v55, %v9180_v16  ;;  %v4433_v19 = vpop.f32.mrb[145].mxu1  ;;  %v9460_v9 = vld [vmem:[#allocation34_spill] sm:$0xff] }
 0xb1d   :  { %v4574_v6 = vmul.f32 %v9452_v11, %v4542_v25  ;;  %v4434_v32 = vadd.f32 %v9180_v16, %v4433_v19  ;;  %v9459_v25 = vld [vmem:[#allocation37_spill] sm:$0xff] }
 0xb1e   :  { %v4605_v33 = vmax.f32 %v4603_v24, %v4575_v49  ;;  %v4545_v46 = vmax.f32 %v4439_v47, 0.0 }
 0xb1f   :  { %v4604_v22 = vmax.f32 %v4602_v35, %v4574_v6  ;;  %v4544_v4 = vmax.f32 %v4434_v32, 0.0  ;;  %v6520_v29 = vpop.f32.mrb[146].mxu1 }
 0xb20   :  { %v4577_v42 = vmul.f32 %v9453_v51, %v4545_v46  ;;  %v4449_v36 = vadd.f32 %v6520_v29, %v9180_v16  ;;  %v4443_v27 = vpop.f32.mrb[147].mxu1  ;;  %v9461_v29 = vld [vmem:[#allocation41_spill] sm:$0xff] }
 0xb21   :  { %v4576_v8 = vmul.f32 %v9454_v21, %v4544_v4  ;;  %v4444_v58 = vadd.f32 %v9180_v16, %v4443_v27 }
 0xb22   :  { %v4607_v23 = vmax.f32 %v4605_v33, %v4577_v42  ;;  %v4547_v54 = vmax.f32 %v4449_v36, 0.0 }
 0xb23   :  { %v4606_v61 = vmax.f32 %v4604_v22, %v4576_v8  ;;  %v4546_v31 = vmax.f32 %v4444_v58, 0.0  ;;  %v6523_v15 = vpop.f32.mrb[148].mxu1 }
 0xb24   :  { %v4579_v60 = vmul.f32 %v9455_v0, %v4547_v54  ;;  %v4459_v57 = vadd.f32 %v6523_v15, %v9180_v16  ;;  %v4453_v14 = vpop.f32.mrb[149].mxu1 }
 0xb25   :  { %v4578_v52 = vmul.f32 %v9456_v18, %v4546_v31  ;;  %v4454_v1 = vadd.f32 %v9180_v16, %v4453_v14 }
 0xb26   :  { %v4609_v37 = vmax.f32 %v4607_v23, %v4579_v60  ;;  %v4549_v5 = vmax.f32 %v4459_v57, 0.0 }
 0xb27   :  { %v4608_v7 = vmax.f32 %v4606_v61, %v4578_v52  ;;  %v6526_v26 = vpop.f32.mrb[150].mxu1  ;;  %v4548_v41 = vmax.f32 %v4454_v1, 0.0 }
 0xb28   :  { %v4469_v56 = vadd.f32 %v6526_v26, %v9180_v16  ;;  %v4463_v63 = vpop.f32.mrb[151].mxu1  ;;  %v4581_v40 = vmul.f32 %v9457_v2, %v4549_v5 }
 0xb29   :  { %v9217_v34 = vmax.f32 %v4608_v7, %v4609_v37  ;;  %v4464_v44 = vadd.f32 %v9180_v16, %v4463_v63  ;;  %v4580_v55 = vmul.f32 %v9459_v25, %v4548_v41  ;;  %v9462_v37 = vld [vmem:[#allocation43_spill] sm:$0xff]  ;;  %v9463_v41 = vld [vmem:[#allocation42_spill] sm:$0xff] }
 0xb2a   :  { %v4551_v30 = vmax.f32 %v4469_v56, 0.0 }
 0xb2b   :  { %v4550_v50 = vmax.f32 %v4464_v44, 0.0  ;;  %v6529_v38 = vpop.f32.mrb[152].mxu1 }
 0xb2c   :  { %v4583_v24 = vmul.f32 %v4551_v30, %v9458_v13  ;;  %v4479_v3 = vadd.f32 %v6529_v38, %v9180_v16  ;;  %v4473_v35 = vpop.f32.mrb[153].mxu1 }
 0xb2d   :  { %v4582_v49 = vmul.f32 %v4550_v50, %v9460_v9  ;;  %v4474_v47 = vadd.f32 %v9180_v16, %v4473_v35  ;;  %v9464_v35 = vld [vmem:[#allocation46_spill] sm:$0xff] }
 0xb2e   :  { %v4618_v19 = vmax.f32 %v4581_v40, %v4583_v24  ;;  %v4553_v11 = vmax.f32 %v4479_v3, 0.0 }
 0xb2f   :  { %v4617_v6 = vmax.f32 %v4580_v55, %v4582_v49  ;;  %v4552_v32 = vmax.f32 %v4474_v47, 0.0  ;;  %v6532_v33 = vpop.f32.mrb[154].mxu1  ;;  %v4611_v49 = vrot.slane %v9217_v34, 4  ;;  %v9465_v47 = vld [vmem:[#allocation49_spill] sm:$0xff] }
 0xb30   :  { %v4585_v46 = vmul.f32 %v4553_v11, %v9428_v20  ;;  %v4489_v22 = vadd.f32 %v6532_v33, %v9180_v16  ;;  %v4483_v4 = vpop.f32.mrb[155].mxu1 }
 0xb31   :  { %v4584_v51 = vmul.f32 %v4552_v32, %v9461_v29  ;;  %v4484_v42 = vadd.f32 %v9180_v16, %v4483_v4  ;;  %v4612_v4 = vmax.f32 %v9217_v34, %v4611_v49  ;;  %v4812_v34 = vld [vmem:[#allocation2 + $0x138] sm:$0xff] }
 0xb32   :  { %v4620_v36 = vmax.f32 %v4618_v19, %v4585_v46  ;;  %v4555_v27 = vmax.f32 %v4489_v22, 0.0  ;;  %v9466_v46 = vld [vmem:[#allocation51_spill] sm:$0xff] }
 0xb33   :  { %v4619_v21 = vmax.f32 %v4617_v6, %v4584_v51  ;;  %v4554_v8 = vmax.f32 %v4484_v42, 0.0  ;;  %v6535_v58 = vpop.f32.mrb[156].mxu1 }
 0xb34   :  { %v4587_v23 = vmul.f32 %v4555_v27, %v9430_v45  ;;  %v4499_v54 = vadd.f32 %v6535_v58, %v9180_v16  ;;  %v4493_v61 = vpop.f32.mrb[157].mxu1 }
 0xb35   :  { %v4586_v31 = vmul.f32 %v4554_v8, %v8237_v17  ;;  %v4494_v20 = vadd.f32 %v9180_v16, %v4493_v61  ;;  %v4809_v61 = vld [vmem:[#allocation2 + $0x120] sm:$0xff] }
 0xb36   :  { %v4622_v15 = vmax.f32 %v4620_v36, %v4587_v23  ;;  %v4557_v0 = vmax.f32 %v4499_v54, 0.0  ;;  %v4613_v36 = vrot.slane %v4612_v4, 2 }
 0xb37   :  { %v4621_v60 = vmax.f32 %v4619_v21, %v4586_v31  ;;  %v4556_v57 = vmax.f32 %v4494_v20, 0.0  ;;  %v6538_v14 = vpop.f32.mrb[158].mxu1  ;;  %v4810_v31 = vld [vmem:[#allocation2 + $0x128] sm:$0xff] }
 0xb38   :  { %v4589_v18 = vmul.f32 %v4557_v0, %v8219_v39  ;;  %v4509_v52 = vadd.f32 %v6538_v14, %v9180_v16  ;;  %v4503_v1 = vpop.f32.mrb[159].mxu1  ;;  %v4614_v58 = vmax.f32 %v4612_v4, %v4613_v36 }
 0xb39   :  { %v4588_v7 = vmul.f32 %v4556_v57, %v9462_v37  ;;  %v4504_v45 = vadd.f32 %v9180_v16, %v4503_v1  ;;  %v4811_v57 = vld [vmem:[#allocation2 + $0x130] sm:$0xff] }
 0xb3a   :  { %v4624_v26 = vmax.f32 %v4622_v15, %v4589_v18  ;;  %v4559_v5 = vmax.f32 %v4509_v52, 0.0  ;;  %v4615_v54 = vrot.slane %v4614_v58, 1  ;;  %v6729_v14 = vpack.c.bf16 %v4812_v34, %v4811_v57  ;;  %v4813_v18 = vld [vmem:[#allocation2 + $0x140] sm:$0xff]  ;;  %v4814_v52 = vld [vmem:[#allocation2 + $0x148] sm:$0xff]  ;;  %v4815_v1 = vld [vmem:[#allocation2 + $0x150] sm:$0xff] }
 0xb3b   :  { %v4623_v56 = vmax.f32 %v4621_v60, %v4588_v7  ;;  %v4558_v17 = vmax.f32 %v4504_v45, 0.0  ;;  %v6541_v63 = vpop.f32.mrb[160].mxu1  ;;  %v6726_v60 = vpack.c.bf16 %v4810_v31, %v4809_v61  ;;  %v6732_v37 = vpack.c.bf16 %v4814_v52, %v4813_v18  ;;  %v4816_v7 = vld [vmem:[#allocation2 + $0x158] sm:$0xff] }
 0xb3c   :  { %v4591_v44 = vmul.f32 %v4559_v5, %v9463_v41  ;;  %v4519_v30 = vadd.f32 %v6541_v63, %v9180_v16  ;;  %v4513_v50 = vpop.f32.mrb[161].mxu1  ;;  %v4616_v15 = vmax.f32 %v4614_v58, %v4615_v54  ;;  %v6735_v45 = vpack.c.bf16 %v4816_v7, %v4815_v1  ;;  %v5606_v5 = vld [vmem:[#allocation2 + $0x18] ss:$0 sm:$0xff]  ;;  %v4896_v63 = vld [vmem:[#allocation2 + $0x160] sm:$0xff]  ;;  %v4897_v41 = vld [vmem:[#allocation2 + $0x168] sm:$0xff] }
 0xb3d   :  { %v4590_v38 = vmul.f32 %v4558_v17, %v8291_v28  ;;  %v4514_v39 = vadd.f32 %v9180_v16, %v4513_v50 }
 0xb3e   :  { %v4626_v2 = vmax.f32 %v4624_v26, %v4591_v44  ;;  %v4561_v40 = vmax.f32 %v4519_v30, 0.0  ;;  %v6738_v30 = vpack.c.bf16 %v4897_v41, %v4896_v63 }
 0xb3f   :  { %v4625_v13 = vmax.f32 %v4623_v56, %v4590_v38  ;;  %v4560_v24 = vmax.f32 %v4514_v39, 0.0  ;;  %v6544_v3 = vpop.f32.mrb[162].mxu1  ;;  %v4898_v38 = vld [vmem:[#allocation2 + $0x170] sm:$0xff]  ;;  %v4899_v39 = vld [vmem:[#allocation2 + $0x178] sm:$0xff] }
 0xb40   :  { %v4593_v25 = vmul.f32 %v4561_v40, %v9464_v35  ;;  %v4529_v55 = vadd.f32 %v6544_v3, %v9180_v16  ;;  %v4523_v9 = vpop.f32.mrb[163].mxu1  ;;  %v5607_v40 = vld [vmem:[#allocation2 + $0x20] ss:$0 sm:$0xff]  ;;  %v5609_v35 = vld [vmem:[#allocation2 + $0x28] ss:$0 sm:$0xff] }
 0xb41   :  { %v4592_v19 = vmul.f32 %v4560_v24, %v9465_v47  ;;  %v4524_v11 = vadd.f32 %v9180_v16, %v4523_v9 }
 0xb42   :  { %v4628_v6 = vmax.f32 %v4626_v2, %v4593_v25  ;;  %v4563_v28 = vmax.f32 %v4529_v55, 0.0  ;;  %v6741_v2 = vpack.c.bf16 %v4899_v39, %v4898_v38 }
 0xb43   :  { %v4627_v32 = vmax.f32 %v4625_v13, %v4592_v19  ;;  %v4562_v33 = vmax.f32 %v4524_v11, 0.0 }
 0xb44   :  { %v4595_v22 = vmul.f32 %v4563_v28, %v9466_v46 }
 0xb45   :  { %v4594_v29 = vmul.f32 %v4562_v33, %v8363_v59 }
 0xb46   :  { %v4630_v51 = vmax.f32 %v4628_v6, %v4595_v22  ;;  %v9467_v6 = vld [vmem:[#allocation21_spill] sm:$0xff] }
 0xb47   :  { %v4629_v42 = vmax.f32 %v4627_v32, %v4594_v29 }
 0xb49   :  { %v4631_v27 = vmax.f32 %v4629_v42, %v4630_v51 }
 0xb4b   :  { %v4632_v21 = vrot.slane %v4631_v27, 4 }
 0xb4d   :  { %v4633_v8 = vmax.f32 %v4631_v27, %v4632_v21 }
 0xb4f   :  { %v4634_v23 = vrot.slane %v4633_v8, 2 }
 0xb51   :  { %v4635_v16 = vmax.f32 %v4633_v8, %v4634_v23 }
 0xb53   :  { %v4636_v20 = vrot.slane %v4635_v16, 1 }
 0xb55   :  { %v4637_v0 = vmax.f32 %v4635_v16, %v4636_v20 }
 0xb57   :  { %v4730_v59 = vsel %vm971_vm7, %v4637_v0, %v4616_v15 }
 0xb58   :  { %6583 = vmatmul.mubr.f32.vlgmr.msra.gmra.mrb[134].mxu0 %v4730_v59 }
 0xb59   :  { %6727 = vmatpush3.bf16.msra.mxu0 %v6726_v60  ;;  %6601 = vmatprep.mubr.msk.f32.mxu0 %vm6869_vm4, %v9363_v10 }
 0xb5a   :  { %6728 = vmatprep.subr.bf16.mxu0 %v9398_v48 }
 0xb5d   :  { %6730 = vmatpush3.bf16.msra.mxu0 %v6729_v14 }
 0xb5e   :  { %6731 = vmatprep.subr.bf16.mxu0 %v9398_v48 }
 0xb61   :  { %6733 = vmatpush3.bf16.msra.mxu0 %v6732_v37 }
 0xb62   :  { %6734 = vmatprep.subr.bf16.mxu0 %v9398_v48 }
 0xb65   :  { %6736 = vmatpush3.bf16.msra.mxu0 %v6735_v45 }
 0xb66   :  { %6737 = vmatprep.subr.bf16.mxu0 %v9398_v48 }
 0xc2b   :  { %v4798_v26 = vpop.f32.mrb[134].mxu0 }
 0xc2c   :  { %v4799_v56 = vadd.f32 %v4798_v26, %v9175_v62  ;;  %v6584_v17 = vpop.f32.mrb[135].mxu0 }
 0xc2e   :  { %v4807_v44 = vadd.f32 %v5606_v5, %v4799_v56 }
 0xc30   :  { %v4808_v50 = vmax.f32 %v4807_v44, 0.0 }
 0xc32   :  { %6602 = vmatmul.mubr.msk.f32.vlgmr.msra.gmra.mrb[136].mxu0 %vm791_vm6, %v4808_v50 }
 0xc33   :  { %6739 = vmatpush3.bf16.msra.mxu0 %v6738_v30  ;;  %6612 = vmatprep.mubr.msk.f32.mxu0 %vm6869_vm4, %v9363_v10 }
 0xc34   :  { %6740 = vmatprep.subr.bf16.mxu0 %v9398_v48 }
 0xc37   :  { %6742 = vmatpush3.bf16.msra.mxu0 %v6741_v2 }
 0xd05   :  { %v4891_v62 = vpop.f32.mrb[136].mxu0 }
 0xd06   :  { %v4892_v13 = vadd.f32 %v5607_v40, %v4891_v62  ;;  %v6603_v24 = vpop.f32.mrb[137].mxu0 }
 0xd08   :  { %v4895_v3 = vmax.f32 %v4892_v13, 0.0 }
 0xd0a   :  { %6613 = vmatmul.mubr.msk.f32.vlgmr.msra.gmra.mrb[138].mxu0 %vm437_vm2, %v4895_v3 }
 0xddd   :  { %v4974_v25 = vpop.f32.mrb[138].mxu0 }
 0xdde   :  { %v4975_v55 = vadd.f32 %v5609_v35, %v4974_v25  ;;  %v6614_v9 = vpop.f32.mrb[139].mxu0 }
 0xde0   :  { %5218 = vrot.lane.b32.xlu1 %v4975_v55, %s6875_s5 }
 0xde4   :  { %5040 = vrot.lane.b32.xlu1 %v8571_v53, %s6873_s13 }
 0xe52   :  { %v5219_v10 = vpop.permute.xlu1 %5218 }
 0xe53   :  { %v5224_v48 = vsel %vm5223_vm1, %v9016_v12, %v5219_v10 }
 0xe54   :  { %v5226_v49 = vsel %vm5225_vm3, %v5224_v48, 0.0 }
 0xe55   :  { %v5234_v47 = vrot.slane %v5226_v49, %v9435_v43 }
 0xe56   :  { %v5041_v19 = vpop.permute.xlu1 %5040 }
 0xe57   :  { %v5235_v11 = vcombine.high %v5234_v47, %v5234_v47  ;;  %5611 = vst.sshfl [vmem:[%s9283_s4] sm:$0x1 pattern:$0x73625140] %v5234_v47  ;;  %v5138_v28 = vsel %vm892_vm5, %v9467_v6, %v5041_v19 }
 0xe58   :  { %v5171_v32 = vsel %vm5139_vm8, %v5138_v28, 0.0 }
 0xe59   :  { %5612 = vst.sshfl [vmem:[%s9283_s4 + $0x1] sm:$0x1 pattern:$0x73625140] %v5235_v11  ;;  %5203 = vst [vmem:[%s9282_s3 + $0xf8] sm:$0xff] %v5171_v32 }
 0xe5a   :  { %5262 = vsyncpa [#allocation3], 1 }

</bundles_post_ra>
